<compile_context>
chip_gen: v5e
topology: v5e:2x2
jax: 0.10.0
libtpu: 0.0.40
codegen_flags: <defaults>
</compile_context>

<pallas_src>
import functools

import jax
import jax.numpy as jnp
from jax import lax
from jax.experimental import pallas as pl
from jax.experimental.pallas import tpu as pltpu

BN_EPS = 1e-5


# --------------------------------------------------------------------------
# VMEM budgeting / tile choice
# --------------------------------------------------------------------------
def _vmem_limit_bytes():
    """Scoped-VMEM limit derived from the chip (v5e/v6e 128MiB, v7x 64MiB)."""
    cap = 64 * 1024 * 1024
    try:
        info = pltpu.get_tpu_info()
        cap = int(getattr(info, "vmem_capacity_bytes", cap))
    except Exception:
        pass
    return max(32 * 1024 * 1024, min(cap * 3 // 4, 100 * 1024 * 1024))


def _pick_row_tile(H, W, c2, c1, cout, vmem_limit, requested=None):
    """Largest multiple-of-8 divisor of H whose working set fits the budget.

    The budget accounts for: double-buffered DMA blocks (inputs + lane-dense
    outputs), the padded tile + im2col transients, and the (double-buffered)
    bf16 weight slab -- so it stays safe on v7x's 64 MiB while letting
    v5e/v6e pick much larger tiles.
    """
    if (requested is not None and 0 < requested <= H and H % requested == 0
            and (requested % 8 == 0 or requested == H)):
        return requested
    if H % 8 != 0:
        return H
    cin = c2 + c1
    im2col = 18 * cin if cin < 128 else 4 * cin           # bf16 patches vs shifted views
    dma_row = W * (4 * c2 + 2 * c1) + W * cout * (2 + 4)  # x2 f32 + x1u bf16 + y1 bf16 + y2 f32
    trans_row = W * cin * 4 + W * im2col + W * cout * 4   # padded tile + patches + f32 acc
    fixed = 4 * 9 * cin * cout * 2                        # bf16 weights, double-buffered, both convs
    budget = int(vmem_limit * 0.45) - fixed
    per_row = 2 * dma_row + trans_row
    cap = max(8, budget // max(per_row, 1))
    best = None
    for th in range(8, H + 1, 8):
        if H % th == 0 and th <= cap:
            best = th
    return best if best is not None else 8


# --------------------------------------------------------------------------
# shared 3x3 conv core (MXU)
# --------------------------------------------------------------------------
def _conv3x3_mxu(z_bf16, w_ref, TH, W, cout):
    """z_bf16: (TH+2, W+2, Cin) zero-padded tile. Returns (TH*W, cout) f32."""
    cin = z_bf16.shape[-1]
    if cin >= 128:
        # 9 accumulating matmuls on shifted views: no 9x im2col buffer, the MXU
        # is already saturated at K = Cin >= 128.
        acc = jnp.zeros((TH * W, cout), jnp.float32)
        for k in range(9):
            dy, dx = divmod(k, 3)
            tap = z_bf16[dy:dy + TH, dx:dx + W, :].reshape(TH * W, cin)
            acc = acc + jnp.dot(tap, w_ref[k * cin:(k + 1) * cin, :],
                                preferred_element_type=jnp.float32)
        return acc
    # tiny Cin: one fat-K matmul (K = 9*Cin) keeps the MXU busy.
    taps = [z_bf16[dy:dy + TH, dx:dx + W, :] for dy in range(3) for dx in range(3)]
    patches = jnp.concatenate(taps, axis=-1).reshape(TH * W, 9 * cin)
    return jnp.dot(patches, w_ref[...], preferred_element_type=jnp.float32)
    # TODO(synk): build the padded tile by writing into a VMEM scratch instead of
    # nested concatenates to cut vst slot pressure further (matters most on v5e).


# --------------------------------------------------------------------------
# kernel 1: conv1 over [x2 ++ x1_up] (concat fused) + per-tile BN1 partials
#           output is channel-major (Cout, TH*W) bf16 -> lane-dense stores
# --------------------------------------------------------------------------
def _conv1_kernel(x2_c, x2_t, x2_b, x1_c, x1_t, x1_b, w_ref, y_ref, e_ref, st_ref):
    TH, W, _ = x2_c.shape
    cout = w_ref.shape[-1]
    hb = pl.program_id(0)
    keep_top = (hb > 0).astype(jnp.float32)                       # 0 at image top
    keep_bot = (hb < pl.num_programs(0) - 1).astype(jnp.float32)  # 0 at image bottom

    # channel concat of skip (f32) and upsampled (bf16) tiles, in VMEM
    ctr = jnp.concatenate([x2_c[...], x1_c[...].astype(jnp.float32)], axis=-1)
    top = jnp.concatenate([x2_t[...], x1_t[...].astype(jnp.float32)], axis=-1) * keep_top
    bot = jnp.concatenate([x2_b[...], x1_b[...].astype(jnp.float32)], axis=-1) * keep_bot
    cin = ctr.shape[-1]
    col = jnp.concatenate([top, ctr, bot], axis=0)                 # (TH+2, W, Cin)
    zc = jnp.zeros((TH + 2, 1, cin), jnp.float32)
    z = jnp.concatenate([zc, col, zc], axis=1).astype(jnp.bfloat16)  # (TH+2, W+2, Cin) bf16

    acc = _conv3x3_mxu(z, w_ref, TH, W, cout)        # (TH*W, cout) f32
    acc_cm = jnp.transpose(acc)                      # (cout, TH*W): lane-dense slab
    y_ref[...] = acc_cm.astype(jnp.bfloat16)
    # edge rows (tile row 0 and row TH-1) for conv2's halos
    e_ref[...] = jnp.concatenate([acc_cm[:, :W], acc_cm[:, (TH - 1) * W:]],
                                 axis=1).astype(jnp.bfloat16)
    # streamed BN stats: per-tile sum and sum-of-squares (f32)
    st_ref[...] = jnp.concatenate(
        [jnp.sum(acc, axis=0, keepdims=True),
         jnp.sum(acc * acc, axis=0, keepdims=True)], axis=0)


def _run_conv1(x2, x1u, w1_flat, cout, TH, vmem_limit):
    N, H, W, C2 = x2.shape
    C1 = x1u.shape[-1]
    NHB = H // TH
    THW = TH * W

    def center(c):
        return pl.BlockSpec((None, TH, W, c), lambda hb, n: (n, hb, 0, 0))

    def halo_top(c):  # row hb*TH-1, clamped (masked in-kernel when hb == 0)
        return pl.BlockSpec((None, 1, W, c),
                            lambda hb, n: (n, jnp.maximum(hb * TH - 1, 0), 0, 0))

    def halo_bot(c):  # row hb*TH+TH, clamped (masked in-kernel when last block)
        return pl.BlockSpec((None, 1, W, c),
                            lambda hb, n: (n, jnp.minimum(hb * TH + TH, H - 1), 0, 0))

    y1, edges, stats = pl.pallas_call(
        _conv1_kernel,
        grid=(NHB, N),   # row-blocks first: that is the axis worth splitting on v7x
        in_specs=[center(C2), halo_top(C2), halo_bot(C2),
                  center(C1), halo_top(C1), halo_bot(C1),
                  pl.BlockSpec((9 * (C2 + C1), cout), lambda hb, n: (0, 0))],
        out_specs=[pl.BlockSpec((None, None, cout, THW), lambda hb, n: (n, hb, 0, 0)),
                   pl.BlockSpec((None, None, cout, 2 * W), lambda hb, n: (n, hb, 0, 0)),
                   pl.BlockSpec((None, None, 2, cout), lambda hb, n: (n, hb, 0, 0))],
        out_shape=[jax.ShapeDtypeStruct((N, NHB, cout, THW), jnp.bfloat16),
                   jax.ShapeDtypeStruct((N, NHB, cout, 2 * W), jnp.bfloat16),
                   jax.ShapeDtypeStruct((N, NHB, 2, cout), jnp.float32)],
        compiler_params=pltpu.CompilerParams(
            dimension_semantics=("parallel", "parallel"),
            vmem_limit_bytes=vmem_limit),
    )(x2, x2, x2, x1u, x1u, x1u, w1_flat)
    return y1, edges, stats


# --------------------------------------------------------------------------
# kernel 2: BN1+ReLU (global scale/shift) -> conv2 + per-tile BN2 partials
# --------------------------------------------------------------------------
def _conv2_kernel(y1_c, e_prev, e_next, a_ref, b_ref, w_ref, y2_ref, st_ref):
    C, THW = y1_c.shape
    W = e_prev.shape[-1] // 2
    TH = THW // W
    cout = w_ref.shape[-1]
    hb = pl.program_id(0)
    keep_top = (hb > 0).astype(jnp.float32)
    keep_bot = (hb < pl.num_programs(0) - 1).astype(jnp.float32)
    a = a_ref[...]   # (C, 1): broadcasts over channel-major (C, cols)
    b = b_ref[...]

    def bn_relu(v_cm):  # channel-major bf16 -> f32
        return jnp.maximum(v_cm.astype(jnp.float32) * a + b, 0.0)

    ep = e_prev[...]
    en = e_next[...]
    # conv2's zero padding lives in the *post* BN+ReLU domain -> mask after bn_relu
    ctr = jnp.transpose(bn_relu(y1_c[...])).reshape(TH, W, C)              # (TH, W, C)
    top = jnp.transpose(bn_relu(ep[:, W:]) * keep_top).reshape(1, W, C)    # prev tile row TH-1
    bot = jnp.transpose(bn_relu(en[:, :W]) * keep_bot).reshape(1, W, C)    # next tile row 0
    col = jnp.concatenate([top, ctr, bot], axis=0)                         # (TH+2, W, C)
    zc = jnp.zeros((TH + 2, 1, C), jnp.float32)
    z = jnp.concatenate([zc, col, zc], axis=1).astype(jnp.bfloat16)        # (TH+2, W+2, C)

    acc = _conv3x3_mxu(z, w_ref, TH, W, cout)          # (TH*W, cout) f32
    y2_ref[...] = jnp.transpose(acc)                   # (cout, TH*W): lane-dense store
    st_ref[...] = jnp.concatenate(
        [jnp.sum(acc, axis=0, keepdims=True),
         jnp.sum(acc * acc, axis=0, keepdims=True)], axis=0)


def _run_conv2(y1, edges, scale1, shift1, w2_flat, vmem_limit):
    N, NHB, C, THW = y1.shape
    cout = w2_flat.shape[-1]
    EW = edges.shape[-1]

    y2, stats = pl.pallas_call(
        _conv2_kernel,
        grid=(NHB, N),
        in_specs=[pl.BlockSpec((None, None, C, THW), lambda hb, n: (n, hb, 0, 0)),
                  pl.BlockSpec((None, None, C, EW),
                               lambda hb, n: (n, jnp.maximum(hb - 1, 0), 0, 0)),
                  pl.BlockSpec((None, None, C, EW),
                               lambda hb, n: (n, jnp.minimum(hb + 1, NHB - 1), 0, 0)),
                  pl.BlockSpec((C, 1), lambda hb, n: (0, 0)),
                  pl.BlockSpec((C, 1), lambda hb, n: (0, 0)),
                  pl.BlockSpec((9 * C, cout), lambda hb, n: (0, 0))],
        out_specs=[pl.BlockSpec((None, None, cout, THW), lambda hb, n: (n, hb, 0, 0)),
                   pl.BlockSpec((None, None, 2, cout), lambda hb, n: (n, hb, 0, 0))],
        out_shape=[jax.ShapeDtypeStruct((N, NHB, cout, THW), jnp.float32),
                   jax.ShapeDtypeStruct((N, NHB, 2, cout), jnp.float32)],
        compiler_params=pltpu.CompilerParams(
            dimension_semantics=("parallel", "parallel"),
            vmem_limit_bytes=vmem_limit),
    )(y1, edges, edges, scale1, shift1, w2_flat)
    return y2, stats


# --------------------------------------------------------------------------
# kernel 3: final BN2 + ReLU, fully lane-dense on (Cout, TH*W) slabs
# --------------------------------------------------------------------------
def _bn_relu_kernel(x_ref, a_ref, b_ref, o_ref):
    o_ref[...] = jnp.maximum(x_ref[...] * a_ref[...] + b_ref[...], 0.0)


def _run_bn_relu(y2, scale_cm, shift_cm, vmem_limit):
    N, NHB, C, THW = y2.shape
    return pl.pallas_call(
        _bn_relu_kernel,
        grid=(NHB, N),
        in_specs=[pl.BlockSpec((None, None, C, THW), lambda hb, n: (n, hb, 0, 0)),
                  pl.BlockSpec((C, 1), lambda hb, n: (0, 0)),
                  pl.BlockSpec((C, 1), lambda hb, n: (0, 0))],
        out_specs=pl.BlockSpec((None, None, C, THW), lambda hb, n: (n, hb, 0, 0)),
        out_shape=jax.ShapeDtypeStruct((N, NHB, C, THW), jnp.float32),
        compiler_params=pltpu.CompilerParams(
            dimension_semantics=("parallel", "parallel"),
            vmem_limit_bytes=vmem_limit),
    )(y2, scale_cm, shift_cm)


# --------------------------------------------------------------------------
# glue
# --------------------------------------------------------------------------
def _finalize_stats(stats, gamma, beta, count):
    """Fold per-tile (sum, sumsq) partials into BN scale/shift (train-mode, biased var)."""
    s = jnp.sum(stats[:, :, 0, :], axis=(0, 1))
    sq = jnp.sum(stats[:, :, 1, :], axis=(0, 1))
    mean = s / count
    var = jnp.maximum(sq / count - mean * mean, 0.0)
    scale = gamma * lax.rsqrt(var + BN_EPS)
    shift = beta - mean * scale
    return scale, shift


def _upsample_matrix(n_in, n_out):
    """Bilinear interpolation matrix, align_corners=True (matches nn.Upsample here)."""
    if n_in == 1:
        return jnp.ones((n_out, 1), jnp.float32)
    src = jnp.arange(n_out, dtype=jnp.float32) * (n_in - 1) / (n_out - 1)
    lo = jnp.clip(jnp.floor(src).astype(jnp.int32), 0, n_in - 2)
    frac = src - lo.astype(jnp.float32)
    rows = jnp.arange(n_out)
    m = jnp.zeros((n_out, n_in), jnp.float32)
    m = m.at[rows, lo].add(1.0 - frac)
    m = m.at[rows, lo + 1].add(frac)
    return m


def _pad_matrix(m, pad_before, n_target):
    """Fold F.pad into the interpolation matrix (zero rows outside the image)."""
    pad_after = n_target - m.shape[0] - pad_before
    return jnp.pad(m, ((pad_before, pad_after), (0, 0)))


def up_forward(x1_nchw, x2_nchw, params, block_rows=None):
    """Equivalent of Up.forward. Inputs/outputs are NCHW like PyTorch."""
    w1, b1, g1, be1, w2, b2, g2, be2 = params
    del b1, b2   # conv bias cancels exactly under training-mode (batch-stat) BatchNorm

    # PyTorch NCHW interface -> NHWC for the TPU kernels (boundary transposes only)
    x1 = jnp.transpose(x1_nchw, (0, 2, 3, 1))
    x2 = jnp.transpose(x2_nchw, (0, 2, 3, 1))

    N, H, W, C2 = x2.shape
    _, h_in, w_in, C1 = x1.shape

    # 1+2) bilinear upsample x1 by 2 (align_corners=True) with F.pad folded into the
    #      interpolation matrices -> a single HBM materialization, in bf16.
    dy = H - 2 * h_in
    dx = W - 2 * w_in
    mh = _pad_matrix(_upsample_matrix(h_in, 2 * h_in), dy // 2, H)
    mw = _pad_matrix(_upsample_matrix(w_in, 2 * w_in), dx // 2, W)
    x1u = jnp.einsum('nhwc,Hh,Ww->nHWc', x1, mh, mw).astype(jnp.bfloat16)
    # TODO(synk): fully fuse the upsample into the conv1 kernel (per-tile row/col
    # interpolation in VMEM) to also remove this materialization.

    Cin, Cout = C2 + C1, w1.shape[-1]
    vmem_limit = _vmem_limit_bytes()
    TH = _pick_row_tile(H, W, C2, C1, Cout, vmem_limit, block_rows)
    NHB = H // TH

    # HWIO -> (ky*3+kx)*Cin + ci rows, bf16: matches the in-kernel tap ordering
    w1_flat = w1.reshape(9 * Cin, Cout).astype(jnp.bfloat16)
    w2_flat = w2.reshape(9 * Cout, Cout).astype(jnp.bfloat16)
    # TODO(synk): for Cout > ~256 add a Cout grid axis so only a weight/output
    # slice is resident per step (keeps v7x's 64 MiB comfortable).

    # 3+4) conv1 (channel concat fused in-kernel, bf16 MXU) + streamed BN1 stats
    y1, edges1, st1 = _run_conv1(x2, x1u, w1_flat, Cout, TH, vmem_limit)
    scale1, shift1 = _finalize_stats(st1, g1, be1, N * H * W)

    # 5) BN1+ReLU -> conv2 + streamed BN2 stats (halos come from the edge-row output)
    y2, st2 = _run_conv2(y1, edges1, scale1.reshape(Cout, 1),
                         shift1.reshape(Cout, 1), w2_flat, vmem_limit)
    scale2, shift2 = _finalize_stats(st2, g2, be2, N * H * W)

    # 6) BN2 + ReLU on lane-dense channel-major slabs
    y = _run_bn_relu(y2, scale2.reshape(Cout, 1), shift2.reshape(Cout, 1), vmem_limit)

    # (N, NHB, Cout, TH*W) -> NCHW.  The reshape is a pure view; the transpose moves
    # TH*W-sized contiguous chunks (far cheaper than an element-wise NHWC->NCHW).
    # TODO(synk): fold this transpose into the BN2+ReLU kernel once minor-dim
    # reshapes inside Mosaic are guaranteed for all shapes.
    y = y.reshape(N, NHB, Cout, TH, W)
    return jnp.transpose(y, (0, 2, 1, 3, 4)).reshape(N, Cout, H, W)


def init_params(key, nin, nout):
    """Deterministic parameter init matching the module's shapes."""
    k1, k2, k3, k4 = jax.random.split(key, 4)
    w1 = 0.1 * jax.random.normal(k1, (3, 3, nin, nout), jnp.float32)   # HWIO
    b1 = 0.05 * jax.random.normal(k2, (nout,), jnp.float32)
    w2 = 0.1 * jax.random.normal(k3, (3, 3, nout, nout), jnp.float32)
    b2 = 0.05 * jax.random.normal(k4, (nout,), jnp.float32)
    g1 = jnp.ones((nout,), jnp.float32)
    be1 = jnp.zeros((nout,), jnp.float32)
    g2 = jnp.ones((nout,), jnp.float32)
    be2 = jnp.zeros((nout,), jnp.float32)
    return (w1, b1, g1, be1, w2, b2, g2, be2)


def _reference(x1_nchw, x2_nchw, params):
    """Pure-JAX f32 port of the PyTorch module (keeps the conv biases)."""
    w1, b1, g1, be1, w2, b2, g2, be2 = params
    _, _, h_in, w_in = x1_nchw.shape
    mh = _upsample_matrix(h_in, 2 * h_in)
    mw = _upsample_matrix(w_in, 2 * w_in)
    x1u = jnp.einsum('nchw,Hh,Ww->ncHW', x1_nchw, mh, mw,
                     precision=lax.Precision.HIGHEST)
    dy = x2_nchw.shape[2] - x1u.shape[2]
    dx = x2_nchw.shape[3] - x1u.shape[3]
    x1u = jnp.pad(x1u, ((0, 0), (0, 0), (dy // 2, dy - dy // 2),
                        (dx // 2, dx - dx // 2)))
    x = jnp.concatenate([x2_nchw, x1u], axis=1)

    def conv_bn_relu(x, w_hwio, b, g, be):
        w_oihw = jnp.transpose(w_hwio, (3, 2, 0, 1))
        y = lax.conv_general_dilated(x, w_oihw, (1, 1), ((1, 1), (1, 1)),
                                     dimension_numbers=('NCHW', 'OIHW', 'NCHW'),
                                     precision=lax.Precision.HIGHEST)
        y = y + b.reshape(1, -1, 1, 1)
        mean = jnp.mean(y, axis=(0, 2, 3), keepdims=True)
        var = jnp.mean((y - mean) ** 2, axis=(0, 2, 3), keepdims=True)
        y = (y - mean) * lax.rsqrt(var + BN_EPS) * g.reshape(1, -1, 1, 1) \
            + be.reshape(1, -1, 1, 1)
        return jnp.maximum(y, 0.0)

    x = conv_bn_relu(x, w1, b1, g1, be1)
    x = conv_bn_relu(x, w2, b2, g2, be2)
    return x


if __name__ == "__main__":
    key = jax.random.PRNGKey(0)
    kx1, kx2, kp = jax.random.split(key, 3)

    # x1: low-res feature map (to be upsampled), x2: skip connection.
    N, C1, C2 = 2, 4, 4
    x1 = jax.random.normal(kx1, (N, C1, 8, 8), jnp.float32)      # NCHW
    x2 = jax.random.normal(kx2, (N, C2, 16, 16), jnp.float32)    # NCHW

    nin, nout = C1 + C2, 8
    params = init_params(kp, nin, nout)

    # block_rows=8 -> two row tiles per image: exercises the halo / edge-row path.
    fwd = jax.jit(functools.partial(up_forward, params=params, block_rows=8))
    out = fwd(x1, x2)
    jax.block_until_ready(out)
    assert out.shape == (N, nout, 16, 16), out.shape

    ref = _reference(x1, x2, params)
    err = float(jnp.max(jnp.abs(out - ref)))
    # bf16 MXU matmuls + bf16 y1 intermediate vs an f32 HIGHEST reference:
    # allow a bf16-level tolerance.
    assert err < 5e-2, f"mismatch vs reference: {err}"
    print("KERNEL_OK")
</pallas_src>

<mosaic_0001>
module attributes {stable_mosaic.version = 11 : i64} {
  func.func @_conv1_kernel(%arg0: i32, %arg1: i32, %arg2: memref<1x8x16x4xf32, #tpu.memory_space<vmem>>, %arg3: memref<1x1x16x4xf32, #tpu.memory_space<vmem>>, %arg4: memref<1x1x16x4xf32, #tpu.memory_space<vmem>>, %arg5: memref<1x8x16x4xbf16, #tpu.memory_space<vmem>>, %arg6: memref<1x1x16x4xbf16, #tpu.memory_space<vmem>>, %arg7: memref<1x1x16x4xbf16, #tpu.memory_space<vmem>>, %arg8: memref<72x8xbf16, #tpu.memory_space<vmem>>, %arg9: memref<1x1x8x128xbf16, #tpu.memory_space<vmem>>, %arg10: memref<1x1x8x32xbf16, #tpu.memory_space<vmem>>, %arg11: memref<1x1x2x8xf32, #tpu.memory_space<vmem>>) attributes {dimension_semantics = [#tpu.dimension_semantics<parallel>, #tpu.dimension_semantics<parallel>], iteration_bounds = array<i64: 2, 2>, scalar_prefetch = 0 : i64, scratch_operands = 0 : i64, tpu.core_type = #tpu.core_type<tc>, window_params = [{transform_indices = @transform_0, window_bounds = array<i64: 1, 8, 16, 4>}, {transform_indices = @transform_1, window_bounds = array<i64: 1, 1, 16, 4>}, {transform_indices = @transform_2, window_bounds = array<i64: 1, 1, 16, 4>}, {transform_indices = @transform_3, window_bounds = array<i64: 1, 8, 16, 4>}, {transform_indices = @transform_4, window_bounds = array<i64: 1, 1, 16, 4>}, {transform_indices = @transform_5, window_bounds = array<i64: 1, 1, 16, 4>}, {pipeline_mode = #tpu.pipeline_mode<synchronous>, transform_indices = @transform_6, window_bounds = array<i64: 72, 8>}, {transform_indices = @transform_7, window_bounds = array<i64: 1, 1, 8, 128>}, {transform_indices = @transform_8, window_bounds = array<i64: 1, 1, 8, 32>}, {transform_indices = @transform_9, window_bounds = array<i64: 1, 1, 2, 8>}]} {
    %c0_i32 = arith.constant 0 : i32
    %0 = arith.cmpi sgt, %arg0, %c0_i32 : i32
    %1 = arith.extui %0 : i1 to i32
    %2 = arith.sitofp %1 : i32 to f32
    %c1_i32 = arith.constant 1 : i32
    %3 = arith.cmpi slt, %arg0, %c1_i32 : i32
    %4 = arith.extui %3 : i1 to i32
    %5 = arith.sitofp %4 : i32 to f32
    %c0 = arith.constant 0 : index
    %c0_0 = arith.constant 0 : index
    %c0_1 = arith.constant 0 : index
    %c0_2 = arith.constant 0 : index
    %6 = vector.load %arg2[%c0, %c0_0, %c0_1, %c0_2] : memref<1x8x16x4xf32, #tpu.memory_space<vmem>>, vector<1x8x16x4xf32>
    %7 = vector.shape_cast %6 : vector<1x8x16x4xf32> to vector<8x16x4xf32>
    %c0_3 = arith.constant 0 : index
    %c0_4 = arith.constant 0 : index
    %c0_5 = arith.constant 0 : index
    %c0_6 = arith.constant 0 : index
    %8 = vector.load %arg5[%c0_3, %c0_4, %c0_5, %c0_6] : memref<1x8x16x4xbf16, #tpu.memory_space<vmem>>, vector<1x8x16x4xbf16>
    %9 = vector.shape_cast %8 : vector<1x8x16x4xbf16> to vector<8x16x4xbf16>
    %10 = arith.extf %9 : vector<8x16x4xbf16> to vector<8x16x4xf32>
    %11 = tpu.concatenate %7, %10 in 2 : vector<8x16x4xf32>, vector<8x16x4xf32> -> vector<8x16x8xf32>
    %c0_7 = arith.constant 0 : index
    %c0_8 = arith.constant 0 : index
    %c0_9 = arith.constant 0 : index
    %c0_10 = arith.constant 0 : index
    %12 = vector.load %arg3[%c0_7, %c0_8, %c0_9, %c0_10] : memref<1x1x16x4xf32, #tpu.memory_space<vmem>>, vector<1x1x16x4xf32>
    %13 = vector.shape_cast %12 : vector<1x1x16x4xf32> to vector<1x16x4xf32>
    %c0_11 = arith.constant 0 : index
    %c0_12 = arith.constant 0 : index
    %c0_13 = arith.constant 0 : index
    %c0_14 = arith.constant 0 : index
    %14 = vector.load %arg6[%c0_11, %c0_12, %c0_13, %c0_14] : memref<1x1x16x4xbf16, #tpu.memory_space<vmem>>, vector<1x1x16x4xbf16>
    %15 = vector.shape_cast %14 : vector<1x1x16x4xbf16> to vector<1x16x4xbf16>
    %16 = arith.extf %15 : vector<1x16x4xbf16> to vector<1x16x4xf32>
    %17 = tpu.concatenate %13, %16 in 2 : vector<1x16x4xf32>, vector<1x16x4xf32> -> vector<1x16x8xf32>
    %18 = vector.broadcast %2 : f32 to vector<1x16x8xf32>
    %19 = arith.mulf %17, %18 : vector<1x16x8xf32>
    %c0_15 = arith.constant 0 : index
    %c0_16 = arith.constant 0 : index
    %c0_17 = arith.constant 0 : index
    %c0_18 = arith.constant 0 : index
    %20 = vector.load %arg4[%c0_15, %c0_16, %c0_17, %c0_18] : memref<1x1x16x4xf32, #tpu.memory_space<vmem>>, vector<1x1x16x4xf32>
    %21 = vector.shape_cast %20 : vector<1x1x16x4xf32> to vector<1x16x4xf32>
    %c0_19 = arith.constant 0 : index
    %c0_20 = arith.constant 0 : index
    %c0_21 = arith.constant 0 : index
    %c0_22 = arith.constant 0 : index
    %22 = vector.load %arg7[%c0_19, %c0_20, %c0_21, %c0_22] : memref<1x1x16x4xbf16, #tpu.memory_space<vmem>>, vector<1x1x16x4xbf16>
    %23 = vector.shape_cast %22 : vector<1x1x16x4xbf16> to vector<1x16x4xbf16>
    %24 = arith.extf %23 : vector<1x16x4xbf16> to vector<1x16x4xf32>
    %25 = tpu.concatenate %21, %24 in 2 : vector<1x16x4xf32>, vector<1x16x4xf32> -> vector<1x16x8xf32>
    %26 = vector.broadcast %5 : f32 to vector<1x16x8xf32>
    %27 = arith.mulf %25, %26 : vector<1x16x8xf32>
    %28 = tpu.concatenate %19, %11, %27 in 0 : vector<1x16x8xf32>, vector<8x16x8xf32>, vector<1x16x8xf32> -> vector<10x16x8xf32>
    %cst = arith.constant 0.000000e+00 : f32
    %29 = vector.broadcast %cst : f32 to vector<10x1x8xf32>
    %30 = tpu.concatenate %29, %28, %29 in 1 : vector<10x1x8xf32>, vector<10x16x8xf32>, vector<10x1x8xf32> -> vector<10x18x8xf32>
    %31 = arith.truncf %30 : vector<10x18x8xf32> to vector<10x18x8xbf16>
    %32 = vector.extract_strided_slice %31 {offsets = [0, 0, 0], sizes = [8, 16, 8], strides = [1, 1, 1]} : vector<10x18x8xbf16> to vector<8x16x8xbf16>
    %33 = vector.extract_strided_slice %31 {offsets = [0, 1, 0], sizes = [8, 16, 8], strides = [1, 1, 1]} : vector<10x18x8xbf16> to vector<8x16x8xbf16>
    %34 = vector.extract_strided_slice %31 {offsets = [0, 2, 0], sizes = [8, 16, 8], strides = [1, 1, 1]} : vector<10x18x8xbf16> to vector<8x16x8xbf16>
    %35 = vector.extract_strided_slice %31 {offsets = [1, 0, 0], sizes = [8, 16, 8], strides = [1, 1, 1]} : vector<10x18x8xbf16> to vector<8x16x8xbf16>
    %36 = vector.extract_strided_slice %31 {offsets = [1, 1, 0], sizes = [8, 16, 8], strides = [1, 1, 1]} : vector<10x18x8xbf16> to vector<8x16x8xbf16>
    %37 = vector.extract_strided_slice %31 {offsets = [1, 2, 0], sizes = [8, 16, 8], strides = [1, 1, 1]} : vector<10x18x8xbf16> to vector<8x16x8xbf16>
    %38 = vector.extract_strided_slice %31 {offsets = [2, 0, 0], sizes = [8, 16, 8], strides = [1, 1, 1]} : vector<10x18x8xbf16> to vector<8x16x8xbf16>
    %39 = vector.extract_strided_slice %31 {offsets = [2, 1, 0], sizes = [8, 16, 8], strides = [1, 1, 1]} : vector<10x18x8xbf16> to vector<8x16x8xbf16>
    %40 = vector.extract_strided_slice %31 {offsets = [2, 2, 0], sizes = [8, 16, 8], strides = [1, 1, 1]} : vector<10x18x8xbf16> to vector<8x16x8xbf16>
    %41 = tpu.concatenate %32, %33, %34, %35, %36, %37, %38, %39, %40 in 2 : vector<8x16x8xbf16>, vector<8x16x8xbf16>, vector<8x16x8xbf16>, vector<8x16x8xbf16>, vector<8x16x8xbf16>, vector<8x16x8xbf16>, vector<8x16x8xbf16>, vector<8x16x8xbf16>, vector<8x16x8xbf16> -> vector<8x16x72xbf16>
    %42 = vector.shape_cast %41 : vector<8x16x72xbf16> to vector<128x72xbf16>
    %c0_23 = arith.constant 0 : index
    %c0_24 = arith.constant 0 : index
    %43 = vector.load %arg8[%c0_23, %c0_24] : memref<72x8xbf16, #tpu.memory_space<vmem>>, vector<72x8xbf16>
    %cst_25 = arith.constant dense<0.000000e+00> : vector<128x8xf32>
    %44 = tpu.matmul %42, %43, %cst_25 {dimension_numbers = #tpu.dot_dimension_numbers<[1], [0], [0], [1], [0, 0, 1, 1], [], []>} : vector<128x72xbf16>, vector<72x8xbf16>, vector<128x8xf32> -> vector<128x8xf32>
    %45 = tpu.transpose %44, [1, 0] : vector<128x8xf32> -> vector<8x128xf32>
    %46 = arith.truncf %45 : vector<8x128xf32> to vector<8x128xbf16>
    %c0_26 = arith.constant 0 : index
    %c0_27 = arith.constant 0 : index
    %c0_28 = arith.constant 0 : index
    %c0_29 = arith.constant 0 : index
    %47 = vector.load %arg9[%c0_26, %c0_27, %c0_28, %c0_29] : memref<1x1x8x128xbf16, #tpu.memory_space<vmem>>, vector<1x1x8x128xbf16>
    %48 = vector.shape_cast %47 : vector<1x1x8x128xbf16> to vector<8x128xbf16>
    %49 = vector.shape_cast %46 : vector<8x128xbf16> to vector<1x1x8x128xbf16>
    tpu.vector_store %arg9[%c0_26, %c0_27, %c0_28, %c0_29], %49 {strides = array<i32>} : memref<1x1x8x128xbf16, #tpu.memory_space<vmem>>, vector<1x1x8x128xbf16>,
    %50 = vector.extract_strided_slice %45 {offsets = [0, 0], sizes = [8, 16], strides = [1, 1]} : vector<8x128xf32> to vector<8x16xf32>
    %51 = vector.extract_strided_slice %45 {offsets = [0, 112], sizes = [8, 16], strides = [1, 1]} : vector<8x128xf32> to vector<8x16xf32>
    %52 = tpu.concatenate %50, %51 in 1 : vector<8x16xf32>, vector<8x16xf32> -> vector<8x32xf32>
    %53 = arith.truncf %52 : vector<8x32xf32> to vector<8x32xbf16>
    %c0_30 = arith.constant 0 : index
    %c0_31 = arith.constant 0 : index
    %c0_32 = arith.constant 0 : index
    %c0_33 = arith.constant 0 : index
    %54 = vector.load %arg10[%c0_30, %c0_31, %c0_32, %c0_33] : memref<1x1x8x32xbf16, #tpu.memory_space<vmem>>, vector<1x1x8x32xbf16>
    %55 = vector.shape_cast %54 : vector<1x1x8x32xbf16> to vector<8x32xbf16>
    %56 = vector.shape_cast %53 : vector<8x32xbf16> to vector<1x1x8x32xbf16>
    tpu.vector_store %arg10[%c0_30, %c0_31, %c0_32, %c0_33], %56 {strides = array<i32>} : memref<1x1x8x32xbf16, #tpu.memory_space<vmem>>, vector<1x1x8x32xbf16>,
    %cst_34 = arith.constant dense<0.000000e+00> : vector<8xf32>
    %57 = vector.multi_reduction <add>, %44, %cst_34 [0] : vector<128x8xf32> to vector<8xf32>
    %58 = vector.shape_cast %57 : vector<8xf32> to vector<1x8xf32>
    %59 = arith.mulf %44, %44 : vector<128x8xf32>
    %cst_35 = arith.constant dense<0.000000e+00> : vector<8xf32>
    %60 = vector.multi_reduction <add>, %59, %cst_35 [0] : vector<128x8xf32> to vector<8xf32>
    %61 = vector.shape_cast %60 : vector<8xf32> to vector<1x8xf32>
    %62 = tpu.concatenate %58, %61 in 0 : vector<1x8xf32>, vector<1x8xf32> -> vector<2x8xf32>
    %c0_36 = arith.constant 0 : index
    %c0_37 = arith.constant 0 : index
    %c0_38 = arith.constant 0 : index
    %c0_39 = arith.constant 0 : index
    %63 = vector.load %arg11[%c0_36, %c0_37, %c0_38, %c0_39] : memref<1x1x2x8xf32, #tpu.memory_space<vmem>>, vector<1x1x2x8xf32>
    %64 = vector.shape_cast %63 : vector<1x1x2x8xf32> to vector<2x8xf32>
    %65 = vector.shape_cast %62 : vector<2x8xf32> to vector<1x1x2x8xf32>
    tpu.vector_store %arg11[%c0_36, %c0_37, %c0_38, %c0_39], %65 {strides = array<i32>} : memref<1x1x2x8xf32, #tpu.memory_space<vmem>>, vector<1x1x2x8xf32>,
    return
  }
  func.func @transform_0(%arg0: i32, %arg1: i32) -> (i32, i32, i32, i32) {
    %c0_i32 = arith.constant 0 : i32
    %c0_i32_0 = arith.constant 0 : i32
    %c0_i32_1 = arith.constant 0 : i32
    return %arg1, %arg0, %c0_i32, %c0_i32_0 : i32, i32, i32, i32
  }
  func.func @transform_1(%arg0: i32, %arg1: i32) -> (i32, i32, i32, i32) {
    %c8_i32 = arith.constant 8 : i32
    %0 = arith.muli %arg0, %c8_i32 : i32
    %c1_i32 = arith.constant 1 : i32
    %1 = arith.subi %0, %c1_i32 : i32
    %c0_i32 = arith.constant 0 : i32
    %2 = arith.maxsi %1, %c0_i32 : i32
    %c0_i32_0 = arith.constant 0 : i32
    %c0_i32_1 = arith.constant 0 : i32
    %c0_i32_2 = arith.constant 0 : i32
    return %arg1, %2, %c0_i32_0, %c0_i32_1 : i32, i32, i32, i32
  }
  func.func @transform_2(%arg0: i32, %arg1: i32) -> (i32, i32, i32, i32) {
    %c8_i32 = arith.constant 8 : i32
    %0 = arith.muli %arg0, %c8_i32 : i32
    %c8_i32_0 = arith.constant 8 : i32
    %1 = arith.addi %0, %c8_i32_0 : i32
    %c15_i32 = arith.constant 15 : i32
    %2 = arith.minsi %1, %c15_i32 : i32
    %c0_i32 = arith.constant 0 : i32
    %c0_i32_1 = arith.constant 0 : i32
    %c0_i32_2 = arith.constant 0 : i32
    return %arg1, %2, %c0_i32, %c0_i32_1 : i32, i32, i32, i32
  }
  func.func @transform_3(%arg0: i32, %arg1: i32) -> (i32, i32, i32, i32) {
    %c0_i32 = arith.constant 0 : i32
    %c0_i32_0 = arith.constant 0 : i32
    %c0_i32_1 = arith.constant 0 : i32
    return %arg1, %arg0, %c0_i32, %c0_i32_0 : i32, i32, i32, i32
  }
  func.func @transform_4(%arg0: i32, %arg1: i32) -> (i32, i32, i32, i32) {
    %c8_i32 = arith.constant 8 : i32
    %0 = arith.muli %arg0, %c8_i32 : i32
    %c1_i32 = arith.constant 1 : i32
    %1 = arith.subi %0, %c1_i32 : i32
    %c0_i32 = arith.constant 0 : i32
    %2 = arith.maxsi %1, %c0_i32 : i32
    %c0_i32_0 = arith.constant 0 : i32
    %c0_i32_1 = arith.constant 0 : i32
    %c0_i32_2 = arith.constant 0 : i32
    return %arg1, %2, %c0_i32_0, %c0_i32_1 : i32, i32, i32, i32
  }
  func.func @transform_5(%arg0: i32, %arg1: i32) -> (i32, i32, i32, i32) {
    %c8_i32 = arith.constant 8 : i32
    %0 = arith.muli %arg0, %c8_i32 : i32
    %c8_i32_0 = arith.constant 8 : i32
    %1 = arith.addi %0, %c8_i32_0 : i32
    %c15_i32 = arith.constant 15 : i32
    %2 = arith.minsi %1, %c15_i32 : i32
    %c0_i32 = arith.constant 0 : i32
    %c0_i32_1 = arith.constant 0 : i32
    %c0_i32_2 = arith.constant 0 : i32
    return %arg1, %2, %c0_i32, %c0_i32_1 : i32, i32, i32, i32
  }
  func.func @transform_6(%arg0: i32, %arg1: i32) -> (i32, i32) {
    %c0_i32 = arith.constant 0 : i32
    %c0_i32_0 = arith.constant 0 : i32
    %c0_i32_1 = arith.constant 0 : i32
    return %c0_i32, %c0_i32_0 : i32, i32
  }
  func.func @transform_7(%arg0: i32, %arg1: i32) -> (i32, i32, i32, i32) {
    %c0_i32 = arith.constant 0 : i32
    %c0_i32_0 = arith.constant 0 : i32
    %c0_i32_1 = arith.constant 0 : i32
    return %arg1, %arg0, %c0_i32, %c0_i32_0 : i32, i32, i32, i32
  }
  func.func @transform_8(%arg0: i32, %arg1: i32) -> (i32, i32, i32, i32) {
    %c0_i32 = arith.constant 0 : i32
    %c0_i32_0 = arith.constant 0 : i32
    %c0_i32_1 = arith.constant 0 : i32
    return %arg1, %arg0, %c0_i32, %c0_i32_0 : i32, i32, i32, i32
  }
  func.func @transform_9(%arg0: i32, %arg1: i32) -> (i32, i32, i32, i32) {
    %c0_i32 = arith.constant 0 : i32
    %c0_i32_0 = arith.constant 0 : i32
    %c0_i32_1 = arith.constant 0 : i32
    return %arg1, %arg0, %c0_i32, %c0_i32_0 : i32, i32, i32, i32
  }
}

module attributes {stable_mosaic.version = 11 : i64} {
  func.func @_bn_relu_kernel(%arg0: i32, %arg1: i32, %arg2: memref<1x1x8x128xf32, #tpu.memory_space<vmem>>, %arg3: memref<8x1xf32, #tpu.memory_space<vmem>>, %arg4: memref<8x1xf32, #tpu.memory_space<vmem>>, %arg5: memref<1x1x8x128xf32, #tpu.memory_space<vmem>>) attributes {dimension_semantics = [#tpu.dimension_semantics<parallel>, #tpu.dimension_semantics<parallel>], iteration_bounds = array<i64: 2, 2>, scalar_prefetch = 0 : i64, scratch_operands = 0 : i64, tpu.core_type = #tpu.core_type<tc>, window_params = [{transform_indices = @transform_0, window_bounds = array<i64: 1, 1, 8, 128>}, {pipeline_mode = #tpu.pipeline_mode<synchronous>, transform_indices = @transform_1, window_bounds = array<i64: 8, 1>}, {pipeline_mode = #tpu.pipeline_mode<synchronous>, transform_indices = @transform_2, window_bounds = array<i64: 8, 1>}, {transform_indices = @transform_3, window_bounds = array<i64: 1, 1, 8, 128>}]} {
    %c0 = arith.constant 0 : index
    %c0_0 = arith.constant 0 : index
    %c0_1 = arith.constant 0 : index
    %c0_2 = arith.constant 0 : index
    %0 = vector.load %arg2[%c0, %c0_0, %c0_1, %c0_2] : memref<1x1x8x128xf32, #tpu.memory_space<vmem>>, vector<1x1x8x128xf32>
    %1 = vector.shape_cast %0 : vector<1x1x8x128xf32> to vector<8x128xf32>
    %c0_3 = arith.constant 0 : index
    %c0_4 = arith.constant 0 : index
    %2 = vector.load %arg3[%c0_3, %c0_4] : memref<8x1xf32, #tpu.memory_space<vmem>>, vector<8x1xf32>
    %3 = vector.broadcast %2 : vector<8x1xf32> to vector<8x128xf32>
    %4 = arith.mulf %1, %3 : vector<8x128xf32>
    %c0_5 = arith.constant 0 : index
    %c0_6 = arith.constant 0 : index
    %5 = vector.load %arg4[%c0_5, %c0_6] : memref<8x1xf32, #tpu.memory_space<vmem>>, vector<8x1xf32>
    %6 = vector.broadcast %5 : vector<8x1xf32> to vector<8x128xf32>
    %7 = arith.addf %4, %6 : vector<8x128xf32>
    %cst = arith.constant 0.000000e+00 : f32
    %8 = vector.broadcast %cst : f32 to vector<8x128xf32>
    %9 = arith.maximumf %7, %8 : vector<8x128xf32>
    %c0_7 = arith.constant 0 : index
    %c0_8 = arith.constant 0 : index
    %c0_9 = arith.constant 0 : index
    %c0_10 = arith.constant 0 : index
    %10 = vector.load %arg5[%c0_7, %c0_8, %c0_9, %c0_10] : memref<1x1x8x128xf32, #tpu.memory_space<vmem>>, vector<1x1x8x128xf32>
    %11 = vector.shape_cast %10 : vector<1x1x8x128xf32> to vector<8x128xf32>
    %12 = vector.shape_cast %9 : vector<8x128xf32> to vector<1x1x8x128xf32>
    tpu.vector_store %arg5[%c0_7, %c0_8, %c0_9, %c0_10], %12 {strides = array<i32>} : memref<1x1x8x128xf32, #tpu.memory_space<vmem>>, vector<1x1x8x128xf32>,
    return
  }
  func.func @transform_0(%arg0: i32, %arg1: i32) -> (i32, i32, i32, i32) {
    %c0_i32 = arith.constant 0 : i32
    %c0_i32_0 = arith.constant 0 : i32
    %c0_i32_1 = arith.constant 0 : i32
    return %arg1, %arg0, %c0_i32, %c0_i32_0 : i32, i32, i32, i32
  }
  func.func @transform_1(%arg0: i32, %arg1: i32) -> (i32, i32) {
    %c0_i32 = arith.constant 0 : i32
    %c0_i32_0 = arith.constant 0 : i32
    %c0_i32_1 = arith.constant 0 : i32
    return %c0_i32, %c0_i32_0 : i32, i32
  }
  func.func @transform_2(%arg0: i32, %arg1: i32) -> (i32, i32) {
    %c0_i32 = arith.constant 0 : i32
    %c0_i32_0 = arith.constant 0 : i32
    %c0_i32_1 = arith.constant 0 : i32
    return %c0_i32, %c0_i32_0 : i32, i32
  }
  func.func @transform_3(%arg0: i32, %arg1: i32) -> (i32, i32, i32, i32) {
    %c0_i32 = arith.constant 0 : i32
    %c0_i32_0 = arith.constant 0 : i32
    %c0_i32_1 = arith.constant 0 : i32
    return %arg1, %arg0, %c0_i32, %c0_i32_0 : i32, i32, i32, i32
  }
}

module attributes {stable_mosaic.version = 11 : i64} {
  func.func @_conv2_kernel(%arg0: i32, %arg1: i32, %arg2: memref<1x1x8x128xbf16, #tpu.memory_space<vmem>>, %arg3: memref<1x1x8x32xbf16, #tpu.memory_space<vmem>>, %arg4: memref<1x1x8x32xbf16, #tpu.memory_space<vmem>>, %arg5: memref<8x1xf32, #tpu.memory_space<vmem>>, %arg6: memref<8x1xf32, #tpu.memory_space<vmem>>, %arg7: memref<72x8xbf16, #tpu.memory_space<vmem>>, %arg8: memref<1x1x8x128xf32, #tpu.memory_space<vmem>>, %arg9: memref<1x1x2x8xf32, #tpu.memory_space<vmem>>) attributes {dimension_semantics = [#tpu.dimension_semantics<parallel>, #tpu.dimension_semantics<parallel>], iteration_bounds = array<i64: 2, 2>, scalar_prefetch = 0 : i64, scratch_operands = 0 : i64, tpu.core_type = #tpu.core_type<tc>, window_params = [{transform_indices = @transform_0, window_bounds = array<i64: 1, 1, 8, 128>}, {transform_indices = @transform_1, window_bounds = array<i64: 1, 1, 8, 32>}, {transform_indices = @transform_2, window_bounds = array<i64: 1, 1, 8, 32>}, {pipeline_mode = #tpu.pipeline_mode<synchronous>, transform_indices = @transform_3, window_bounds = array<i64: 8, 1>}, {pipeline_mode = #tpu.pipeline_mode<synchronous>, transform_indices = @transform_4, window_bounds = array<i64: 8, 1>}, {pipeline_mode = #tpu.pipeline_mode<synchronous>, transform_indices = @transform_5, window_bounds = array<i64: 72, 8>}, {transform_indices = @transform_6, window_bounds = array<i64: 1, 1, 8, 128>}, {transform_indices = @transform_7, window_bounds = array<i64: 1, 1, 2, 8>}]} {
    %c0_i32 = arith.constant 0 : i32
    %0 = arith.cmpi sgt, %arg0, %c0_i32 : i32
    %1 = arith.extui %0 : i1 to i32
    %2 = arith.sitofp %1 : i32 to f32
    %c1_i32 = arith.constant 1 : i32
    %3 = arith.cmpi slt, %arg0, %c1_i32 : i32
    %4 = arith.extui %3 : i1 to i32
    %5 = arith.sitofp %4 : i32 to f32
    %c0 = arith.constant 0 : index
    %c0_0 = arith.constant 0 : index
    %6 = vector.load %arg5[%c0, %c0_0] : memref<8x1xf32, #tpu.memory_space<vmem>>, vector<8x1xf32>
    %c0_1 = arith.constant 0 : index
    %c0_2 = arith.constant 0 : index
    %7 = vector.load %arg6[%c0_1, %c0_2] : memref<8x1xf32, #tpu.memory_space<vmem>>, vector<8x1xf32>
    %c0_3 = arith.constant 0 : index
    %c0_4 = arith.constant 0 : index
    %c0_5 = arith.constant 0 : index
    %c0_6 = arith.constant 0 : index
    %8 = vector.load %arg3[%c0_3, %c0_4, %c0_5, %c0_6] : memref<1x1x8x32xbf16, #tpu.memory_space<vmem>>, vector<1x1x8x32xbf16>
    %9 = vector.shape_cast %8 : vector<1x1x8x32xbf16> to vector<8x32xbf16>
    %c0_7 = arith.constant 0 : index
    %c0_8 = arith.constant 0 : index
    %c0_9 = arith.constant 0 : index
    %c0_10 = arith.constant 0 : index
    %10 = vector.load %arg4[%c0_7, %c0_8, %c0_9, %c0_10] : memref<1x1x8x32xbf16, #tpu.memory_space<vmem>>, vector<1x1x8x32xbf16>
    %11 = vector.shape_cast %10 : vector<1x1x8x32xbf16> to vector<8x32xbf16>
    %c0_11 = arith.constant 0 : index
    %c0_12 = arith.constant 0 : index
    %c0_13 = arith.constant 0 : index
    %c0_14 = arith.constant 0 : index
    %12 = vector.load %arg2[%c0_11, %c0_12, %c0_13, %c0_14] : memref<1x1x8x128xbf16, #tpu.memory_space<vmem>>, vector<1x1x8x128xbf16>
    %13 = vector.shape_cast %12 : vector<1x1x8x128xbf16> to vector<8x128xbf16>
    %14 = arith.extf %13 : vector<8x128xbf16> to vector<8x128xf32>
    %15 = vector.broadcast %6 : vector<8x1xf32> to vector<8x128xf32>
    %16 = arith.mulf %14, %15 : vector<8x128xf32>
    %17 = vector.broadcast %7 : vector<8x1xf32> to vector<8x128xf32>
    %18 = arith.addf %16, %17 : vector<8x128xf32>
    %cst = arith.constant 0.000000e+00 : f32
    %19 = vector.broadcast %cst : f32 to vector<8x128xf32>
    %20 = arith.maximumf %18, %19 : vector<8x128xf32>
    %21 = tpu.transpose %20, [1, 0] : vector<8x128xf32> -> vector<128x8xf32>
    %22 = vector.shape_cast %21 : vector<128x8xf32> to vector<8x16x8xf32>
    %23 = vector.extract_strided_slice %9 {offsets = [0, 16], sizes = [8, 16], strides = [1, 1]} : vector<8x32xbf16> to vector<8x16xbf16>
    %24 = arith.extf %23 : vector<8x16xbf16> to vector<8x16xf32>
    %25 = vector.broadcast %6 : vector<8x1xf32> to vector<8x16xf32>
    %26 = arith.mulf %24, %25 : vector<8x16xf32>
    %27 = vector.broadcast %7 : vector<8x1xf32> to vector<8x16xf32>
    %28 = arith.addf %26, %27 : vector<8x16xf32>
    %cst_15 = arith.constant 0.000000e+00 : f32
    %29 = vector.broadcast %cst_15 : f32 to vector<8x16xf32>
    %30 = arith.maximumf %28, %29 : vector<8x16xf32>
    %31 = vector.broadcast %2 : f32 to vector<8x16xf32>
    %32 = arith.mulf %30, %31 : vector<8x16xf32>
    %33 = tpu.transpose %32, [1, 0] : vector<8x16xf32> -> vector<16x8xf32>
    %34 = vector.shape_cast %33 : vector<16x8xf32> to vector<1x16x8xf32>
    %35 = vector.extract_strided_slice %11 {offsets = [0, 0], sizes = [8, 16], strides = [1, 1]} : vector<8x32xbf16> to vector<8x16xbf16>
    %36 = arith.extf %35 : vector<8x16xbf16> to vector<8x16xf32>
    %37 = vector.broadcast %6 : vector<8x1xf32> to vector<8x16xf32>
    %38 = arith.mulf %36, %37 : vector<8x16xf32>
    %39 = vector.broadcast %7 : vector<8x1xf32> to vector<8x16xf32>
    %40 = arith.addf %38, %39 : vector<8x16xf32>
    %cst_16 = arith.constant 0.000000e+00 : f32
    %41 = vector.broadcast %cst_16 : f32 to vector<8x16xf32>
    %42 = arith.maximumf %40, %41 : vector<8x16xf32>
    %43 = vector.broadcast %5 : f32 to vector<8x16xf32>
    %44 = arith.mulf %42, %43 : vector<8x16xf32>
    %45 = tpu.transpose %44, [1, 0] : vector<8x16xf32> -> vector<16x8xf32>
    %46 = vector.shape_cast %45 : vector<16x8xf32> to vector<1x16x8xf32>
    %47 = tpu.concatenate %34, %22, %46 in 0 : vector<1x16x8xf32>, vector<8x16x8xf32>, vector<1x16x8xf32> -> vector<10x16x8xf32>
    %cst_17 = arith.constant 0.000000e+00 : f32
    %48 = vector.broadcast %cst_17 : f32 to vector<10x1x8xf32>
    %49 = tpu.concatenate %48, %47, %48 in 1 : vector<10x1x8xf32>, vector<10x16x8xf32>, vector<10x1x8xf32> -> vector<10x18x8xf32>
    %50 = arith.truncf %49 : vector<10x18x8xf32> to vector<10x18x8xbf16>
    %51 = vector.extract_strided_slice %50 {offsets = [0, 0, 0], sizes = [8, 16, 8], strides = [1, 1, 1]} : vector<10x18x8xbf16> to vector<8x16x8xbf16>
    %52 = vector.extract_strided_slice %50 {offsets = [0, 1, 0], sizes = [8, 16, 8], strides = [1, 1, 1]} : vector<10x18x8xbf16> to vector<8x16x8xbf16>
    %53 = vector.extract_strided_slice %50 {offsets = [0, 2, 0], sizes = [8, 16, 8], strides = [1, 1, 1]} : vector<10x18x8xbf16> to vector<8x16x8xbf16>
    %54 = vector.extract_strided_slice %50 {offsets = [1, 0, 0], sizes = [8, 16, 8], strides = [1, 1, 1]} : vector<10x18x8xbf16> to vector<8x16x8xbf16>
    %55 = vector.extract_strided_slice %50 {offsets = [1, 1, 0], sizes = [8, 16, 8], strides = [1, 1, 1]} : vector<10x18x8xbf16> to vector<8x16x8xbf16>
    %56 = vector.extract_strided_slice %50 {offsets = [1, 2, 0], sizes = [8, 16, 8], strides = [1, 1, 1]} : vector<10x18x8xbf16> to vector<8x16x8xbf16>
    %57 = vector.extract_strided_slice %50 {offsets = [2, 0, 0], sizes = [8, 16, 8], strides = [1, 1, 1]} : vector<10x18x8xbf16> to vector<8x16x8xbf16>
    %58 = vector.extract_strided_slice %50 {offsets = [2, 1, 0], sizes = [8, 16, 8], strides = [1, 1, 1]} : vector<10x18x8xbf16> to vector<8x16x8xbf16>
    %59 = vector.extract_strided_slice %50 {offsets = [2, 2, 0], sizes = [8, 16, 8], strides = [1, 1, 1]} : vector<10x18x8xbf16> to vector<8x16x8xbf16>
    %60 = tpu.concatenate %51, %52, %53, %54, %55, %56, %57, %58, %59 in 2 : vector<8x16x8xbf16>, vector<8x16x8xbf16>, vector<8x16x8xbf16>, vector<8x16x8xbf16>, vector<8x16x8xbf16>, vector<8x16x8xbf16>, vector<8x16x8xbf16>, vector<8x16x8xbf16>, vector<8x16x8xbf16> -> vector<8x16x72xbf16>
    %61 = vector.shape_cast %60 : vector<8x16x72xbf16> to vector<128x72xbf16>
    %c0_18 = arith.constant 0 : index
    %c0_19 = arith.constant 0 : index
    %62 = vector.load %arg7[%c0_18, %c0_19] : memref<72x8xbf16, #tpu.memory_space<vmem>>, vector<72x8xbf16>
    %cst_20 = arith.constant dense<0.000000e+00> : vector<128x8xf32>
    %63 = tpu.matmul %61, %62, %cst_20 {dimension_numbers = #tpu.dot_dimension_numbers<[1], [0], [0], [1], [0, 0, 1, 1], [], []>} : vector<128x72xbf16>, vector<72x8xbf16>, vector<128x8xf32> -> vector<128x8xf32>
    %64 = tpu.transpose %63, [1, 0] : vector<128x8xf32> -> vector<8x128xf32>
    %c0_21 = arith.constant 0 : index
    %c0_22 = arith.constant 0 : index
    %c0_23 = arith.constant 0 : index
    %c0_24 = arith.constant 0 : index
    %65 = vector.load %arg8[%c0_21, %c0_22, %c0_23, %c0_24] : memref<1x1x8x128xf32, #tpu.memory_space<vmem>>, vector<1x1x8x128xf32>
    %66 = vector.shape_cast %65 : vector<1x1x8x128xf32> to vector<8x128xf32>
    %67 = vector.shape_cast %64 : vector<8x128xf32> to vector<1x1x8x128xf32>
    tpu.vector_store %arg8[%c0_21, %c0_22, %c0_23, %c0_24], %67 {strides = array<i32>} : memref<1x1x8x128xf32, #tpu.memory_space<vmem>>, vector<1x1x8x128xf32>,
    %cst_25 = arith.constant dense<0.000000e+00> : vector<8xf32>
    %68 = vector.multi_reduction <add>, %63, %cst_25 [0] : vector<128x8xf32> to vector<8xf32>
    %69 = vector.shape_cast %68 : vector<8xf32> to vector<1x8xf32>
    %70 = arith.mulf %63, %63 : vector<128x8xf32>
    %cst_26 = arith.constant dense<0.000000e+00> : vector<8xf32>
    %71 = vector.multi_reduction <add>, %70, %cst_26 [0] : vector<128x8xf32> to vector<8xf32>
    %72 = vector.shape_cast %71 : vector<8xf32> to vector<1x8xf32>
    %73 = tpu.concatenate %69, %72 in 0 : vector<1x8xf32>, vector<1x8xf32> -> vector<2x8xf32>
    %c0_27 = arith.constant 0 : index
    %c0_28 = arith.constant 0 : index
    %c0_29 = arith.constant 0 : index
    %c0_30 = arith.constant 0 : index
    %74 = vector.load %arg9[%c0_27, %c0_28, %c0_29, %c0_30] : memref<1x1x2x8xf32, #tpu.memory_space<vmem>>, vector<1x1x2x8xf32>
    %75 = vector.shape_cast %74 : vector<1x1x2x8xf32> to vector<2x8xf32>
    %76 = vector.shape_cast %73 : vector<2x8xf32> to vector<1x1x2x8xf32>
    tpu.vector_store %arg9[%c0_27, %c0_28, %c0_29, %c0_30], %76 {strides = array<i32>} : memref<1x1x2x8xf32, #tpu.memory_space<vmem>>, vector<1x1x2x8xf32>,
    return
  }
  func.func @transform_0(%arg0: i32, %arg1: i32) -> (i32, i32, i32, i32) {
    %c0_i32 = arith.constant 0 : i32
    %c0_i32_0 = arith.constant 0 : i32
    %c0_i32_1 = arith.constant 0 : i32
    return %arg1, %arg0, %c0_i32, %c0_i32_0 : i32, i32, i32, i32
  }
  func.func @transform_1(%arg0: i32, %arg1: i32) -> (i32, i32, i32, i32) {
    %c1_i32 = arith.constant 1 : i32
    %0 = arith.subi %arg0, %c1_i32 : i32
    %c0_i32 = arith.constant 0 : i32
    %1 = arith.maxsi %0, %c0_i32 : i32
    %c0_i32_0 = arith.constant 0 : i32
    %c0_i32_1 = arith.constant 0 : i32
    %c0_i32_2 = arith.constant 0 : i32
    return %arg1, %1, %c0_i32_0, %c0_i32_1 : i32, i32, i32, i32
  }
  func.func @transform_2(%arg0: i32, %arg1: i32) -> (i32, i32, i32, i32) {
    %c1_i32 = arith.constant 1 : i32
    %0 = arith.addi %arg0, %c1_i32 : i32
    %c1_i32_0 = arith.constant 1 : i32
    %1 = arith.minsi %0, %c1_i32_0 : i32
    %c0_i32 = arith.constant 0 : i32
    %c0_i32_1 = arith.constant 0 : i32
    %c0_i32_2 = arith.constant 0 : i32
    return %arg1, %1, %c0_i32, %c0_i32_1 : i32, i32, i32, i32
  }
  func.func @transform_3(%arg0: i32, %arg1: i32) -> (i32, i32) {
    %c0_i32 = arith.constant 0 : i32
    %c0_i32_0 = arith.constant 0 : i32
    %c0_i32_1 = arith.constant 0 : i32
    return %c0_i32, %c0_i32_0 : i32, i32
  }
  func.func @transform_4(%arg0: i32, %arg1: i32) -> (i32, i32) {
    %c0_i32 = arith.constant 0 : i32
    %c0_i32_0 = arith.constant 0 : i32
    %c0_i32_1 = arith.constant 0 : i32
    return %c0_i32, %c0_i32_0 : i32, i32
  }
  func.func @transform_5(%arg0: i32, %arg1: i32) -> (i32, i32) {
    %c0_i32 = arith.constant 0 : i32
    %c0_i32_0 = arith.constant 0 : i32
    %c0_i32_1 = arith.constant 0 : i32
    return %c0_i32, %c0_i32_0 : i32, i32
  }
  func.func @transform_6(%arg0: i32, %arg1: i32) -> (i32, i32, i32, i32) {
    %c0_i32 = arith.constant 0 : i32
    %c0_i32_0 = arith.constant 0 : i32
    %c0_i32_1 = arith.constant 0 : i32
    return %arg1, %arg0, %c0_i32, %c0_i32_0 : i32, i32, i32, i32
  }
  func.func @transform_7(%arg0: i32, %arg1: i32) -> (i32, i32, i32, i32) {
    %c0_i32 = arith.constant 0 : i32
    %c0_i32_0 = arith.constant 0 : i32
    %c0_i32_1 = arith.constant 0 : i32
    return %arg1, %arg0, %c0_i32, %c0_i32_0 : i32, i32, i32, i32
  }
}

</mosaic_0001>

<bundles_post_ra>
// kernel: up_forward.5
= control target key start
LH: loop header
LB: loop body
LE: loop exit
PB: predicated region body
PF: predicated region fallthrough
CT: control target
= control target key end

     0   :  { %s419_s12 = smov 0   ;;  %s421_s13 = smov 0   ;;  %s476_s0 = inlined_call_operand.vmem [shape: f32[2,2,8,128], index: 0, kind: input, shape index: {}]   ;;  %s477_s1 = inlined_call_operand.vmem [shape: f32[8,1], index: 1, kind: input, shape index: {}]   ;;  %s478_s2 = inlined_call_operand.vmem [shape: f32[8,1], index: 2, kind: input, shape index: {}]   ;;  %s479_s3 = inlined_call_operand.vmem [shape: f32[2,2,8,128], index: 3, kind: output, shape index: {}]  }
   0x1   :  { %s423_s14 = smov 0   ;;  %s425_s15 = smov 0  }
   0x2   :  { %s427_s16 = smov 0  }
   0x3 LB: > { %s22_s17 = sadd.s32 1, %s388_s14  ;;  %s25_s18 = sadd.s32 1, %s392_s15  ;;  %s396_s16 = sphi %s427_s16, %s13_s16   ;;  %s392_s15 = sphi %s425_s15, %s483_s15   ;;  %s388_s14 = sphi %s423_s14, %s482_s14   ;;  %s384_s13 = sphi %s421_s13, %s481_s13   ;;  %s380_s12 = sphi %s419_s12, %s480_s12  }
   0x4   : > { %p23_p0 = scmp.ge.s32.totalorder %s22_s17, 2  ;;  %p309_p1 = scmp.ge.s32.totalorder %s396_s16, 1 }
   0x5   : > { %p156_p2 = scmp.lt.s32.totalorder %s396_s16, 5 }
   0x6   : > { %s485_s17 = smov (%p23_p0, %s22_s17), 0  ;;  %s487_s18 = smov (!%p23_p0, %s25_s18), %s392_s15 }
   0x7   : > { %p157_p3 = pnand %p309_p1, %p156_p2  ;;  %p27_p4 = scmp.ge.s32.totalorder %s487_s18, 2 }
   0x8   : > { %p186_p5 = scmp.lt.s32.totalorder (!%p157_p3), %s380_s12, 1  ;;  %p188_p6 = scmp.lt.s32.totalorder (!%p157_p3), %s384_s13, 1 }
   0x9   : > { %s489_s18 = smov (%p27_p4, %s487_s18), 0  ;;  %160 = sbr.rel (%p157_p3) target bundleno = 144 (0x90), region = 32 }
   0xe   : > { %v203_v0 = vld [vmem:[%s477_s1] sm:$0xff]  ;;  %v398_v1 = vmov 0   ;;  %s491_s12 = smov (!%p186_p5, %s380_s12), 1  ;;  %s493_s13 = smov (!%p188_p6, %s384_s13), 1 }
   0xf   : > { %357 = vset.pattern.permute.xlu0 %v398_v1  ;;  %v210_v2 = vld [vmem:[%s478_s2] sm:$0xff]  ;;  %s310_s23 = sshll.u32 %s491_s12, 1 }
  0x10   : > { %206 = vperm.xlu0 %357, %v203_v0   ;;  %s191_s24 = sadd.s32 %s310_s23, %s493_s13 }
  0x11   : > { %s311_s25 = sshll.u32 %s191_s24, 3 }
  0x12   : > { %s193_s28 = scalar_lea.vmem %s476_s0, %s311_s25  ;;  %s201_s4 = scalar_lea.vmem %s479_s3, %s311_s25 }
  0x13   : > { %v202_v4 = vld [vmem:[%s193_s28] sm:$0xff] }
  0x18   : > { %213 = vperm.xlu0 %357, %v210_v2  }
  0x82   : > { %v207_v3 = vpop.permute.xlu0 %206 }
  0x83   : > { %v209_v5 = vmul.f32 %v207_v3, %v202_v4 }
  0x8a   : > { %v214_v6 = vpop.permute.xlu0 %213 }
  0x8b   : > { %v216_v7 = vadd.f32 %v214_v6, %v209_v5 }
  0x8d   : > { %v217_v8 = vmax.f32 %v216_v7, 0.0 }
  0x8f   : > { %218 = vst [vmem:[%s201_s4] sm:$0xff] %v217_v8 }
  0x90 PF: > { %s13_s16 = sadd.s32 1, %s396_s16   ;;  %s480_s12 = smov %s388_s14 }
  0x91   : > { %p10_p7 = scmp.ge.s32.totalorder %s13_s16, 6   ;;  %s481_s13 = smov %s392_s15 }
  0x92   : > { %s482_s14 = smov %s485_s17  ;;  %s483_s15 = smov %s489_s18 }
  0x93   :  { %12 = sbr.rel (!%p10_p7) target bundleno = 3 (0x3), region = 62 }

// kernel: up_forward.3
= control target key start
LH: loop header
LB: loop body
LE: loop exit
PB: predicated region body
PF: predicated region fallthrough
CT: control target
= control target key end

     0   :  { %s2389_s30 = smov 0   ;;  %s2391_s10 = smov 0   ;;  %s3059_s0 = inlined_call_operand.vmem [shape: f32[2,16,16,4], index: 0, kind: input, shape index: {}, may-alias: {0,1,2}]   ;;  %s3060_s1 = inlined_call_operand.vmem [shape: f32[2,16,16,4], index: 1, kind: input, shape index: {}, may-alias: {0,1,2}]   ;;  %s3061_s2 = inlined_call_operand.vmem [shape: f32[2,16,16,4], index: 2, kind: input, shape index: {}, may-alias: {0,1,2}]   ;;  %s3062_s3 = inlined_call_operand.vmem [shape: bf16[2,16,16,4], index: 3, kind: input, shape index: {}, may-alias: {3,4,5}]   ;;  %s3063_s4 = inlined_call_operand.vmem [shape: bf16[2,16,16,4], index: 4, kind: input, shape index: {}, may-alias: {3,4,5}]   ;;  %s3064_s5 = inlined_call_operand.vmem [shape: bf16[2,16,16,4], index: 5, kind: input, shape index: {}, may-alias: {3,4,5}]   ;;  %s3065_s6 = inlined_call_operand.vmem [shape: bf16[72,8], index: 6, kind: input, shape index: {}]   ;;  %s3066_s7 = inlined_call_operand.vmem [shape: bf16[2,2,8,128], index: 7, kind: output, shape index: {0}]   ;;  %s3067_s8 = inlined_call_operand.vmem [shape: bf16[2,2,8,32], index: 8, kind: output, shape index: {1}]   ;;  %s3068_s9 = inlined_call_operand.vmem [shape: f32[2,2,2,8], index: 9, kind: output, shape index: {2}]  }
   0x1   :  { %s2393_s11 = smov 0   ;;  %s2395_s12 = smov 0  }
   0x2   :  { %s2397_s13 = smov 0  }
   0x3 LB: > { %s29_s14 = sadd.s32 1, %s2320_s11  ;;  %s32_s15 = sadd.s32 1, %s2324_s12  ;;  %s2328_s13 = sphi %s2397_s13, %s20_s13   ;;  %s2324_s12 = sphi %s2395_s12, %s3073_s12   ;;  %s2320_s11 = sphi %s2393_s11, %s3072_s11   ;;  %s2316_s10 = sphi %s2391_s10, %s3071_s10   ;;  %s2312_s30 = sphi %s2389_s30, %s3070_s30  }
   0x4   : > { %p30_p0 = scmp.ge.s32.totalorder %s29_s14, 2  ;;  %p2046_p1 = scmp.ge.s32.totalorder %s2328_s13, 1 }
   0x5   : > { %p464_p2 = scmp.lt.s32.totalorder %s2328_s13, 5 }
   0x6   : > { %s3075_s14 = smov (%p30_p0, %s29_s14), 0  ;;  %s3077_s15 = smov (!%p30_p0, %s32_s15), %s2324_s12 }
   0x7   : > { %p465_p3 = pnand %p2046_p1, %p464_p2  ;;  %p34_p4 = scmp.ge.s32.totalorder %s3077_s15, 2 }
   0x8   : > { %s2422_s16 = sshll.u32 (!%p465_p3), %s2316_s10, 3  ;;  %p587_p5 = scmp.lt.s32.totalorder (!%p465_p3), %s2312_s30, 1 }
   0x9   : > { %s3079_s15 = smov (%p34_p4, %s3077_s15), 0  ;;  %468 = sbr.rel (%p465_p3) target bundleno = 785 (0x311), region = 48 }
   0xa   : > { %p589_p6 = scmp.lt.s32.totalorder (!%p465_p3), %s2422_s16, 15  ;;  %s2052_s19 = sadd.s32 (!%p465_p3), 4294967295, %s2422_s16 }
   0xb   : > { %p599_p7 = scmp.gt.s32.totalorder (!%p465_p3), %s2052_s19, 0  ;;  %p2053_p8 = scmp.lt.s32.totalorder (!%p465_p3), %s2052_s19, 15 }
   0xc   : > { %s615_s26 = sadd.s32 (!%p465_p3), 8, %s2422_s16  ;;  %s2330_s29 = smov (!%p465_p3), 4  }
   0xd   : > { %p2447_p9 = scmp.lt.s32.totalorder (!%p465_p3), %s615_s26, 15  ;;  %p701_p10 = scmp.gt.s32.totalorder (!%p465_p3), %s2316_s10, 0 }
   0xe   : > { %s3081_s30 = smov (!%p587_p5, %s2312_s30), 1  ;;  %s3083_s19 = smov (!%p599_p7, %s2052_s19), 0  ;;  %vm819_vm0 = vcmask 31744   ;;  %vm894_vm1 = vcmask 1040384   ;;  %vm1182_vm2 = vcmask 1046528   ;;  %vm1554_vm4 = vcmask 1043456  }
   0xf   : > { %s590_s17 = scalar_select %p589_p6, %s2422_s16, 15  ;;  %vm1069_vm3 = vsmask.f32 7424  ;;  %vm1365_vm5 = vcmask 64512   ;;  %vm1382_vm6 = vcmask 130048   ;;  %vm1399_vm7 = vcmask 195584  }
  0x10   : > { %s2429_s18 = sshll.u32 %s3081_s30, 5  ;;  %s3085_s19 = smov (!%p2053_p8, %s3083_s19), 15  ;;  %vm1416_vm8 = vcmask 261120   ;;  %vm1433_vm9 = vcmask 326656   ;;  %vm1450_vm10 = vcmask 392192   ;;  %vm1467_vm11 = vcmask 457728  }
  0x11   : > { %s2048_s20 = sshll.u32 %s590_s17, 1  ;;  %s2058_s27 = sshll.u32 %s3085_s19, 1  ;;  %vm1484_vm12 = vcmask 523264   ;;  %vm1537_vm13 = vcmask 588800   ;;  %vm1740_vm14 = vcmask 58368   ;;  %vm1647_vm15 = vcmask 257024  }
  0x12   : > { %s2433_s21 = sadd.s32 %s2429_s18, %s2048_s20  ;;  %s2454_s16 = sadd.s32 %s2058_s27, %s2429_s18 }
  0x13   : > { %s2071_s22 = sshll.u32 %s2433_s21, 2  ;;  %s2081_s17 = sshll.u32 %s2454_s16, 2 }
  0x14   : > { %s2439_s25 = scalar_lea.vmem %s3062_s3, %s2071_s22  ;;  %s654_s22 = scalar_lea.vmem %s3063_s4, %s2081_s17 }
  0x15   : > { %v2169_v0 = vld [vmem:[%s2439_s25 + $0x8] sm:$0xff]   ;;  %v2130_v1 = vld [vmem:[%s2439_s25] sm:$0xff]   ;;  %v2171_v6 = vld [vmem:[%s2439_s25 + $0x18] sm:$0xff]   ;;  %s3087_s26 = smov (!%p2447_p9, %s615_s26), 15  ;;  %s2332_s28 = smov 24  }
  0x16   : > { %v2135_v2 = vunpack.c.l.bf16 %v2169_v0  ;;  %v2136_v3 = vunpack.c.h.bf16 %v2169_v0  ;;  %v2131_v4 = vunpack.c.l.bf16 %v2130_v1  ;;  %v2132_v5 = vunpack.c.h.bf16 %v2130_v1  ;;  %v2170_v7 = vld [vmem:[%s2439_s25 + $0x10] sm:$0xff]   ;;  %v2172_v12 = vld [vmem:[%s2439_s25 + $0x20] sm:$0xff]   ;;  %v2173_v22 = vld [vmem:[%s2439_s25 + $0x28] sm:$0xff]   ;;  %s3089_s26 = smov (!%p2447_p9, %s3087_s26), 15  ;;  %s2335_s19 = smov 40  }
  0x17   : > { %v2143_v8 = vunpack.c.l.bf16 %v2171_v6  ;;  %v2144_v9 = vunpack.c.h.bf16 %v2171_v6  ;;  %v2139_v14 = vunpack.c.l.bf16 %v2170_v7  ;;  %v2140_v15 = vunpack.c.h.bf16 %v2170_v7  ;;  %v2162_v18 = vld [vmem:[%s654_s22] sm:$0xff]   ;;  %v2174_v23 = vld [vmem:[%s2439_s25 + $0x30] sm:$0xff]   ;;  %s2065_s23 = sshll.u32 %s3089_s26, 1  ;;  %v2175_v39 = vld [vmem:[%s2439_s25 + $0x38] sm:$0xff]   ;;  %s2336_s20 = smov 32  }
  0x18   : > { %v2245_v10 = vpack.i.bf16 %v2136_v3, %v2135_v2  ;;  %v2240_v11 = vpack.i.bf16 %v2132_v5, %v2131_v4  ;;  %v2147_v16 = vunpack.c.l.bf16 %v2172_v12  ;;  %v2148_v17 = vunpack.c.h.bf16 %v2172_v12  ;;  %s2470_s24 = sadd.s32 %s2065_s23, %s2429_s18  ;;  %s2050_s18 = sshll.u32 %s2433_s21, 3 }
  0x19   : > { %v2255_v13 = vpack.i.bf16 %v2144_v9, %v2143_v8  ;;  %v2250_v19 = vpack.i.bf16 %v2140_v15, %v2139_v14  ;;  %v2163_v20 = vunpack.c.l.bf16 %v2162_v18  ;;  %v2164_v21 = vunpack.c.h.bf16 %v2162_v18  ;;  %s2088_s26 = sshll.u32 %s2470_s24, 2  ;;  %s2483_s22 = scalar_lea.vmem %s3059_s0, %s2050_s18 }
  0x1a   : > { %2246 = vrot.lane.b32.xlu1 %v2245_v10, %s2330_s29  ;;  %2241 = vrot.lane.b32.xlu0 %v2240_v11, %s2330_s29  ;;  %v2260_v24 = vpack.i.bf16 %v2148_v17, %v2147_v16  ;;  %v2151_v26 = vunpack.c.l.bf16 %v2173_v22  ;;  %v2152_v27 = vunpack.c.h.bf16 %v2173_v22  ;;  %v2155_v28 = vunpack.c.l.bf16 %v2174_v23  ;;  %s671_s17 = scalar_lea.vmem %s3064_s5, %s2088_s26  ;;  %v713_v37 = vld [vmem:[%s2483_s22 + $0x30] sm:$0xff]  ;;  %v714_v38 = vld [vmem:[%s2483_s22 + $0x38] sm:$0xff]  ;;  %s2331_s21 = smov 48  }
  0x1b   : > { %2256 = vrot.lane.b32.xlu2 %v2255_v13, %s2330_s29  ;;  %v2265_v25 = vpack.i.bf16 %v2164_v21, %v2163_v20  ;;  %v2156_v29 = vunpack.c.h.bf16 %v2174_v23  ;;  %v2166_v32 = vld [vmem:[%s671_s17] sm:$0xff]   ;;  %v2159_v42 = vunpack.c.l.bf16 %v2175_v39  ;;  %v2160_v43 = vunpack.c.h.bf16 %v2175_v39  ;;  %v716_v61 = vld [vmem:[%s2483_s22 + $0x48] sm:$0xff]  ;;  %s702_s25 = scalar_select %p701_p10, 1, 0  ;;  %v709_v63 = vld [vmem:[%s2483_s22 + $0x10] sm:$0xff] }
  0x1c   : > { %v2270_v30 = vpack.i.bf16 %v2152_v27, %v2151_v26  ;;  %v2167_v33 = vunpack.c.l.bf16 %v2166_v32  ;;  %v2168_v34 = vunpack.c.h.bf16 %v2166_v32  ;;  %v715_v60 = vld [vmem:[%s2483_s22 + $0x40] sm:$0xff]  ;;  %v710_v3 = vld [vmem:[%s2483_s22 + $0x18] sm:$0xff]  ;;  %v708_v6 = vld [vmem:[%s2483_s22 + $0x8] sm:$0xff]  ;;  %s2060_s23 = sshll.u32 %s2454_s16, 3  ;;  %s2333_s17 = smov 16  }
  0x1d   : > { %v2275_v31 = vpack.i.bf16 %v2156_v29, %v2155_v28  ;;  %v2280_v46 = vpack.i.bf16 %v2160_v43, %v2159_v42  ;;  %v707_v5 = vld [vmem:[%s2483_s22] sm:$0xff]  ;;  %s609_s27 = scalar_lea.vmem %s3060_s1, %s2060_s23  ;;  %s2334_s18 = smov 64  }
  0x1e   : > { %v2285_v35 = vpack.i.bf16 %v2168_v34, %v2167_v33  ;;  %v712_v34 = vld [vmem:[%s2483_s22 + $0x28] sm:$0xff]  ;;  %p678_p11 = scmp.lt.s32.totalorder %s2316_s10, 1 }
  0x1f   : > { %v837_v42 = vld [vmem:[%s609_s27 + $0x8] sm:$0xff] }
  0x20   : > { %s705_s23 = scalar_select %p678_p11, 1, 0 }
  0x21   : > { %s3091_s10 = smov (!%p678_p11, %s2316_s10), 1 }
  0x22   : > { %2251 = vrot.lane.b32.xlu1 %v2250_v19, %s2330_s29  ;;  %2266 = vrot.lane.b32.xlu0 %v2265_v25, %s2330_s29 }
  0x23   : > { %2261 = vrot.lane.b32.xlu2 %v2260_v24, %s2330_s29 }
  0x2a   : > { %2271 = vrot.lane.b32.xlu0 %v2270_v30, %s2330_s29  ;;  %2276 = vrot.lane.b32.xlu1 %v2275_v31, %s2330_s29 }
  0x2b   : > { %2281 = vrot.lane.b32.xlu2 %v2280_v46, %s2330_s29 }
  0x32   : > { %2286 = vrot.lane.b32.xlu0 %v2285_v35, %s2330_s29  ;;  %s703_s29 = scvt.s32.f32 %s702_s25  ;;  %s2337_s25 = smov 56  }
  0x34   : > { %v852_v22 = vstv %s703_s29  ;;  %s2338_s29 = smov 8  }
  0x75   : > { %v2257_v36 = vpop.permute.xlu2 %2256 }
  0x76   : > { %v2259_v40 = vunpack.i.h.bf16 %v2257_v36  ;;  %v2258_v41 = vunpack.i.l.bf16 %v2257_v36 }
  0x78   : > { %v826_v44 = vsel %vm819_vm0, %v713_v37, %v2258_v41  ;;  %v827_v45 = vsel %vm819_vm0, %v714_v38, %v2259_v40  ;;  %v711_v41 = vld [vmem:[%s2483_s22 + $0x20] sm:$0xff] }
  0x79   : > { %v907_v47 = vrot.slane %v826_v44, 7  ;;  %v908_v48 = vrot.slane %v827_v45, 7 }
  0x7b   : > { %v909_v49 = vsel %vm894_vm1, %v907_v47, %v908_v48  ;;  %v959_v50 = vsel %vm894_vm1, 0.0, %v907_v47  ;;  %v969_v57 = vsel %vm894_vm1, %v908_v48, 0.0  ;;  %v836_v47 = vld [vmem:[%s609_s27] sm:$0xff]  ;;  %s706_s27 = scvt.s32.f32 %s705_s23 }
  0x7c   : > { %v987_v51 = vpack.c.bf16 %v959_v50, %v959_v50  ;;  %v988_v52 = vpack.c.bf16 %v909_v49, %v909_v49  ;;  %v989_v62 = vpack.c.bf16 %v969_v57, %v969_v57 }
  0x7d   : > { %v2262_v56 = vpop.permute.xlu2 %2261 }
  0x7e   : > { %v1029_v53 = vunpack.c.l.b16 %v987_v51  ;;  %v1030_v54 = vunpack.c.l.b16 %v988_v52  ;;  %v2264_v58 = vunpack.i.h.bf16 %v2262_v56  ;;  %v2263_v59 = vunpack.i.l.bf16 %v2262_v56 }
  0x7f   : > { %v1057_v13 = vunpack.c.l.b16 %v989_v62 }
  0x80   : > { %v2494_v55 = vpack.c.b16 %v1030_v54, %v1029_v53  ;;  %v828_v0 = vsel %vm819_vm0, %v715_v60, %v2263_v59  ;;  %v2505_v1 = vsel %vm819_vm0, %v716_v61, %v2264_v58 }
  0x81   : > { %v910_v11 = vrot.slane %v828_v0, 7  ;;  %v911_v12 = vrot.slane %v2505_v1, 7  ;;  %v2535_v37 = vpack.c.b16 %v1057_v13, %v1057_v13  ;;  %v717_v13 = vld [vmem:[%s2483_s22 + $0x50] sm:$0xff] }
  0x82   : > { %1303 = vrot.lane.b32.xlu1 %v2494_v55, %s2331_s21 }
  0x83   : > { %v2533_v36 = vsel %vm894_vm1, %v910_v11, %v911_v12  ;;  %v960_v43 = vsel %vm894_vm1, 0.0, %v910_v11 }
  0x84   : > { %v990_v0 = vpack.c.bf16 %v960_v43, %v960_v43  ;;  %v1196_v43 = vrot.slane %v2535_v37, 1 }
  0x8c   : > { %v2247_v2 = vpop.permute.xlu1 %2246  ;;  %v2242_v4 = vpop.permute.xlu0 %2241 }
  0x8d   : > { %v2249_v7 = vunpack.i.h.bf16 %v2247_v2  ;;  %v2248_v8 = vunpack.i.l.bf16 %v2247_v2  ;;  %v2244_v9 = vunpack.i.h.bf16 %v2242_v4  ;;  %v2243_v10 = vunpack.i.l.bf16 %v2242_v4 }
  0x8e   : > { %v991_v2 = vpack.c.bf16 %v2533_v36, %v2533_v36 }
  0x8f   : > { %v822_v14 = vsel %vm819_vm0, %v709_v63, %v2248_v8  ;;  %v823_v15 = vsel %vm819_vm0, %v710_v3, %v2249_v7  ;;  %v820_v16 = vsel %vm819_vm0, %v707_v5, %v2243_v10  ;;  %v2516_v17 = vsel %vm819_vm0, %v708_v6, %v2244_v9 }
  0x90   : > { %v901_v18 = vrot.slane %v822_v14, 7  ;;  %v902_v19 = vrot.slane %v823_v15, 7  ;;  %v898_v20 = vrot.slane %v820_v16, 7  ;;  %v899_v21 = vrot.slane %v2516_v17, 7 }
  0x92   : > { %v903_v23 = vsel %vm894_vm1, %v901_v18, %v902_v19  ;;  %v957_v24 = vsel %vm894_vm1, 0.0, %v901_v18  ;;  %v967_v25 = vsel %vm894_vm1, %v902_v19, 0.0  ;;  %v900_v26 = vsel %vm894_vm1, %v898_v20, %v899_v21  ;;  %v718_v19 = vld [vmem:[%s2483_s22 + $0x58] sm:$0xff] }
  0x93   : > { %v981_v27 = vpack.c.bf16 %v957_v24, %v957_v24  ;;  %v982_v28 = vpack.c.bf16 %v903_v23, %v903_v23  ;;  %v983_v29 = vpack.c.bf16 %v967_v25, %v967_v25  ;;  %v956_v30 = vsel %vm894_vm1, 0.0, %v898_v20 }
  0x94   : > { %v978_v31 = vpack.c.bf16 %v956_v30, %v956_v30  ;;  %v979_v32 = vpack.c.bf16 %v900_v26, %v900_v26  ;;  %v2252_v33 = vpop.permute.xlu1 %2251  ;;  %v2267_v35 = vpop.permute.xlu0 %2266 }
  0x95   : > { %v1025_v38 = vunpack.c.l.b16 %v981_v27  ;;  %v1026_v39 = vunpack.c.l.b16 %v982_v28  ;;  %v2254_v40 = vunpack.i.h.bf16 %v2252_v33  ;;  %v2253_v46 = vunpack.i.l.bf16 %v2252_v33 }
  0x96   : > { %v1023_v44 = vunpack.c.l.b16 %v978_v31  ;;  %v1024_v45 = vunpack.c.l.b16 %v979_v32  ;;  %v2269_v48 = vunpack.i.h.bf16 %v2267_v35  ;;  %v2268_v51 = vunpack.i.l.bf16 %v2267_v35 }
  0x97   : > { %v2539_v49 = vpack.c.b16 %v1026_v39, %v1025_v38  ;;  %v825_v50 = vsel %vm819_vm0, %v712_v34, %v2254_v40  ;;  %v1055_v52 = vunpack.c.l.b16 %v983_v29  ;;  %v824_v54 = vsel %vm819_vm0, %v711_v41, %v2253_v46  ;;  %v719_v39 = vld [vmem:[%s2483_s22 + $0x60] sm:$0xff]  ;;  %v720_v40 = vld [vmem:[%s2483_s22 + $0x68] sm:$0xff] }
  0x98   : > { %v2542_v53 = vpack.c.b16 %v1024_v45, %v1023_v44  ;;  %v905_v56 = vrot.slane %v825_v50, 7  ;;  %v851_v57 = vsel %vm819_vm0, %v837_v42, %v2269_v48  ;;  %v904_v58 = vrot.slane %v824_v54, 7 }
  0x99   : > { %v2546_v59 = vmul.f32 %v852_v22, %v851_v57  ;;  %v850_v60 = vsel %vm819_vm0, %v836_v47, %v2268_v51  ;;  %v2549_v61 = vpack.c.b16 %v1055_v52, %v1055_v52  ;;  %v1189_v6 = vrot.slane %v2539_v49, 1 }
  0x9a   : > { %v968_v62 = vsel %vm894_vm1, %v905_v56, 0.0  ;;  %1228 = vrot.lane.b32.xlu0 %v2542_v53, %s2332_s28  ;;  %v853_v63 = vmul.f32 %v852_v22, %v850_v60  ;;  %v906_v3 = vsel %vm894_vm1, %v904_v58, %v905_v56  ;;  %v958_v4 = vsel %vm894_vm1, 0.0, %v904_v58 }
  0x9b   : > { %v896_v5 = vrot.slane %v2546_v59, 7  ;;  %v984_v7 = vpack.c.bf16 %v958_v4, %v958_v4  ;;  %v985_v8 = vpack.c.bf16 %v906_v3, %v906_v3  ;;  %v1190_v10 = vrot.slane %v2549_v61, 1 }
  0x9c   : > { %v895_v9 = vrot.slane %v853_v63, 7  ;;  %v2272_v11 = vpop.permute.xlu0 %2271  ;;  %v2277_v14 = vpop.permute.xlu1 %2276  ;;  %v986_v15 = vpack.c.bf16 %v968_v62, %v968_v62  ;;  %v1195_v38 = vrot.slane %v2494_v55, 1  ;;  %v1031_v41 = vunpack.c.l.b16 %v990_v0 }
  0x9d   : > { %v2274_v16 = vunpack.i.h.bf16 %v2272_v11  ;;  %v2273_v18 = vunpack.i.l.bf16 %v2272_v11  ;;  %v2279_v20 = vunpack.i.h.bf16 %v2277_v14  ;;  %v1027_v22 = vunpack.c.l.b16 %v984_v7 }
  0x9e   : > { %v1028_v23 = vunpack.c.l.b16 %v985_v8  ;;  %v897_v24 = vsel %vm894_vm1, %v895_v9, %v896_v5  ;;  %v955_v25 = vsel %vm894_vm1, 0.0, %v895_v9  ;;  %v2568_v28 = vsel %vm1182_vm2, %v1189_v6, %v1190_v10 }
  0x9f   : > { %v975_v26 = vpack.c.bf16 %v955_v25, %v955_v25  ;;  %v976_v27 = vpack.c.bf16 %v897_v24, %v897_v24  ;;  %v830_v29 = vsel %vm819_vm0, %v717_v13, %v2273_v18  ;;  %1211 = vrot.lane.b32.xlu1 %v2568_v28, %s2333_s17  ;;  %v831_v31 = vsel %vm819_vm0, %v718_v19, %v2274_v16 }
  0xa0   : > { %v2571_v30 = vpack.c.b16 %v1028_v23, %v1027_v22  ;;  %v913_v32 = vrot.slane %v830_v29, 7  ;;  %v2278_v33 = vunpack.i.l.bf16 %v2277_v14  ;;  %v914_v36 = vrot.slane %v831_v31, 7 }
  0xa1   : > { %v1021_v34 = vunpack.c.l.b16 %v975_v26  ;;  %v1022_v35 = vunpack.c.l.b16 %v976_v27  ;;  %v1032_v42 = vunpack.c.l.b16 %v991_v2  ;;  %v1056_v44 = vunpack.c.l.b16 %v986_v15 }
  0xa2   : > { %1232 = vrot.lane.b32.xlu2 %v2571_v30, %s2332_s28  ;;  %1299 = vrot.lane.b32.xlu0 %v2539_v49, %s2331_s21  ;;  %v971_v46 = vsel %vm894_vm1, %v914_v36, 0.0  ;;  %v915_v47 = vsel %vm894_vm1, %v913_v32, %v914_v36  ;;  %v961_v48 = vsel %vm894_vm1, 0.0, %v913_v32  ;;  %v832_v50 = vsel %vm819_vm0, %v719_v39, %v2278_v33 }
  0xa3   : > { %v2584_v45 = vpack.c.b16 %v1022_v35, %v1021_v34  ;;  %v2591_v51 = vsel %vm819_vm0, %v720_v40, %v2279_v20  ;;  %v995_v52 = vpack.c.bf16 %v971_v46, %v971_v46  ;;  %v2593_v54 = vpack.c.b16 %v1056_v44, %v1056_v44 }
  0xa4   : > { %v2595_v56 = vpack.c.b16 %v1032_v42, %v1031_v41  ;;  %v2598_v57 = vsel %vm1182_vm2, %v1195_v38, %v1196_v43  ;;  %v993_v58 = vpack.c.bf16 %v961_v48, %v961_v48  ;;  %v994_v60 = vpack.c.bf16 %v915_v47, %v915_v47 }
  0xa5   : > { %v916_v62 = vrot.slane %v832_v50, 7  ;;  %v917_v63 = vrot.slane %v2591_v51, 7  ;;  %v1192_v0 = vrot.slane %v2571_v30, 1  ;;  %v1193_v2 = vrot.slane %v2593_v54, 1 }
  0xa6   : > { %v1059_v3 = vunpack.c.l.b16 %v995_v52  ;;  %v1033_v4 = vunpack.c.l.b16 %v993_v58  ;;  %v1034_v6 = vunpack.c.l.b16 %v994_v60  ;;  %v966_v11 = vsel %vm894_vm1, %v899_v21, 0.0 }
  0xa7   : > { %1353 = vrot.lane.b32.xlu1 %v2598_v57, %s2334_s18  ;;  %v918_v7 = vsel %vm894_vm1, %v916_v62, %v917_v63  ;;  %v962_v8 = vsel %vm894_vm1, 0.0, %v916_v62  ;;  %v2614_v9 = vsel %vm1182_vm2, %v1192_v0, %v1193_v2  ;;  %v980_v16 = vpack.c.bf16 %v966_v11, %v966_v11 }
  0xa8   : > { %v2616_v10 = vpack.c.b16 %v1059_v3, %v1059_v3  ;;  %v996_v13 = vpack.c.bf16 %v962_v8, %v962_v8  ;;  %v997_v14 = vpack.c.bf16 %v918_v7, %v918_v7  ;;  %v2621_v15 = vpack.c.b16 %v1034_v6, %v1033_v4 }
  0xa9   : > { %v1054_v21 = vunpack.c.l.b16 %v980_v16  ;;  %v1085_v25 = vshll.u32 %v2542_v53, 16  ;;  %v1186_v26 = vrot.slane %v2542_v53, 1  ;;  %v1083_v29 = vshrl.u32 %v2542_v53, 16 }
  0xaa   : > { %1236 = vrot.lane.b32.xlu2 %v2595_v56, %s2332_s28  ;;  %1230 = vrot.lane.b32.xlu0 %v2539_v49, %s2332_s28  ;;  %v1201_v18 = vrot.slane %v2621_v15, 1  ;;  %v1202_v19 = vrot.slane %v2616_v10, 1  ;;  %v1035_v20 = vunpack.c.l.b16 %v996_v13  ;;  %v1036_v22 = vunpack.c.l.b16 %v997_v14 }
  0xab   : > { %v1062_v24 = vpack.c.b16 %v1054_v21, %v1054_v21  ;;  %v1087_v31 = vrot.slane %v1085_v25, 1  ;;  %v1097_v36 = vshll.u32 %v2539_v49, 16  ;;  %v970_v38 = vsel %vm894_vm1, %v911_v12, 0.0 }
  0xac   : > { %v2632_v17 = vsel %vm1182_vm2, %v1201_v18, %v1202_v19  ;;  %v2634_v23 = vpack.c.b16 %v1036_v22, %v1035_v20  ;;  %v992_v41 = vpack.c.bf16 %v970_v38, %v970_v38  ;;  %v1095_v42 = vshrl.u32 %v2539_v49, 16 }
  0xad   : > { %v1187_v27 = vrot.slane %v1062_v24, 1  ;;  %v1090_v32 = vshll.u32 %v1062_v24, 16  ;;  %v1088_v34 = vor.u32 %v1087_v31, %v1083_v29  ;;  %v1099_v40 = vrot.slane %v1097_v36, 1 }
  0xae   : > { %v1102_v43 = vshll.u32 %v2549_v61, 16  ;;  %v1058_v12 = vunpack.c.l.b16 %v992_v41  ;;  %v1121_v61 = vshll.u32 %v2494_v55, 16  ;;  %v1198_v48 = vrot.slane %v2595_v56, 1  ;;  %v721_v41 = vld [vmem:[%s2483_s22 + $0x70] sm:$0xff] }
  0xaf   : > { %1213 = vrot.lane.b32.xlu1 %v2614_v9, %s2333_s17  ;;  %v1188_v33 = vsel %vm1182_vm2, %v1186_v26, %v1187_v27  ;;  %v1092_v35 = vrot.slane %v1090_v32, 1  ;;  %v1100_v1 = vor.u32 %v1099_v40, %v1095_v42  ;;  %v1119_v52 = vshrl.u32 %v2494_v55, 16  ;;  %v722_v42 = vld [vmem:[%s2483_s22 + $0x78] sm:$0xff]  ;;  %s2067_s22 = sshll.u32 %s2470_s24, 3 }
  0xb0   : > { %v1104_v44 = vrot.slane %v1102_v43, 1  ;;  %v1066_v47 = vpack.c.b16 %v1058_v12, %v1058_v12  ;;  %v1123_v58 = vrot.slane %v1121_v61, 1  ;;  %v1126_v60 = vshll.u32 %v2535_v37, 16  ;;  %s626_s26 = scalar_lea.vmem %s3061_s2, %s2067_s22 }
  0xb1   : > { %v1093_v39 = vsel %vm1069_vm3, %v1088_v34, %v1092_v35  ;;  %v1133_v2 = vshll.u32 %v2595_v56, 16  ;;  %v1131_v37 = vshrl.u32 %v2595_v56, 16  ;;  %v1109_v8 = vshll.u32 %v2571_v30, 16 }
  0xb2   : > { %1301 = vrot.lane.b32.xlu2 %v2571_v30, %s2331_s21  ;;  %1234 = vrot.lane.b32.xlu0 %v2494_v55, %s2332_s28  ;;  %v1105_v46 = vsel %vm1069_vm3, %v1100_v1, %v1104_v44  ;;  %v1199_v50 = vrot.slane %v1066_v47, 1  ;;  %v1128_v0 = vrot.slane %v1126_v60, 1  ;;  %v1138_v6 = vshll.u32 %v1066_v47, 16  ;;  %v2287_v60 = vpop.permute.xlu0 %2286 }
  0xb3   : > { %v1135_v4 = vrot.slane %v1133_v2, 1  ;;  %v1145_v11 = vshll.u32 %v2621_v15, 16  ;;  %v1107_v14 = vshrl.u32 %v2571_v30, 16  ;;  %v1111_v16 = vrot.slane %v1109_v8, 1 }
  0xb4   : > { %v2674_v62 = vsel %vm1182_vm2, %v1198_v48, %v1199_v50  ;;  %v1114_v18 = vshll.u32 %v2593_v54, 16  ;;  %v1150_v20 = vshll.u32 %v2616_v10, 16  ;;  %v972_v22 = vsel %vm894_vm1, %v917_v63, 0.0  ;;  %v2282_v10 = vpop.permute.xlu2 %2281 }
  0xb5   : > { %v1136_v7 = vor.u32 %v1135_v4, %v1131_v37  ;;  %v1147_v19 = vrot.slane %v1145_v11, 1  ;;  %v1112_v21 = vor.u32 %v1111_v16, %v1107_v14  ;;  %v998_v25 = vpack.c.bf16 %v972_v22, %v972_v22 }
  0xb6   : > { %v1116_v24 = vrot.slane %v1114_v18, 1  ;;  %v1152_v26 = vrot.slane %v1150_v20, 1  ;;  %v965_v29 = vsel %vm894_vm1, %v896_v5, 0.0  ;;  %v1157_v59 = vshll.u32 %v2634_v23, 16 }
  0xb7   : > { %1219 = vrot.lane.b32.xlu1 %v2632_v17, %s2333_s17  ;;  %v1060_v63 = vunpack.c.l.b16 %v998_v25  ;;  %v977_v31 = vpack.c.bf16 %v965_v29, %v965_v29  ;;  %v2284_v36 = vunpack.i.h.bf16 %v2282_v10  ;;  %v2283_v38 = vunpack.i.l.bf16 %v2282_v10 }
  0xb8   : > { %v1117_v27 = vsel %vm1069_vm3, %v1112_v21, %v1116_v24  ;;  %v1159_v34 = vrot.slane %v1157_v59, 1  ;;  %v1073_v40 = vshll.u32 %v2584_v45, 16  ;;  %v1071_v12 = vshrl.u32 %v2584_v45, 16 }
  0xb9   : > { %v2715_v32 = vpack.c.b16 %v1060_v63, %v1060_v63  ;;  %v1053_v5 = vunpack.c.l.b16 %v977_v31  ;;  %v834_v47 = vsel %vm819_vm0, %v721_v41, %v2283_v38  ;;  %v835_v61 = vsel %vm819_vm0, %v722_v42, %v2284_v36 }
  0xba   : > { %1307 = vrot.lane.b32.xlu2 %v2621_v15, %s2331_s21  ;;  %1240 = vrot.lane.b32.xlu0 %v2634_v23, %s2332_s28  ;;  %v2288_v25 = vunpack.i.l.bf16 %v2287_v60  ;;  %v871_v31 = vstv %s706_s27 }
  0xbb   : > { %v1162_v35 = vshll.u32 %v2715_v32, 16  ;;  %v1205_v24 = vrot.slane %v2715_v32, 1 }
  0xbd   : > { %v1164_v44 = vrot.slane %v1162_v35, 1 }
  0xbf   : > { %1284 = vrot.lane.b32.xlu1 %v2598_v57, %s2335_s19 }
  0xc2   : > { %1305 = vrot.lane.b32.xlu0 %v2595_v56, %s2331_s21  ;;  %1278 = vrot.lane.b32.xlu2 %v1188_v33, %s2335_s19 }
  0xc7   : > { %1259 = vrot.lane.b32.xlu1 %v1093_v39, %s2336_s20 }
  0xca   : > { %1209 = vrot.lane.b32.xlu0 %v1188_v33, %s2333_s17  ;;  %1349 = vrot.lane.b32.xlu2 %v2568_v28, %s2334_s18  ;;  %v1155_v33 = vshrl.u32 %v2634_v23, 16 }
  0xcc   : > { %v1160_v1 = vor.u32 %v1159_v34, %v1155_v33 }
  0xce   : > { %v2735_v50 = vsel %vm1069_vm3, %v1160_v1, %v1164_v44 }
  0xcf   : > { %1330 = vrot.lane.b32.xlu1 %v1105_v46, %s2337_s25 }
  0xd2   : > { %1280 = vrot.lane.b32.xlu0 %v2568_v28, %s2335_s19  ;;  %1282 = vrot.lane.b32.xlu2 %v2614_v9, %s2335_s19  ;;  %v1124_v28 = vor.u32 %v1123_v58, %v1119_v52  ;;  %v919_v52 = vrot.slane %v834_v47, 7  ;;  %v920_v58 = vrot.slane %v835_v61, 7 }
  0xd4   : > { %v1129_v3 = vsel %vm1069_vm3, %v1124_v28, %v1128_v0  ;;  %v921_v4 = vsel %vm894_vm1, %v919_v52, %v920_v58  ;;  %v973_v16 = vsel %vm894_vm1, %v920_v58, 0.0 }
  0xd5   : > { %v1000_v11 = vpack.c.bf16 %v921_v4, %v921_v4  ;;  %v1001_v20 = vpack.c.bf16 %v973_v16, %v973_v16 }
  0xd7   : > { %1168 = vrot.lane.b32.xlu1 %v1093_v39, %s2338_s29  ;;  %v1061_v39 = vpack.c.b16 %v1053_v5, %v1053_v5  ;;  %v1226_v21 = vunpack.c.l.b16 %v1000_v11  ;;  %v1245_v63 = vunpack.c.l.b16 %v1001_v20 }
  0xd9   : > { %v1078_v48 = vshll.u32 %v1061_v39, 16  ;;  %v1184_v37 = vrot.slane %v1061_v39, 1  ;;  %v1246_v34 = vpack.c.b16 %v1245_v63, %v1245_v63  ;;  %v1509_v63 = vld [vmem:[%s3065_s6 + $0x20] sm:$0xf] }
  0xda   : > { %1286 = vrot.lane.b32.xlu0 %v2674_v62, %s2335_s19  ;;  %1215 = vrot.lane.b32.xlu2 %v2598_v57, %s2333_s17  ;;  %v1140_v57 = vrot.slane %v1138_v6, 1  ;;  %v963_v6 = vsel %vm894_vm1, 0.0, %v919_v52 }
  0xdb   : > { %v1080_v0 = vrot.slane %v1078_v48, 1  ;;  %v999_v8 = vpack.c.bf16 %v963_v6, %v963_v6 }
  0xdc   : > { %v2691_v13 = vsel %vm1069_vm3, %v1136_v7, %v1140_v57 }
  0xdd   : > { %v1225_v22 = vunpack.c.l.b16 %v999_v8 }
  0xdf   : > { %1334 = vrot.lane.b32.xlu1 %v1129_v3, %s2337_s25 }
  0xe2   : > { %1351 = vrot.lane.b32.xlu0 %v2614_v9, %s2334_s18  ;;  %1357 = vrot.lane.b32.xlu2 %v2632_v17, %s2334_s18  ;;  %v1143_v9 = vshrl.u32 %v2621_v15, 16 }
  0xe4   : > { %v1148_v54 = vor.u32 %v1147_v19, %v1143_v9  ;;  %v1204_v19 = vrot.slane %v2634_v23, 1 }
  0xe6   : > { %v2710_v51 = vsel %vm1069_vm3, %v1148_v54, %v1152_v26  ;;  %v855_v54 = vld [vmem:[%s626_s26] sm:$0xff]  ;;  %v856_v26 = vld [vmem:[%s626_s26 + $0x8] sm:$0xff]  ;;  %v1206_v29 = vsel %vm1182_vm2, %v1204_v19, %v1205_v24 }
  0xe7   : > { %1267 = vrot.lane.b32.xlu1 %v2691_v13, %s2336_s20  ;;  %v869_v59 = vsel %vm819_vm0, %v855_v54, %v2288_v25 }
  0xe8   : > { %v872_v38 = vmul.f32 %v871_v31, %v869_v59  ;;  %v1527_v59 = vunpack.c.l.b16 %v1509_v63 }
  0xea   : > { %1170 = vrot.lane.b32.xlu0 %v1105_v46, %s2338_s29  ;;  %1174 = vrot.lane.b32.xlu2 %v1129_v3, %s2338_s29  ;;  %v922_v42 = vrot.slane %v872_v38, 7 }
  0xec   : > { %v964_v58 = vsel %vm894_vm1, 0.0, %v922_v42 }
  0xef   : > { %1332 = vrot.lane.b32.xlu1 %v1117_v27, %s2337_s25 }
  0xf2   : > { %1263 = vrot.lane.b32.xlu0 %v1117_v27, %s2336_s20  ;;  %1178 = vrot.lane.b32.xlu2 %v2710_v51, %s2338_s29 }
  0xf4   : > { %v2748_v57 = vpop.permute.xlu1 %1303 }
  0xf7   : > { %1338 = vrot.lane.b32.xlu1 %v2710_v51, %s2337_s25 }
  0xfa   : > { %1261 = vrot.lane.b32.xlu0 %v1105_v46, %s2336_s20  ;;  %1265 = vrot.lane.b32.xlu2 %v1129_v3, %s2336_s20  ;;  %v1075_v46 = vrot.slane %v1073_v40, 1  ;;  %v1183_v3 = vrot.slane %v2584_v45, 1  ;;  %v1255_v40 = vshll.u32 %v1246_v34, 16 }
  0xfc   : > { %v2727_v43 = vpop.permute.xlu2 %1232  ;;  %v1076_v28 = vor.u32 %v1075_v46, %v1071_v12  ;;  %v1185_v14 = vsel %vm1182_vm2, %v1183_v3, %v1184_v37  ;;  %v1276_v12 = vrot.slane %v1246_v34, 1  ;;  %v1257_v48 = vrot.slane %v1255_v40, 1 }
  0xfd   : > { %v1532_v34 = vpack.c.b16 %v1527_v59, %v1527_v59 }
  0xfe   : > { %v1081_v7 = vsel %vm1069_vm3, %v1076_v28, %v1080_v0 }
  0xff   : > { %1176 = vrot.lane.b32.xlu1 %v2691_v13, %s2338_s29 }
 0x102   : > { %1172 = vrot.lane.b32.xlu0 %v1117_v27, %s2338_s29  ;;  %1271 = vrot.lane.b32.xlu2 %v2735_v50, %s2336_s20  ;;  %v2769_v27 = vpack.c.b16 %v1226_v21, %v1225_v22 }
 0x104   : > { %v2740_v2 = vpop.permute.xlu2 %1236  ;;  %v1250_v35 = vshll.u32 %v2769_v27, 16  ;;  %v1275_v44 = vrot.slane %v2769_v27, 1 }
 0x106   : > { %v1252_v39 = vrot.slane %v1250_v35, 1 }
 0x107   : > { %1166 = vrot.lane.b32.xlu1 %v1081_v7, %s2338_s29 }
 0x10a   : > { %1336 = vrot.lane.b32.xlu0 %v2691_v13, %s2337_s25  ;;  %1207 = vrot.lane.b32.xlu2 %v1185_v14, %s2333_s17  ;;  %v2289_v13 = vunpack.i.h.bf16 %v2287_v60  ;;  %v1277_v60 = vsel %vm1182_vm2, %v1275_v44, %v1276_v12  ;;  %v2126_v12 = vld [vmem:[%s3065_s6 + $0x8] sm:$0xff] }
 0x10c   : > { %v2758_v18 = vpop.permute.xlu2 %1301  ;;  %v2760_v9 = vpop.permute.xlu0 %1228  ;;  %v870_v32 = vsel %vm819_vm0, %v856_v26, %v2289_v13 }
 0x10d   : > { %v873_v36 = vmul.f32 %v871_v31, %v870_v32 }
 0x10f   : > { %1217 = vrot.lane.b32.xlu1 %v2674_v62, %s2333_s17  ;;  %v923_v41 = vrot.slane %v873_v36, 7  ;;  %v1556_v36 = vsel %vm1554_vm4, %v1532_v34, 0 }
 0x110   : > { %2176 = vmatpush.bf16.msra.mxu1 %v1556_v36  ;;  %2177 = vmatpush.bf16.msra.mxu2 %v1556_v36 }
 0x111   : > { %v2772_v10 = vpop.permute.xlu1 %1211  ;;  %v924_v52 = vsel %vm894_vm1, %v922_v42, %v923_v41  ;;  %v974_v3 = vsel %vm894_vm1, %v923_v41, 0.0  ;;  %v2128_v41 = vld [vmem:[%s3065_s6 + $0x18] sm:$0xff]  ;;  %1561 = vmatpush.bf16.msra.mxu0 %v1556_v36  ;;  %2178 = vmatpush.bf16.msra.mxu3 %v1556_v36 }
 0x112   : > { %1355 = vrot.lane.b32.xlu0 %v2674_v62, %s2334_s18  ;;  %1290 = vrot.lane.b32.xlu2 %v1206_v29, %s2335_s19  ;;  %v1248_v62 = vshrl.u32 %v2769_v27, 16  ;;  %v1003_v28 = vpack.c.bf16 %v924_v52, %v924_v52  ;;  %v1004_v11 = vpack.c.bf16 %v974_v3, %v974_v3  ;;  %v2125_v52 = vld [vmem:[%s3065_s6] sm:$0xff] }
 0x114   : > { %v2779_v5 = vpop.permute.xlu2 %1307  ;;  %v2781_v33 = vpop.permute.xlu0 %1299  ;;  %v1253_v46 = vor.u32 %v1252_v39, %v1248_v62  ;;  %v1297_v8 = vunpack.c.l.b16 %v1003_v28  ;;  %v1316_v16 = vunpack.c.l.b16 %v1004_v11  ;;  %2179 = vmatpush.bf16.msra.mxu1 %v2128_v41  ;;  %2180 = vmatpush.bf16.msra.mxu2 %v2128_v41 }
 0x115   : > { %1562 = vmatpush.bf16.msra.mxu0 %v2128_v41  ;;  %2181 = vmatpush.bf16.msra.mxu3 %v2128_v41 }
 0x116   : > { %v1258_v0 = vsel %vm1069_vm3, %v1253_v46, %v1257_v48  ;;  %v1317_v21 = vpack.c.b16 %v1316_v16, %v1316_v16 }
 0x117   : > { %1238 = vrot.lane.b32.xlu1 %v2621_v15, %s2332_s28 }
 0x118   : > { %v1326_v54 = vshll.u32 %v1317_v21, 16  ;;  %v1347_v62 = vrot.slane %v1317_v21, 1 }
 0x119   : > { %v2787_v1 = vpop.permute.xlu1 %1353 }
 0x11a   : > { %1269 = vrot.lane.b32.xlu0 %v2710_v51, %s2336_s20  ;;  %1311 = vrot.lane.b32.xlu2 %v2769_v27, %s2331_s21  ;;  %v1002_v51 = vpack.c.bf16 %v964_v58, %v964_v58  ;;  %v1328_v32 = vrot.slane %v1326_v54, 1 }
 0x11c   : > { %v2794_v47 = vpop.permute.xlu0 %1230  ;;  %v2796_v61 = vpop.permute.xlu2 %1278  ;;  %v1296_v7 = vunpack.c.l.b16 %v1002_v51 }
 0x11e   : > { %v1298_v14 = vpack.c.b16 %v1297_v8, %v1296_v7 }
 0x11f   : > { %1361 = vrot.lane.b32.xlu1 %v1277_v60, %s2334_s18 }
 0x120   : > { %v1321_v24 = vshll.u32 %v1298_v14, 16  ;;  %v1319_v13 = vshrl.u32 %v1298_v14, 16 }
 0x121   : > { %v2804_v37 = vpop.permute.xlu1 %1213 }
 0x122   : > { %1309 = vrot.lane.b32.xlu0 %v2634_v23, %s2331_s21  ;;  %1342 = vrot.lane.b32.xlu2 %v1258_v0, %s2337_s25  ;;  %v1323_v25 = vrot.slane %v1321_v24, 1 }
 0x124   : > { %v2809_v4 = vpop.permute.xlu0 %1234  ;;  %v2811_v6 = vpop.permute.xlu2 %1349  ;;  %v1324_v31 = vor.u32 %v1323_v25, %v1319_v13 }
 0x126   : > { %v1329_v35 = vsel %vm1069_vm3, %v1324_v31, %v1328_v32 }
 0x127   : > { %1340 = vrot.lane.b32.xlu1 %v2735_v50, %s2337_s25 }
 0x129   : > { %v2815_v19 = vpop.permute.xlu1 %1219 }
 0x12a   : > { %1180 = vrot.lane.b32.xlu0 %v2735_v50, %s2338_s29  ;;  %1288 = vrot.lane.b32.xlu2 %v2632_v17, %s2335_s19 }
 0x12c   : > { %v2821_v20 = vpop.permute.xlu0 %1240  ;;  %v2823_v22 = vpop.permute.xlu2 %1282 }
 0x12f   : > { %1221 = vrot.lane.b32.xlu1 %v1206_v29, %s2333_s17 }
 0x131   : > { %v2826_v26 = vpop.permute.xlu1 %1284 }
 0x132   : > { %1273 = vrot.lane.b32.xlu0 %v1258_v0, %s2336_s20  ;;  %1359 = vrot.lane.b32.xlu2 %v1206_v29, %s2334_s18  ;;  %v1346_v29 = vrot.slane %v1298_v14, 1 }
 0x134   : > { %v2830_v50 = vpop.permute.xlu0 %1305  ;;  %v2832_v17 = vpop.permute.xlu2 %1215  ;;  %v1348_v42 = vsel %vm1182_vm2, %v1346_v29, %v1347_v62 }
 0x137   : > { %1292 = vrot.lane.b32.xlu1 %v1277_v60, %s2335_s19 }
 0x139   : > { %v2839_v38 = vpop.permute.xlu1 %1259 }
 0x13a   : > { %1344 = vrot.lane.b32.xlu0 %v1329_v35, %s2337_s25  ;;  %1242 = vrot.lane.b32.xlu2 %v2769_v27, %s2332_s28  ;;  %v2127_v27 = vld [vmem:[%s3065_s6 + $0x10] sm:$0xff] }
 0x13b   : > { %2182 = vmatpush.bf16.msra.mxu1 %v2127_v27  ;;  %2183 = vmatpush.bf16.msra.mxu2 %v2127_v27 }
 0x13c   : > { %v1210_v39 = vpop.permute.xlu0 %1209  ;;  %v2844_v40 = vpop.permute.xlu2 %1357  ;;  %1563 = vmatpush.bf16.msra.mxu0 %v2127_v27  ;;  %2184 = vmatpush.bf16.msra.mxu3 %v2127_v27 }
 0x13f   : > { %1363 = vrot.lane.b32.xlu1 %v1348_v42, %s2334_s18  ;;  %2185 = vmatpush.bf16.msra.mxu1 %v2126_v12 }
 0x140   : > { %2186 = vmatpush.bf16.msra.mxu2 %v2126_v12  ;;  %1564 = vmatpush.bf16.msra.mxu0 %v2126_v12 }
 0x141   : > { %v2854_v44 = vpop.permute.xlu1 %1330  ;;  %2187 = vmatpush.bf16.msra.mxu3 %v2126_v12 }
 0x142   : > { %1313 = vrot.lane.b32.xlu2 %v1298_v14, %s2331_s21  ;;  %s2089_s21 = sshll.u32 %s3081_s30, 1 }
 0x143   : > { %2188 = vmatpush.bf16.msra.mxu1 %v2125_v52  ;;  %s681_s26 = sadd.s32 %s2089_s21, %s3091_s10 }
 0x144   : > { %v1281_v46 = vpop.permute.xlu0 %1280  ;;  %v1175_v48 = vpop.permute.xlu2 %1174  ;;  %2189 = vmatpush.bf16.msra.mxu2 %v2125_v52  ;;  %1565 = vmatpush.bf16.msra.mxu0 %v2125_v52  ;;  %s2094_s27 = sshll.u32 %s681_s26, 1  ;;  %s2090_s30 = sshll.u32 %s681_s26, 2 }
 0x145   : > { %2190 = vmatpush.bf16.msra.mxu3 %v2125_v52  ;;  %v1375_v14 = vsel %vm1365_vm5, %v2494_v55, %v1175_v48  ;;  %s699_s17 = scalar_lea.vmem %s3068_s9, %s2094_s27  ;;  %s683_s19 = scalar_lea.vmem %s3066_s7, %s2090_s30 }
 0x146   : > { %s691_s16 = scalar_lea.vmem %s3067_s8, %s2090_s30 }
 0x149   : > { %v1169_v58 = vpop.permute.xlu1 %1168 }
 0x14a   : > { %v1369_v60 = vsel %vm1365_vm5, %v2542_v53, %v1169_v58 }
 0x14b   : > { %v1386_v51 = vsel %vm1382_vm6, %v1369_v60, %v1210_v39 }
 0x14c   : > { %v1287_v28 = vpop.permute.xlu0 %1286  ;;  %v1179_v0 = vpop.permute.xlu2 %1178  ;;  %v1403_v7 = vsel %vm1399_vm7, %v1386_v51, %v2794_v47 }
 0x14d   : > { %v1379_v3 = vsel %vm1365_vm5, %v2621_v15, %v1179_v0  ;;  %v1392_v15 = vsel %vm1382_vm6, %v1375_v14, %v2832_v17 }
 0x14e   : > { %v1396_v8 = vsel %vm1382_vm6, %v1379_v3, %v2815_v19  ;;  %v1409_v47 = vsel %vm1399_vm7, %v1392_v15, %v2740_v2 }
 0x14f   : > { %v2874_v53 = vsel %vm1399_vm7, %v1396_v8, %v2821_v20 }
 0x151   : > { %v1335_v11 = vpop.permute.xlu1 %1334 }
 0x154   : > { %v2878_v16 = vpop.permute.xlu0 %1351  ;;  %v1266_v21 = vpop.permute.xlu2 %1265 }
 0x159   : > { %v1268_v19 = vpop.permute.xlu1 %1267 }
 0x15a   : > { %v1426_v20 = vsel %vm1416_vm8, %v1409_v47, %v1268_v19 }
 0x15b   : > { %v1443_v24 = vsel %vm1433_vm9, %v1426_v20, %v1287_v28 }
 0x15c   : > { %v1171_v13 = vpop.permute.xlu0 %1170  ;;  %v1460_v55 = vsel %vm1450_vm10, %v1443_v24, %v2779_v5  ;;  %v1272_v54 = vpop.permute.xlu2 %1271 }
 0x15d   : > { %v1371_v25 = vsel %vm1365_vm5, %v2539_v49, %v1171_v13 }
 0x15e   : > { %v1388_v17 = vsel %vm1382_vm6, %v1371_v25, %v2772_v10 }
 0x15f   : > { %v1405_v2 = vsel %vm1399_vm7, %v1388_v17, %v2727_v43 }
 0x161   : > { %v1333_v63 = vpop.permute.xlu1 %1332 }
 0x164   : > { %v1264_v31 = vpop.permute.xlu0 %1263  ;;  %v1208_v34 = vpop.permute.xlu2 %1207 }
 0x165   : > { %v1422_v32 = vsel %vm1416_vm8, %v1405_v2, %v1264_v31 }
 0x166   : > { %v1439_v59 = vsel %vm1433_vm9, %v1422_v32, %v2823_v22 }
 0x167   : > { %v1456_v5 = vsel %vm1450_vm10, %v1439_v59, %v2748_v57 }
 0x168   : > { %v1473_v49 = vsel %vm1467_vm11, %v1456_v5, %v1335_v11 }
 0x169   : > { %v1490_v10 = vsel %vm1484_vm12, %v1473_v49, %v2787_v1  ;;  %v1339_v35 = vpop.permute.xlu1 %1338 }
 0x16a   : > { %2113 = vmatmul.msk.bf16.vlgmr.msra.gmra.mxu1 %vm1537_vm13, %v1490_v10  ;;  %v1477_v43 = vsel %vm1467_vm11, %v1460_v55, %v1339_v35 }
 0x16b   : > { %v1494_v36 = vsel %vm1484_vm12, %v1477_v43, %v2844_v40 }
 0x16c   : > { %v1262_v22 = vpop.permute.xlu0 %1261  ;;  %2115 = vmatmul.msk.bf16.vlgmr.msra.gmra.mxu2 %vm1537_vm13, %v1494_v36  ;;  %v1291_v39 = vpop.permute.xlu2 %1290 }
 0x16d   : > { %v1420_v57 = vsel %vm1416_vm8, %v1403_v7, %v1262_v22 }
 0x16e   : > { %v1437_v29 = vsel %vm1433_vm9, %v1420_v57, %v1281_v46 }
 0x171   : > { %v1177_v62 = vpop.permute.xlu1 %1176 }
 0x172   : > { %v1377_v19 = vsel %vm1365_vm5, %v2595_v56, %v1177_v62 }
 0x174   : > { %v1173_v41 = vpop.permute.xlu0 %1172  ;;  %v1312_v60 = vpop.permute.xlu2 %1311 }
 0x175   : > { %v1373_v1 = vsel %vm1365_vm5, %v2571_v30, %v1173_v41 }
 0x176   : > { %v1390_v42 = vsel %vm1382_vm6, %v1373_v1, %v2804_v37 }
 0x177   : > { %v1407_v27 = vsel %vm1399_vm7, %v1390_v42, %v2809_v4 }
 0x178   : > { %v1424_v40 = vsel %vm1416_vm8, %v1407_v27, %v1266_v21 }
 0x179   : > { %v1441_v12 = vsel %vm1433_vm9, %v1424_v40, %v2826_v26  ;;  %v1167_v48 = vpop.permute.xlu1 %1166 }
 0x17a   : > { %v1458_v46 = vsel %vm1450_vm10, %v1441_v12, %v2830_v50  ;;  %v1367_v52 = vsel %vm1365_vm5, %v2584_v45, %v1167_v48 }
 0x17b   : > { %v1384_v30 = vsel %vm1382_vm6, %v1367_v52, %v1208_v34 }
 0x17c   : > { %v1337_v58 = vpop.permute.xlu0 %1336  ;;  %v1401_v37 = vsel %vm1399_vm7, %v1384_v30, %v2760_v9 }
 0x17d   : > { %v1418_v4 = vsel %vm1416_vm8, %v1401_v37, %v2839_v38  ;;  %v1475_v9 = vsel %vm1467_vm11, %v1458_v46, %v1337_v58 }
 0x17e   : > { %v1435_v26 = vsel %vm1433_vm9, %v1418_v4, %v2796_v61  ;;  %v1343_v61 = vpop.permute.xlu2 %1342 }
 0x17f   : > { %v1452_v51 = vsel %vm1450_vm10, %v1435_v26, %v2781_v33  ;;  %v1454_v33 = vsel %vm1450_vm10, %v1437_v29, %v2758_v18 }
 0x180   : > { %v1469_v50 = vsel %vm1467_vm11, %v1452_v51, %v2854_v44  ;;  %v1430_v44 = vsel %vm1416_vm8, %v2874_v53, %v1272_v54 }
 0x181   : > { %v1218_v45 = vpop.permute.xlu1 %1217  ;;  %v1486_v28 = vsel %vm1484_vm12, %v1469_v50, %v2811_v6  ;;  %v1471_v6 = vsel %vm1467_vm11, %v1454_v33, %v1333_v63  ;;  %v1447_v8 = vsel %vm1433_vm9, %v1430_v44, %v1291_v39 }
 0x182   : > { %2111 = vmatmul.msk.bf16.vlgmr.msra.gmra.mxu0 %vm1537_vm13, %v1486_v28  ;;  %v1464_v11 = vsel %vm1450_vm10, %v1447_v8, %v1312_v60  ;;  %v1488_v47 = vsel %vm1484_vm12, %v1471_v6, %v2878_v16  ;;  %v1394_v53 = vsel %vm1382_vm6, %v1377_v19, %v1218_v45 }
 0x183   : > { %v1481_v21 = vsel %vm1467_vm11, %v1464_v11, %v1343_v61 }
 0x184   : > { %v1356_v0 = vpop.permute.xlu0 %1355 }
 0x185   : > { %v1492_v38 = vsel %vm1484_vm12, %v1475_v9, %v1356_v0 }
 0x186   : > { %2114 = vmatmul.msk.bf16.gmra.mxu1 %vm1537_vm13, %v1492_v38  ;;  %v1289_v14 = vpop.permute.xlu2 %1288 }
 0x189   : > { %v1239_v3 = vpop.permute.xlu1 %1238 }
 0x18a   : > { %v1411_v24 = vsel %vm1399_vm7, %v1394_v53, %v1239_v3 }
 0x18c   : > { %v1270_v7 = vpop.permute.xlu0 %1269 }
 0x18d   : > { %v1428_v13 = vsel %vm1416_vm8, %v1411_v24, %v1270_v7 }
 0x18e   : > { %v1445_v55 = vsel %vm1433_vm9, %v1428_v13, %v1289_v14  ;;  %v1360_v54 = vpop.permute.xlu2 %1359 }
 0x191   : > { %v1362_v15 = vpop.permute.xlu1 %1361 }
 0x192   : > { %2112 = vmatmul.msk.bf16.gmra.mxu0 %vm1537_vm13, %v1488_v47  ;;  %v1498_v18 = vsel %vm1484_vm12, %v1481_v21, %v1362_v15 }
 0x193   : > { %2117 = vmatmul.msk.bf16.vlgmr.msra.gmra.mxu3 %vm1537_vm13, %v1498_v18 }
 0x194   : > { %v1310_v20 = vpop.permute.xlu0 %1309 }
 0x195   : > { %v1462_v16 = vsel %vm1450_vm10, %v1445_v55, %v1310_v20 }
 0x196   : > { %v1243_v32 = vpop.permute.xlu2 %1242 }
 0x199   : > { %v1341_v25 = vpop.permute.xlu1 %1340 }
 0x19a   : > { %v1479_v56 = vsel %vm1467_vm11, %v1462_v16, %v1341_v25 }
 0x19b   : > { %v1496_v17 = vsel %vm1484_vm12, %v1479_v56, %v1360_v54 }
 0x19c   : > { %v1181_v63 = vpop.permute.xlu0 %1180  ;;  %2116 = vmatmul.msk.bf16.gmra.mxu2 %vm1537_vm13, %v1496_v17 }
 0x19d   : > { %v1381_v59 = vsel %vm1365_vm5, %v2634_v23, %v1181_v63 }
 0x19e   : > { %v1314_v36 = vpop.permute.xlu2 %1313 }
 0x1a1   : > { %v1222_v2 = vpop.permute.xlu1 %1221 }
 0x1a2   : > { %v1398_v5 = vsel %vm1382_vm6, %v1381_v59, %v1222_v2 }
 0x1a3   : > { %v1415_v34 = vsel %vm1399_vm7, %v1398_v5, %v1243_v32 }
 0x1a4   : > { %v1274_v31 = vpop.permute.xlu0 %1273 }
 0x1a5   : > { %v1432_v10 = vsel %vm1416_vm8, %v1415_v34, %v1274_v31 }
 0x1a9   : > { %v1293_v49 = vpop.permute.xlu1 %1292 }
 0x1aa   : > { %v1449_v35 = vsel %vm1433_vm9, %v1432_v10, %v1293_v49 }
 0x1ab   : > { %v1466_v22 = vsel %vm1450_vm10, %v1449_v35, %v1314_v36 }
 0x1ac   : > { %v1345_v43 = vpop.permute.xlu0 %1344 }
 0x1ad   : > { %v1483_v57 = vsel %vm1467_vm11, %v1466_v22, %v1345_v43 }
 0x1b1   : > { %v1364_v29 = vpop.permute.xlu1 %1363 }
 0x1b2   : > { %v1500_v62 = vsel %vm1484_vm12, %v1483_v57, %v1364_v29 }
 0x1b3   : > { %2118 = vmatmul.msk.bf16.gmra.mxu3 %vm1537_vm13, %v1500_v62 }
 0x1e7   : > { %v1577_v39 = vpop.f32.mrf.mxu1 }
 0x1e8   : > { %v1690_v28 = vmul.f32 %v1577_v39, %v1577_v39  ;;  %v1656_v3 = vsel %vm1365_vm5, %v1577_v39, 0.0 }
 0x1ea   : > { %v1709_v11 = vsel %vm1365_vm5, %v1690_v28, 0.0 }
 0x1ef   : > { %v1579_v1 = vpop.f32.mrf.mxu1  ;;  %v2972_v27 = vpop.f32.mrf.mxu2 }
 0x1f0   : > { %v1691_v7 = vmul.f32 %v1579_v1, %v1579_v1  ;;  %v1658_v14 = vsel %vm1365_vm5, %v1579_v1, 0.0  ;;  %v1694_v63 = vmul.f32 %v2972_v27, %v2972_v27  ;;  %v1664_v32 = vsel %vm1365_vm5, %v2972_v27, 0.0 }
 0x1f2   : > { %v1711_v19 = vsel %vm1365_vm5, %v1691_v7, 0.0  ;;  %v1717_v5 = vsel %vm1365_vm5, %v1694_v63, 0.0 }
 0x1f7   : > { %v2982_v33 = vpop.f32.mrf.mxu2 }
 0x1f8   : > { %v1695_v49 = vmul.f32 %v2982_v33, %v2982_v33  ;;  %v1666_v10 = vsel %vm1365_vm5, %v2982_v33, 0.0 }
 0x1fa   : > { %v1719_v36 = vsel %vm1365_vm5, %v1695_v49, 0.0 }
 0x1ff   : > { %v1567_v23 = vpop.f32.mrf.mxu0 }
 0x200   : > { %1607 = vxpose.xlu2.b32.start [1/16] (narrow) %v1567_v23, 8  ;;  %v1686_v12 = vmul.f32 %v1567_v23, %v1567_v23  ;;  %v1649_v52 = vsel %vm1365_vm5, %v1567_v23, 0.0 }
 0x202   : > { %v1702_v4 = vsel %vm1365_vm5, %v1686_v12, 0.0 }
 0x203   : > { %v1582_v30 = vpop.f32.mrf.mxu1 }
 0x204   : > { %v1692_v21 = vmul.f32 %v1582_v30, %v1582_v30  ;;  %v1660_v53 = vsel %vm1365_vm5, %v1582_v30, 0.0 }
 0x206   : > { %v1713_v13 = vsel %vm1365_vm5, %v1692_v21, 0.0 }
 0x207   : > { %v1569_v41 = vpop.f32.mrf.mxu0 }
 0x208   : > { %1608 = vxpose.xlu2.b32.cont [2/16] (narrow) %v1569_v41, 8  ;;  %v1687_v40 = vmul.f32 %v1569_v41, %v1569_v41  ;;  %v1650_v48 = vsel %vm1365_vm5, %v1569_v41, 0.0 }
 0x209   : > { %v1651_v37 = vadd.f32 %v1650_v48, %v1649_v52 }
 0x20a   : > { %v1703_v58 = vsel %vm1365_vm5, %v1687_v40, 0.0 }
 0x20b   : > { %v1704_v51 = vadd.f32 %v1703_v58, %v1702_v4  ;;  %v1584_v18 = vpop.f32.mrf.mxu1 }
 0x20c   : > { %v1693_v55 = vmul.f32 %v1584_v18, %v1584_v18  ;;  %v1662_v54 = vsel %vm1365_vm5, %v1584_v18, 0.0 }
 0x20e   : > { %v1715_v2 = vsel %vm1365_vm5, %v1693_v55, 0.0 }
 0x20f   : > { %v1572_v42 = vpop.f32.mrf.mxu0 }
 0x210   : > { %1609 = vxpose.xlu2.b32.cont [3/16] (narrow) %v1572_v42, 8  ;;  %v1688_v46 = vmul.f32 %v1572_v42, %v1572_v42  ;;  %v1652_v60 = vsel %vm1365_vm5, %v1572_v42, 0.0 }
 0x211   : > { %v1653_v50 = vadd.f32 %v1652_v60, %v1651_v37 }
 0x212   : > { %v1705_v26 = vsel %vm1365_vm5, %v1688_v46, 0.0 }
 0x213   : > { %v1706_v38 = vadd.f32 %v1705_v26, %v1704_v51 }
 0x216   : > { %v2993_v56 = vpop.f32.mrf.mxu3 }
 0x217   : > { %v1574_v45 = vpop.f32.mrf.mxu0  ;;  %v1698_v48 = vmul.f32 %v2993_v56, %v2993_v56  ;;  %v1672_v58 = vsel %vm1365_vm5, %v2993_v56, 0.0 }
 0x218   : > { %v1654_v9 = vsel %vm1365_vm5, %v1574_v45, 0.0  ;;  %v1689_v0 = vmul.f32 %v1574_v45, %v1574_v45  ;;  %1610 = vxpose.xlu2.b32.cont [4/16] (narrow) %v1574_v45, 8 }
 0x219   : > { %v1655_v61 = vadd.f32 %v1654_v9, %v1653_v50 }
 0x21a   : > { %v1707_v44 = vsel %vm1365_vm5, %v1689_v0, 0.0 }
 0x21b   : > { %v1657_v6 = vadd.f32 %v1656_v3, %v1655_v61  ;;  %v1708_v8 = vadd.f32 %v1707_v44, %v1706_v38 }
 0x21d   : > { %v1659_v15 = vadd.f32 %v1658_v14, %v1657_v6  ;;  %v1710_v47 = vadd.f32 %v1709_v11, %v1708_v8 }
 0x21e   : > { %v1599_v57 = vpop.f32.mrf.mxu3 }
 0x21f   : > { %v1712_v20 = vadd.f32 %v1711_v19, %v1710_v47  ;;  %v1661_v24 = vadd.f32 %v1660_v53, %v1659_v15  ;;  %v2990_v25 = vpop.f32.mrf.mxu2  ;;  %v1699_v37 = vmul.f32 %v1599_v57, %v1599_v57  ;;  %v1674_v51 = vsel %vm1365_vm5, %v1599_v57, 0.0 }
 0x220   : > { %1611 = vxpose.xlu2.b32.cont [5/16] (narrow) %v1577_v39, 8  ;;  %v1696_v22 = vmul.f32 %v2990_v25, %v2990_v25  ;;  %v1668_v62 = vsel %vm1365_vm5, %v2990_v25, 0.0 }
 0x221   : > { %v1714_v16 = vadd.f32 %v1713_v13, %v1712_v20  ;;  %v1663_v17 = vadd.f32 %v1662_v54, %v1661_v24  ;;  %v1727_v28 = vsel %vm1365_vm5, %v1699_v37, 0.0 }
 0x222   : > { %v1721_v41 = vsel %vm1365_vm5, %v1696_v22, 0.0 }
 0x223   : > { %v1716_v31 = vadd.f32 %v1715_v2, %v1714_v16  ;;  %v1665_v59 = vadd.f32 %v1664_v32, %v1663_v17 }
 0x225   : > { %v1718_v34 = vadd.f32 %v1717_v5, %v1716_v31  ;;  %v1667_v35 = vadd.f32 %v1666_v10, %v1665_v59 }
 0x227   : > { %v1594_v43 = vpop.f32.mrf.mxu2  ;;  %v1720_v29 = vadd.f32 %v1719_v36, %v1718_v34  ;;  %v1669_v39 = vadd.f32 %v1668_v62, %v1667_v35 }
 0x228   : > { %1612 = vxpose.xlu2.b32.cont [6/16] (narrow) %v1579_v1, 8  ;;  %v1697_v23 = vmul.f32 %v1594_v43, %v1594_v43  ;;  %v1670_v1 = vsel %vm1365_vm5, %v1594_v43, 0.0 }
 0x229   : > { %v1722_v42 = vadd.f32 %v1721_v41, %v1720_v29  ;;  %v1671_v12 = vadd.f32 %v1670_v1, %v1669_v39 }
 0x22a   : > { %v1723_v40 = vsel %vm1365_vm5, %v1697_v23, 0.0 }
 0x22b   : > { %v1724_v46 = vadd.f32 %v1723_v40, %v1722_v42  ;;  %v1673_v60 = vadd.f32 %v1672_v58, %v1671_v12 }
 0x22d   : > { %v1675_v45 = vadd.f32 %v1674_v51, %v1673_v60 }
 0x230   : > { %1613 = vxpose.xlu2.b32.cont [7/16] (narrow) %v1582_v30, 8  ;;  %v1725_v30 = vsel %vm1365_vm5, %v1698_v48, 0.0 }
 0x231   : > { %v1726_v26 = vadd.f32 %v1725_v30, %v1724_v46 }
 0x233   : > { %v1728_v38 = vadd.f32 %v1727_v28, %v1726_v26 }
 0x236   : > { %v1602_v52 = vpop.f32.mrf.mxu3 }
 0x237   : > { %v1700_v4 = vmul.f32 %v1602_v52, %v1602_v52  ;;  %v1676_v50 = vsel %vm1365_vm5, %v1602_v52, 0.0 }
 0x238   : > { %1614 = vxpose.xlu2.b32.cont [8/16] (narrow) %v1584_v18, 8  ;;  %v1677_v0 = vadd.f32 %v1676_v50, %v1675_v45 }
 0x239   : > { %v1729_v9 = vsel %vm1365_vm5, %v1700_v4, 0.0 }
 0x23a   : > { %v1730_v44 = vadd.f32 %v1729_v9, %v1728_v38 }
 0x23e   : > { %v1604_v61 = vpop.f32.mrf.mxu3 }
 0x23f   : > { %v1678_v3 = vsel %vm1365_vm5, %v1604_v61, 0.0  ;;  %v1701_v7 = vmul.f32 %v1604_v61, %v1604_v61 }
 0x240   : > { %v1679_v6 = vadd.f32 %v1678_v3, %v1677_v0  ;;  %1615 = vxpose.xlu2.b32.cont [9/16] (narrow) %v2972_v27, 8 }
 0x241   : > { %v1731_v8 = vsel %vm1365_vm5, %v1701_v7, 0.0 }
 0x242   : > { %v1680_v11 = vrot.slane %v1679_v6, 4  ;;  %v1732_v14 = vadd.f32 %v1731_v8, %v1730_v44 }
 0x244   : > { %v1681_v21 = vadd.f32 %v1680_v11, %v1679_v6  ;;  %v1733_v15 = vrot.slane %v1732_v14, 4 }
 0x246   : > { %v1682_v47 = vrot.slane %v1681_v21, 2  ;;  %v1734_v19 = vadd.f32 %v1733_v15, %v1732_v14 }
 0x248   : > { %v1683_v18 = vadd.f32 %v1682_v47, %v1681_v21  ;;  %v1735_v53 = vrot.slane %v1734_v19, 2  ;;  %1616 = vxpose.xlu2.b32.cont [10/16] (narrow) %v2982_v33, 8 }
 0x24a   : > { %v1684_v20 = vrot.slane %v1683_v18, 1  ;;  %v1736_v24 = vadd.f32 %v1735_v53, %v1734_v19 }
 0x24c   : > { %v1737_v27 = vrot.slane %v1736_v24, 1  ;;  %v1685_v13 = vadd.f32 %v1684_v20, %v1683_v18 }
 0x24e   : > { %v1738_v55 = vadd.f32 %v1737_v27, %v1736_v24 }
 0x250   : > { %1617 = vxpose.xlu2.b32.cont [11/16] (narrow) %v2990_v25, 8  ;;  %v1739_v16 = vsel %vm894_vm1, %v1685_v13, %v1738_v55 }
 0x251   : > { %1741 = vst.msk [vmem:[%s699_s17] sm:$0x3] %vm1740_vm14, %v1739_v16 }
 0x258   : > { %1618 = vxpose.xlu2.b32.cont [12/16] (narrow) %v1594_v43, 8 }
 0x260   : > { %1619 = vxpose.xlu2.b32.cont [13/16] (narrow) %v2993_v56, 8 }
 0x268   : > { %1620 = vxpose.xlu2.b32.cont [14/16] (narrow) %v1599_v57, 8 }
 0x270   : > { %1621 = vxpose.xlu2.b32.cont [15/16] (narrow) %v1602_v52, 8 }
 0x278   : > { %1622 = vxpose.xlu2.b32.end [16/16] (narrow) %v1604_v61, 8 }
 0x299   : > { %v1623_v33 = vpop.trf.xlu2 }
 0x29a   : > { %v1639_v54 = vpack.c.bf16 %v1623_v33, %v1623_v33  ;;  %1642 = vrot.lane.b32.xlu0 %v1623_v33, %s2336_s20 }
 0x29c   : > { %1640 = vst [vmem:[%s683_s19] sm:$0xf] %v1639_v54 }
 0x30c   : > { %v1643_v25 = vpop.permute.xlu0 %1642 }
 0x30d   : > { %v1645_v56 = vsel %vm1382_vm6, %v1623_v33, %v1643_v25 }
 0x30e   : > { %v1646_v17 = vpack.c.bf16 %v1645_v56, %v1645_v56 }
 0x310   : > { %1648 = vst.msk [vmem:[%s691_s16] sm:$0xf] %vm1647_vm15, %v1646_v17 }
 0x311 PF: > { %s20_s13 = sadd.s32 1, %s2328_s13   ;;  %s3070_s30 = smov %s2320_s11 }
 0x312   : > { %p17_p12 = scmp.ge.s32.totalorder %s20_s13, 6   ;;  %s3071_s10 = smov %s2324_s12 }
 0x313   : > { %s3072_s11 = smov %s3075_s14  ;;  %s3073_s12 = smov %s3079_s15 }
 0x314   :  { %19 = sbr.rel (!%p17_p12) target bundleno = 3 (0x3), region = 117 }

// kernel: up_forward.4
= control target key start
LH: loop header
LB: loop body
LE: loop exit
PB: predicated region body
PF: predicated region fallthrough
CT: control target
= control target key end

     0   :  { %s1828_s24 = smov 0   ;;  %s1830_s25 = smov 0   ;;  %s2354_s0 = inlined_call_operand.vmem [shape: bf16[2,2,8,128], index: 0, kind: input, shape index: {}]   ;;  %s2355_s1 = inlined_call_operand.vmem [shape: bf16[2,2,8,32], index: 1, kind: input, shape index: {}, may-alias: {1,2}]   ;;  %s2356_s2 = inlined_call_operand.vmem [shape: bf16[2,2,8,32], index: 2, kind: input, shape index: {}, may-alias: {1,2}]   ;;  %s2357_s3 = inlined_call_operand.vmem [shape: f32[8,1], index: 3, kind: input, shape index: {}]   ;;  %s2358_s4 = inlined_call_operand.vmem [shape: f32[8,1], index: 4, kind: input, shape index: {}]   ;;  %s2359_s5 = inlined_call_operand.vmem [shape: bf16[72,8], index: 5, kind: input, shape index: {}]   ;;  %s2360_s6 = inlined_call_operand.vmem [shape: f32[2,2,8,128], index: 6, kind: output, shape index: {0}]   ;;  %s2361_s7 = inlined_call_operand.vmem [shape: f32[2,2,2,8], index: 7, kind: output, shape index: {1}]  }
   0x1   :  { %s1832_s26 = smov 0   ;;  %s1834_s27 = smov 0  }
   0x2   :  { %s1836_s28 = smov 0  }
   0x3 LB: > { %s27_s29 = sadd.s32 1, %s1768_s26  ;;  %s30_s30 = sadd.s32 1, %s1772_s27  ;;  %s1776_s28 = sphi %s1836_s28, %s18_s28   ;;  %s1772_s27 = sphi %s1834_s27, %s2365_s27   ;;  %s1768_s26 = sphi %s1832_s26, %s2364_s26   ;;  %s1764_s25 = sphi %s1830_s25, %s2363_s25   ;;  %s1760_s24 = sphi %s1828_s24, %s2362_s24  }
   0x4   : > { %p28_p0 = scmp.ge.s32.totalorder %s27_s29, 2  ;;  %p1607_p1 = scmp.ge.s32.totalorder %s1776_s28, 1 }
   0x5   : > { %p315_p2 = scmp.lt.s32.totalorder %s1776_s28, 5 }
   0x6   : > { %s2367_s29 = smov (%p28_p0, %s27_s29), 0  ;;  %s2369_s30 = smov (!%p28_p0, %s30_s30), %s1772_s27 }
   0x7   : > { %p316_p3 = pnand %p1607_p1, %p315_p2  ;;  %p32_p4 = scmp.ge.s32.totalorder %s2369_s30, 2 }
   0x8   : > { %s1610_s12 = sadd.s32 (!%p316_p3), 4294967295, %s1764_s25  ;;  %s405_s13 = sadd.s32 (!%p316_p3), 1, %s1764_s25 }
   0x9   : > { %s2371_s30 = smov (%p32_p4, %s2369_s30), 0  ;;  %319 = sbr.rel (%p316_p3) target bundleno = 1060 (0x424), region = 44 }
   0xa   : > { %p392_p5 = scmp.gt.s32.totalorder (!%p316_p3), %s1610_s12, 0  ;;  %p383_p6 = scmp.lt.s32.totalorder (!%p316_p3), %s1760_s24, 1 }
   0xb   : > { %p406_p7 = scmp.lt.s32.totalorder (!%p316_p3), %s405_s13, 1  ;;  %p1611_p8 = scmp.lt.s32.totalorder (!%p316_p3), %s1610_s12, 1 }
   0xc   : > { %p385_p9 = scmp.lt.s32.totalorder (!%p316_p3), %s1764_s25, 1  ;;  %p436_p10 = scmp.gt.s32.totalorder (!%p316_p3), %s1764_s25, 0 }
   0xd   : > { %s1782_s20 = smov (!%p316_p3), 32   ;;  %s1783_s21 = smov (!%p316_p3), 112  }
   0xe   : > { %v442_v0 = vld [vmem:[%s2357_s3] sm:$0xff]  ;;  %v1778_v1 = vmov 0   ;;  %s2373_s12 = smov (!%p392_p5, %s1610_s12), 0  ;;  %s2375_s24 = smov (!%p383_p6, %s1760_s24), 1  ;;  %vm593_vm0 = vcmask 1040384   ;;  %vm881_vm1 = vcmask 1046528  }
   0xf   : > { %1725 = vset.pattern.permute.xlu0 %v1778_v1  ;;  %v443_v2 = vld [vmem:[%s2358_s4] sm:$0xff]  ;;  %s2377_s13 = smov (!%p406_p7, %s405_s13), 1  ;;  %s2379_s12 = smov (!%p1611_p8, %s2373_s12), 1  ;;  %vm768_vm2 = vsmask.f32 7424  ;;  %vm1064_vm3 = vcmask 64512  }
  0x10   : > { %450 = vperm.xlu0 %1725, %v442_v0   ;;  %s1608_s14 = sshll.u32 %s2375_s24, 1  ;;  %s2381_s13 = smov (!%p406_p7, %s2377_s13), 1  ;;  %vm1081_vm4 = vcmask 130048   ;;  %vm1098_vm5 = vcmask 195584   ;;  %vm1115_vm6 = vcmask 261120   ;;  %vm1132_vm7 = vcmask 326656  }
  0x11   : > { %s399_s15 = sadd.s32 %s2379_s12, %s1608_s14  ;;  %s413_s16 = sadd.s32 %s1608_s14, %s2381_s13  ;;  %vm1149_vm8 = vcmask 392192   ;;  %vm1166_vm9 = vcmask 457728   ;;  %vm1183_vm10 = vcmask 523264   ;;  %vm1253_vm11 = vcmask 1043456  }
  0x12   : > { %s1617_s17 = sshll.u32 %s399_s15, 2  ;;  %s1622_s19 = sshll.u32 %s413_s16, 2  ;;  %vm1236_vm12 = vcmask 588800   ;;  %vm1430_vm13 = vcmask 58368  }
  0x13   : > { %s386_s18 = scalar_select %p385_p9, %s1764_s25, 1 }
  0x14   : > { %s401_s22 = scalar_lea.vmem %s2355_s1, %s1617_s17  ;;  %s415_s9 = scalar_lea.vmem %s2356_s2, %s1622_s19 }
  0x15   : > { %s1878_s10 = sadd.s32 %s1608_s14, %s386_s18  ;;  %v444_v3 = vld [vmem:[%s401_s22] sm:$0xf]  ;;  %s1779_s16 = smov 24  }
  0x16   : > { %v445_v4 = vld [vmem:[%s415_s9] sm:$0xf]  ;;  %s1609_s24 = sshll.u32 %s1878_s10, 2  ;;  %v493_v5 = vunpack.c.l.bf16 %v444_v3  ;;  %s1780_s17 = smov 40  }
  0x17   : > { %v535_v6 = vunpack.c.l.bf16 %v445_v4  ;;  %s390_s13 = scalar_lea.vmem %s2354_s0, %s1609_s24  ;;  %s1781_s19 = smov 16  }
  0x18   : > { %456 = vperm.xlu0 %1725, %v443_v2   ;;  %v446_v8 = vld [vmem:[%s390_s13] sm:$0xf]  ;;  %s440_s15 = scalar_select %p385_p9, 1, 0 }
  0x19   : > { %v447_v11 = vunpack.c.l.bf16 %v446_v8  ;;  %s437_s18 = scalar_select %p436_p10, 1, 0 }
  0x1a   : > { %s441_s14 = scvt.s32.f32 %s440_s15  ;;  %s1784_s22 = smov 8  }
  0x1b   : > { %s438_s25 = scvt.s32.f32 %s437_s18  ;;  %s1785_s23 = smov 48  }
  0x1c   : > { %v539_v16 = vstv %s441_s14  ;;  %s1786_s8 = smov 64   ;;  %s1787_s9 = smov 56  }
  0x82   : > { %v451_v7 = vpop.permute.xlu0 %450 }
  0x83   : > { %v1884_v9 = vmul.f32 %v493_v5, %v451_v7  ;;  %v536_v10 = vmul.f32 %v535_v6, %v451_v7  ;;  %v453_v12 = vmul.f32 %v451_v7, %v447_v11  ;;  %v497_v7 = vstv %s438_s25 }
  0x8a   : > { %v457_v13 = vpop.permute.xlu0 %456 }
  0x8b   : > { %v537_v14 = vadd.f32 %v536_v10, %v457_v13  ;;  %v459_v15 = vadd.f32 %v457_v13, %v453_v12  ;;  %v495_v63 = vadd.f32 %v1884_v9, %v457_v13 }
  0x8d   : > { %v538_v17 = vmax.f32 %v537_v14, 0.0  ;;  %v460_v18 = vmax.f32 %v459_v15, 0.0  ;;  %v496_v3 = vmax.f32 %v495_v63, 0.0 }
  0x8f   : > { %461 = vxpose.xlu1.b32.start.end [1/1] (short) %v460_v18, 128  ;;  %v1888_v19 = vmul.f32 %v539_v16, %v538_v17  ;;  %v498_v13 = vmul.f32 %v497_v7, %v496_v3 }
 0x133   : > { %v477_v20 = vpop.trf.xlu1 }
 0x134   : > { %v597_v21 = vrot.slane %v477_v20, 7 }
 0x136   : > { %v655_v22 = vsel %vm593_vm0, 0.0, %v597_v21 }
 0x137   : > { %v677_v23 = vpack.c.bf16 %v655_v22, %v655_v22 }
 0x139   : > { %v722_v28 = vunpack.c.l.b16 %v677_v23 }
 0x13b   : > { %v478_v24 = vpop.trf.xlu1 }
 0x13c   : > { %v598_v25 = vrot.slane %v478_v24, 7 }
 0x13e   : > { %v599_v26 = vsel %vm593_vm0, %v597_v21, %v598_v25  ;;  %v665_v27 = vsel %vm593_vm0, %v598_v25, 0.0 }
 0x13f   : > { %v678_v29 = vpack.c.bf16 %v599_v26, %v599_v26  ;;  %v679_v30 = vpack.c.bf16 %v665_v27, %v665_v27 }
 0x141   : > { %v723_v31 = vunpack.c.l.b16 %v678_v29  ;;  %v753_v32 = vunpack.c.l.b16 %v679_v30 }
 0x143   : > { %v1893_v33 = vpack.c.b16 %v723_v31, %v722_v28  ;;  %v761_v34 = vpack.c.b16 %v753_v32, %v753_v32  ;;  %v479_v35 = vpop.trf.xlu1 }
 0x144   : > { %v600_v36 = vrot.slane %v479_v35, 7 }
 0x145   : > { %927 = vrot.lane.b32.xlu0 %v1893_v33, %s1779_s16  ;;  %v886_v37 = vrot.slane %v761_v34, 1  ;;  %v885_v38 = vrot.slane %v1893_v33, 1  ;;  %v784_v46 = vshll.u32 %v1893_v33, 16  ;;  %v789_v52 = vshll.u32 %v761_v34, 16 }
 0x146   : > { %v656_v39 = vsel %vm593_vm0, 0.0, %v600_v36  ;;  %v782_v53 = vshrl.u32 %v1893_v33, 16 }
 0x147   : > { %v887_v40 = vsel %vm881_vm1, %v885_v38, %v886_v37  ;;  %v680_v41 = vpack.c.bf16 %v656_v39, %v656_v39  ;;  %v786_v54 = vrot.slane %v784_v46, 1  ;;  %v791_v61 = vrot.slane %v789_v52, 1 }
 0x149   : > { %v724_v47 = vunpack.c.l.b16 %v680_v41  ;;  %v787_v60 = vor.u32 %v786_v54, %v782_v53 }
 0x14b   : > { %v480_v42 = vpop.trf.xlu1  ;;  %v792_v1 = vsel %vm768_vm2, %v787_v60, %v791_v61 }
 0x14c   : > { %v601_v43 = vrot.slane %v480_v42, 7 }
 0x14d   : > { %977 = vrot.lane.b32.xlu0 %v887_v40, %s1780_s17 }
 0x14e   : > { %v602_v44 = vsel %vm593_vm0, %v600_v36, %v601_v43  ;;  %v666_v45 = vsel %vm593_vm0, %v601_v43, 0.0 }
 0x14f   : > { %v681_v48 = vpack.c.bf16 %v602_v44, %v602_v44  ;;  %v682_v49 = vpack.c.bf16 %v666_v45, %v666_v45 }
 0x151   : > { %v725_v50 = vunpack.c.l.b16 %v681_v48  ;;  %v754_v51 = vunpack.c.l.b16 %v682_v49 }
 0x153   : > { %v1906_v55 = vpack.c.b16 %v725_v50, %v724_v47  ;;  %v1908_v56 = vpack.c.b16 %v754_v51, %v754_v51  ;;  %v481_v57 = vpop.trf.xlu1 }
 0x154   : > { %v603_v58 = vrot.slane %v481_v57, 7 }
 0x155   : > { %908 = vrot.lane.b32.xlu0 %v887_v40, %s1781_s19  ;;  %929 = vrot.lane.b32.xlu2 %v1906_v55, %s1779_s16  ;;  %v889_v59 = vrot.slane %v1908_v56, 1  ;;  %v888_v62 = vrot.slane %v1906_v55, 1  ;;  %v796_v51 = vshll.u32 %v1906_v55, 16  ;;  %v801_v54 = vshll.u32 %v1908_v56, 16 }
 0x156   : > { %v657_v0 = vsel %vm593_vm0, 0.0, %v603_v58 }
 0x157   : > { %v1919_v2 = vsel %vm881_vm1, %v888_v62, %v889_v59  ;;  %v683_v4 = vpack.c.bf16 %v657_v0, %v657_v0  ;;  %v798_v59 = vrot.slane %v796_v51, 1  ;;  %v803_v0 = vrot.slane %v801_v54, 1 }
 0x159   : > { %v726_v10 = vunpack.c.l.b16 %v683_v4 }
 0x15b   : > { %v482_v5 = vpop.trf.xlu1 }
 0x15c   : > { %v604_v6 = vrot.slane %v482_v5, 7 }
 0x15d   : > { %958 = vrot.lane.b32.xlu0 %v792_v1, %s1782_s20  ;;  %979 = vrot.lane.b32.xlu2 %v1919_v2, %s1780_s17 }
 0x15e   : > { %v605_v8 = vsel %vm593_vm0, %v603_v58, %v604_v6  ;;  %v667_v9 = vsel %vm593_vm0, %v604_v6, 0.0  ;;  %v794_v58 = vshrl.u32 %v1906_v55, 16 }
 0x15f   : > { %v684_v11 = vpack.c.bf16 %v605_v8, %v605_v8  ;;  %v685_v12 = vpack.c.bf16 %v667_v9, %v667_v9 }
 0x160   : > { %v799_v63 = vor.u32 %v798_v59, %v794_v58 }
 0x161   : > { %v727_v14 = vunpack.c.l.b16 %v684_v11  ;;  %v755_v15 = vunpack.c.l.b16 %v685_v12  ;;  %500 = vrot.lane.b32.xlu1 %v498_v13, %s1783_s21 }
 0x162   : > { %v804_v4 = vsel %vm768_vm2, %v799_v63, %v803_v0 }
 0x163   : > { %v1926_v16 = vpack.c.b16 %v727_v14, %v726_v10  ;;  %v763_v17 = vpack.c.b16 %v755_v15, %v755_v15  ;;  %v483_v18 = vpop.trf.xlu1 }
 0x164   : > { %v606_v20 = vrot.slane %v483_v18, 7 }
 0x165   : > { %867 = vrot.lane.b32.xlu0 %v792_v1, %s1784_s22  ;;  %1000 = vrot.lane.b32.xlu2 %v1926_v16, %s1785_s23  ;;  %v892_v21 = vrot.slane %v763_v17, 1  ;;  %v891_v22 = vrot.slane %v1926_v16, 1  ;;  %v808_v23 = vshll.u32 %v1926_v16, 16  ;;  %v813_v25 = vshll.u32 %v763_v17, 16 }
 0x166   : > { %v658_v24 = vsel %vm593_vm0, 0.0, %v606_v20  ;;  %v806_v27 = vshrl.u32 %v1926_v16, 16 }
 0x167   : > { %v1935_v26 = vsel %vm881_vm1, %v891_v22, %v892_v21  ;;  %v810_v28 = vrot.slane %v808_v23, 1  ;;  %v686_v29 = vpack.c.bf16 %v658_v24, %v658_v24  ;;  %v815_v36 = vrot.slane %v813_v25, 1 }
 0x169   : > { %v811_v35 = vor.u32 %v810_v28, %v806_v27  ;;  %v728_v37 = vunpack.c.l.b16 %v686_v29 }
 0x16b   : > { %v484_v30 = vpop.trf.xlu1  ;;  %v1945_v42 = vsel %vm768_vm2, %v811_v35, %v815_v36 }
 0x16c   : > { %v607_v31 = vrot.slane %v484_v30, 7 }
 0x16d   : > { %998 = vrot.lane.b32.xlu0 %v1906_v55, %s1785_s23  ;;  %1050 = vrot.lane.b32.xlu2 %v1935_v26, %s1786_s8 }
 0x16e   : > { %v608_v32 = vsel %vm593_vm0, %v606_v20, %v607_v31  ;;  %v668_v34 = vsel %vm593_vm0, %v607_v31, 0.0 }
 0x16f   : > { %v687_v38 = vpack.c.bf16 %v608_v32, %v608_v32  ;;  %v688_v39 = vpack.c.bf16 %v668_v34, %v668_v34 }
 0x171   : > { %v729_v40 = vunpack.c.l.b16 %v687_v38  ;;  %v756_v41 = vunpack.c.l.b16 %v688_v39 }
 0x173   : > { %v1947_v43 = vpack.c.b16 %v729_v40, %v728_v37  ;;  %v1949_v44 = vpack.c.b16 %v756_v41, %v756_v41  ;;  %v485_v45 = vpop.trf.xlu1 }
 0x174   : > { %v609_v46 = vrot.slane %v485_v45, 7 }
 0x175   : > { %v895_v47 = vrot.slane %v1949_v44, 1  ;;  %1048 = vrot.lane.b32.xlu0 %v1919_v2, %s1786_s8  ;;  %1031 = vrot.lane.b32.xlu2 %v1945_v42, %s1787_s9  ;;  %v894_v48 = vrot.slane %v1947_v43, 1  ;;  %v825_v58 = vshll.u32 %v1949_v44, 16  ;;  %v818_v63 = vshrl.u32 %v1947_v43, 16 }
 0x176   : > { %v659_v50 = vsel %vm593_vm0, 0.0, %v609_v46 }
 0x177   : > { %v896_v49 = vsel %vm881_vm1, %v894_v48, %v895_v47  ;;  %v689_v52 = vpack.c.bf16 %v659_v50, %v659_v50  ;;  %v820_v50 = vshll.u32 %v1947_v43, 16 }
 0x178   : > { %983 = vrot.lane.b32.xlu1 %v896_v49, %s1780_s17 }
 0x179   : > { %v730_v61 = vunpack.c.l.b16 %v689_v52  ;;  %v822_v0 = vrot.slane %v820_v50, 1 }
 0x17b   : > { %v1961_v53 = vpop.trf.xlu1 }
 0x17c   : > { %v610_v57 = vrot.slane %v1961_v53, 7 }
 0x17d   : > { %910 = vrot.lane.b32.xlu0 %v1919_v2, %s1781_s19  ;;  %1002 = vrot.lane.b32.xlu2 %v1947_v43, %s1785_s23 }
 0x17e   : > { %v611_v60 = vsel %vm593_vm0, %v609_v46, %v610_v57 }
 0x17f   : > { %v690_v62 = vpack.c.bf16 %v611_v60, %v611_v60 }
 0x181   : > { %v731_v56 = vunpack.c.l.b16 %v690_v62 }
 0x183   : > { %v1973_v1 = vpack.c.b16 %v731_v56, %v730_v61  ;;  %v487_v3 = vpop.trf.xlu1 }
 0x184   : > { %v612_v27 = vrot.slane %v487_v3, 7 }
 0x185   : > { %1029 = vrot.lane.b32.xlu0 %v804_v4, %s1787_s9  ;;  %914 = vrot.lane.b32.xlu2 %v896_v49, %s1781_s19 }
 0x186   : > { %v660_v35 = vsel %vm593_vm0, 0.0, %v612_v27 }
 0x187   : > { %v692_v39 = vpack.c.bf16 %v660_v35, %v660_v35  ;;  %v832_v35 = vshll.u32 %v1973_v1, 16 }
 0x189   : > { %v732_v52 = vunpack.c.l.b16 %v692_v39 }
 0x18b   : > { %v488_v2 = vpop.trf.xlu1 }
 0x18c   : > { %v613_v28 = vrot.slane %v488_v2, 7  ;;  %v827_v2 = vrot.slane %v825_v58, 1 }
 0x18d   : > { %869 = vrot.lane.b32.xlu0 %v804_v4, %s1784_s22  ;;  %1052 = vrot.lane.b32.xlu2 %v896_v49, %s1786_s8 }
 0x18e   : > { %v670_v32 = vsel %vm593_vm0, %v613_v28, 0.0  ;;  %v614_v36 = vsel %vm593_vm0, %v612_v27, %v613_v28 }
 0x18f   : > { %v694_v38 = vpack.c.bf16 %v670_v32, %v670_v32  ;;  %v693_v40 = vpack.c.bf16 %v614_v36, %v614_v36 }
 0x191   : > { %v758_v49 = vunpack.c.l.b16 %v694_v38  ;;  %v733_v54 = vunpack.c.l.b16 %v693_v40  ;;  %v834_v40 = vrot.slane %v832_v35, 1 }
 0x193   : > { %v489_v5 = vpop.trf.xlu1  ;;  %v2021_v61 = vpack.c.b16 %v758_v49, %v758_v49  ;;  %v2028_v56 = vpack.c.b16 %v733_v54, %v732_v52 }
 0x194   : > { %v615_v46 = vrot.slane %v489_v5, 7 }
 0x195   : > { %960 = vrot.lane.b32.xlu0 %v804_v4, %s1782_s20  ;;  %v901_v5 = vrot.slane %v2021_v61, 1  ;;  %v849_v52 = vshll.u32 %v2021_v61, 16  ;;  %v842_v54 = vshrl.u32 %v2028_v56, 16 }
 0x196   : > { %v661_v59 = vsel %vm593_vm0, 0.0, %v615_v46 }
 0x197   : > { %v695_v3 = vpack.c.bf16 %v661_v59, %v661_v59 }
 0x19b   : > { %v490_v6 = vpop.trf.xlu1 }
 0x19c   : > { %v616_v47 = vrot.slane %v490_v6, 7 }
 0x19d   : > { %931 = vrot.lane.b32.xlu0 %v1926_v16, %s1779_s16 }
 0x19e   : > { %v671_v51 = vsel %vm593_vm0, %v616_v47, 0.0  ;;  %v617_v60 = vsel %vm593_vm0, %v615_v46, %v616_v47 }
 0x19f   : > { %v697_v62 = vpack.c.bf16 %v671_v51, %v671_v51  ;;  %v696_v44 = vpack.c.bf16 %v617_v60, %v617_v60  ;;  %v844_v51 = vshll.u32 %v2028_v56, 16 }
 0x1a1   : > { %v759_v6 = vunpack.c.l.b16 %v697_v62  ;;  %v846_v58 = vrot.slane %v844_v51, 1 }
 0x1a3   : > { %v491_v7 = vpop.trf.xlu1 }
 0x1a4   : > { %v618_v8 = vrot.slane %v491_v7, 7  ;;  %v823_v7 = vor.u32 %v822_v0, %v818_v63  ;;  %v847_v63 = vor.u32 %v846_v58, %v842_v54  ;;  %v851_v0 = vrot.slane %v849_v52, 1 }
 0x1a5   : > { %981 = vrot.lane.b32.xlu0 %v1935_v26, %s1780_s17 }
 0x1a6   : > { %v662_v9 = vsel %vm593_vm0, 0.0, %v618_v8 }
 0x1a7   : > { %v698_v10 = vpack.c.bf16 %v662_v9, %v662_v9  ;;  %v734_v9 = vunpack.c.l.b16 %v695_v3 }
 0x1a9   : > { %v924_v15 = vunpack.c.l.b16 %v698_v10  ;;  %v735_v10 = vunpack.c.l.b16 %v696_v44  ;;  %v2094_v44 = vsel %vm768_vm2, %v847_v63, %v851_v0 }
 0x1ab   : > { %v492_v11 = vpop.trf.xlu1 }
 0x1ac   : > { %v619_v12 = vrot.slane %v492_v11, 7  ;;  %v2032_v11 = vpack.c.b16 %v759_v6, %v759_v6 }
 0x1ad   : > { %912 = vrot.lane.b32.xlu0 %v1935_v26, %s1781_s19 }
 0x1ae   : > { %v620_v13 = vsel %vm593_vm0, %v618_v8, %v619_v12  ;;  %v672_v14 = vsel %vm593_vm0, %v619_v12, 0.0  ;;  %v900_v8 = vrot.slane %v2028_v56, 1  ;;  %v828_v12 = vsel %vm768_vm2, %v823_v7, %v827_v2 }
 0x1af   : > { %v699_v17 = vpack.c.bf16 %v620_v13, %v620_v13  ;;  %v700_v18 = vpack.c.bf16 %v672_v14, %v672_v14  ;;  %v2041_v14 = vpack.c.b16 %v735_v10, %v734_v9  ;;  %v1208_v9 = vld [vmem:[%s2359_s5 + $0x20] sm:$0xf]  ;;  %v861_v54 = vshll.u32 %v2032_v11, 16 }
 0x1b0   : > { %v2036_v13 = vsel %vm881_vm1, %v900_v8, %v901_v5  ;;  %v1226_v10 = vunpack.c.l.b16 %v1208_v9 }
 0x1b1   : > { %v925_v20 = vunpack.c.l.b16 %v699_v17  ;;  %v944_v21 = vunpack.c.l.b16 %v700_v18  ;;  %v904_v17 = vrot.slane %v2032_v11, 1  ;;  %v903_v18 = vrot.slane %v2041_v14, 1 }
 0x1b2   : > { %v856_v52 = vshll.u32 %v2041_v14, 16  ;;  %v854_v58 = vshrl.u32 %v2041_v14, 16 }
 0x1b3   : > { %v1990_v22 = vpack.c.b16 %v925_v20, %v924_v15  ;;  %v945_v23 = vpack.c.b16 %v944_v21, %v944_v21 }
 0x1b5   : > { %v954_v24 = vshll.u32 %v945_v23, 16  ;;  %962 = vrot.lane.b32.xlu0 %v1945_v42, %s1782_s20  ;;  %1010 = vrot.lane.b32.xlu1 %v1990_v22, %s1785_s23  ;;  %v947_v25 = vshrl.u32 %v1990_v22, 16  ;;  %v949_v26 = vshll.u32 %v1990_v22, 16  ;;  %v975_v41 = vrot.slane %v945_v23, 1 }
 0x1b6   : > { %v974_v45 = vrot.slane %v1990_v22, 1  ;;  %v2049_v23 = vsel %vm881_vm1, %v903_v18, %v904_v17 }
 0x1b7   : > { %v1998_v29 = vpop.permute.xlu0 %927  ;;  %v951_v30 = vrot.slane %v949_v26, 1  ;;  %v956_v31 = vrot.slane %v954_v24, 1  ;;  %v930_v26 = vpop.permute.xlu2 %929 }
 0x1b9   : > { %v952_v34 = vor.u32 %v951_v30, %v947_v25 }
 0x1bb   : > { %v2004_v37 = vsel %vm768_vm2, %v952_v34, %v956_v31 }
 0x1bd   : > { %871 = vrot.lane.b32.xlu0 %v1945_v42, %s1784_s22  ;;  %1041 = vrot.lane.b32.xlu1 %v2004_v37, %s1787_s9  ;;  %v2016_v42 = vsel %vm881_vm1, %v974_v45, %v975_v41 }
 0x1bf   : > { %v2011_v48 = vpop.permute.xlu0 %977  ;;  %v980_v38 = vpop.permute.xlu2 %979 }
 0x1c5   : > { %933 = vrot.lane.b32.xlu0 %v1947_v43, %s1779_s16  ;;  %1060 = vrot.lane.b32.xlu1 %v2016_v42, %s1786_s8 }
 0x1c7   : > { %v909_v4 = vpop.permute.xlu0 %908  ;;  %v1001_v49 = vpop.permute.xlu2 %1000 }
 0x1cd   : > { %873 = vrot.lane.b32.xlu0 %v828_v12, %s1784_s22  ;;  %987 = vrot.lane.b32.xlu1 %v2036_v13, %s1780_s17 }
 0x1cf   : > { %v2043_v15 = vpop.permute.xlu0 %958  ;;  %v1051_v60 = vpop.permute.xlu2 %1050 }
 0x1d3   : > { %v501_v20 = vpop.permute.xlu1 %500 }
 0x1d4   : > { %v1726_v21 = vpack.i.bf16 %v1888_v19, %v501_v20  ;;  %v669_v19 = vsel %vm593_vm0, %v610_v57, 0.0  ;;  %v897_v57 = vrot.slane %v1973_v1, 1  ;;  %v1658_v20 = vld [vmem:[%s2359_s5 + $0x18] sm:$0xff] }
 0x1d5   : > { %1033 = vrot.lane.b32.xlu0 %v828_v12, %s1787_s9  ;;  %1058 = vrot.lane.b32.xlu1 %v2049_v23, %s1786_s8  ;;  %v691_v30 = vpack.c.bf16 %v669_v19, %v669_v19  ;;  %v1655_v19 = vld [vmem:[%s2359_s5] sm:$0xff] }
 0x1d6   : > { %1727 = vxpose.xlu2.b32.start.end [1/1] (short) (narrow) %v1726_v21, 16  ;;  %v1657_v21 = vld [vmem:[%s2359_s5 + $0x10] sm:$0xff] }
 0x1d7   : > { %v868_v24 = vpop.permute.xlu0 %867  ;;  %v757_v32 = vunpack.c.l.b16 %v691_v30 }
 0x1d8   : > { %v1068_v25 = vsel %vm1064_vm3, %v1893_v33, %v868_v24 }
 0x1d9   : > { %v1085_v27 = vsel %vm1081_vm4, %v1068_v25, %v909_v4  ;;  %v765_v34 = vpack.c.b16 %v757_v32, %v757_v32  ;;  %v1656_v25 = vld [vmem:[%s2359_s5 + $0x8] sm:$0xff] }
 0x1da   : > { %v1102_v28 = vsel %vm1098_vm5, %v1085_v27, %v930_v26 }
 0x1db   : > { %v898_v53 = vrot.slane %v765_v34, 1  ;;  %v837_v36 = vshll.u32 %v765_v34, 16 }
 0x1dd   : > { %964 = vrot.lane.b32.xlu0 %v828_v12, %s1782_s20  ;;  %941 = vrot.lane.b32.xlu1 %v1990_v22, %s1779_s16  ;;  %v2073_v39 = vsel %vm881_vm1, %v897_v57, %v898_v53  ;;  %v830_v22 = vshrl.u32 %v1973_v1, 16  ;;  %v839_v46 = vrot.slane %v837_v36, 1  ;;  %v1231_v12 = vpack.c.b16 %v1226_v10, %v1226_v10 }
 0x1df   : > { %v2064_v31 = vpop.permute.xlu0 %998  ;;  %v835_v45 = vor.u32 %v834_v40, %v830_v22  ;;  %v1255_v17 = vsel %vm1253_vm11, %v1231_v12, 0 }
 0x1e0   : > { %1659 = vmatpush.bf16.msra.mxu1 %v1255_v17  ;;  %1660 = vmatpush.bf16.msra.mxu2 %v1255_v17 }
 0x1e1   : > { %v2079_v47 = vsel %vm768_vm2, %v835_v45, %v839_v46  ;;  %1661 = vmatpush.bf16.msra.mxu3 %v1255_v17  ;;  %1260 = vmatpush.bf16.msra.mxu0 %v1255_v17 }
 0x1e4   : > { %1662 = vmatpush.bf16.msra.mxu1 %v1658_v20  ;;  %1663 = vmatpush.bf16.msra.mxu2 %v1658_v20 }
 0x1e5   : > { %935 = vrot.lane.b32.xlu0 %v1973_v1, %s1779_s16  ;;  %1664 = vmatpush.bf16.msra.mxu3 %v1658_v20 }
 0x1e6   : > { %1261 = vmatpush.bf16.msra.mxu0 %v1658_v20 }
 0x1e7   : > { %v2068_v33 = vpop.permute.xlu0 %1048 }
 0x1e8   : > { %1665 = vmatpush.bf16.msra.mxu1 %v1657_v21  ;;  %1666 = vmatpush.bf16.msra.mxu2 %v1657_v21 }
 0x1e9   : > { %1667 = vmatpush.bf16.msra.mxu3 %v1657_v21 }
 0x1ea   : > { %1262 = vmatpush.bf16.msra.mxu0 %v1657_v21 }
 0x1ec   : > { %1668 = vmatpush.bf16.msra.mxu1 %v1656_v25  ;;  %1669 = vmatpush.bf16.msra.mxu2 %v1656_v25 }
 0x1ed   : > { %985 = vrot.lane.b32.xlu0 %v2073_v39, %s1780_s17  ;;  %1670 = vmatpush.bf16.msra.mxu3 %v1656_v25 }
 0x1ee   : > { %1263 = vmatpush.bf16.msra.mxu0 %v1656_v25 }
 0x1ef   : > { %v911_v41 = vpop.permute.xlu0 %910 }
 0x1f0   : > { %1671 = vmatpush.bf16.msra.mxu1 %v1655_v19  ;;  %1672 = vmatpush.bf16.msra.mxu2 %v1655_v19 }
 0x1f1   : > { %1673 = vmatpush.bf16.msra.mxu3 %v1655_v19 }
 0x1f2   : > { %1264 = vmatpush.bf16.msra.mxu0 %v1655_v19 }
 0x1f5   : > { %966 = vrot.lane.b32.xlu0 %v2079_v47, %s1782_s20 }
 0x1f7   : > { %v2083_v50 = vpop.permute.xlu0 %1029 }
 0x1fd   : > { %1006 = vrot.lane.b32.xlu0 %v2028_v56, %s1785_s23 }
 0x1ff   : > { %v870_v59 = vpop.permute.xlu0 %869 }
 0x200   : > { %v1070_v62 = vsel %vm1064_vm3, %v1906_v55, %v870_v59  ;;  %v1032_v55 = vpop.permute.xlu2 %1031  ;;  %v858_v59 = vrot.slane %v856_v52, 1 }
 0x201   : > { %v1087_v3 = vsel %vm1081_vm4, %v1070_v62, %v911_v41  ;;  %v863_v62 = vrot.slane %v861_v54, 1 }
 0x205   : > { %1037 = vrot.lane.b32.xlu0 %v2094_v44, %s1787_s9 }
 0x207   : > { %v961_v61 = vpop.permute.xlu0 %960 }
 0x208   : > { %v1119_v4 = vsel %vm1115_vm6, %v1102_v28, %v961_v61  ;;  %v1003_v32 = vpop.permute.xlu2 %1002 }
 0x209   : > { %v1136_v2 = vsel %vm1132_vm7, %v1119_v4, %v980_v38 }
 0x20a   : > { %v1153_v5 = vsel %vm1149_vm8, %v1136_v2, %v1001_v49 }
 0x20b   : > { %v1170_v6 = vsel %vm1166_vm9, %v1153_v5, %v1032_v55 }
 0x20c   : > { %v2103_v7 = vsel %vm1183_vm10, %v1170_v6, %v1051_v60  ;;  %v859_v60 = vor.u32 %v858_v59, %v854_v58 }
 0x20d   : > { %989 = vrot.lane.b32.xlu0 %v2049_v23, %s1780_s17 }
 0x20e   : > { %v2154_v63 = vsel %vm768_vm2, %v859_v60, %v863_v62 }
 0x20f   : > { %v932_v8 = vpop.permute.xlu0 %931 }
 0x210   : > { %v2126_v57 = vpop.permute.xlu2 %914  ;;  %v1104_v36 = vsel %vm1098_vm5, %v1087_v3, %v932_v8 }
 0x217   : > { %v982_v18 = vpop.permute.xlu0 %981 }
 0x21f   : > { %v913_v24 = vpop.permute.xlu0 %912 }
 0x227   : > { %v963_v26 = vpop.permute.xlu0 %962 }
 0x228   : > { %v1121_v38 = vsel %vm1115_vm6, %v1104_v36, %v963_v26 }
 0x229   : > { %v1138_v22 = vsel %vm1132_vm7, %v1121_v38, %v982_v18 }
 0x22a   : > { %v1155_v40 = vsel %vm1149_vm8, %v1138_v22, %v1003_v32 }
 0x22f   : > { %v872_v27 = vpop.permute.xlu0 %871 }
 0x230   : > { %v1072_v28 = vsel %vm1064_vm3, %v1926_v16, %v872_v27  ;;  %v1053_v16 = vpop.permute.xlu2 %1052 }
 0x231   : > { %v1089_v30 = vsel %vm1081_vm4, %v1072_v28, %v913_v24 }
 0x237   : > { %v934_v34 = vpop.permute.xlu0 %933 }
 0x238   : > { %v1106_v53 = vsel %vm1098_vm5, %v1089_v30, %v934_v34 }
 0x23f   : > { %v2128_v35 = vpop.permute.xlu0 %873 }
 0x240   : > { %v1074_v62 = vsel %vm1064_vm3, %v1947_v43, %v2128_v35 }
 0x247   : > { %v1034_v41 = vpop.permute.xlu0 %1033  ;;  %1004 = vrot.lane.b32.xlu2 %v1973_v1, %s1785_s23 }
 0x248   : > { %v1172_v45 = vsel %vm1166_vm9, %v1155_v40, %v1034_v41 }
 0x249   : > { %v1189_v46 = vsel %vm1183_vm10, %v1172_v45, %v1053_v16 }
 0x24a   : > { %1645 = vmatmul.msk.bf16.vlgmr.msra.gmra.mxu1 %vm1236_vm12, %v1189_v46 }
 0x24f   : > { %v965_v49 = vpop.permute.xlu0 %964  ;;  %1056 = vrot.lane.b32.xlu2 %v2036_v13, %s1786_s8 }
 0x250   : > { %v2142_v51 = vsel %vm1115_vm6, %v1106_v53, %v965_v49 }
 0x257   : > { %918 = vrot.lane.b32.xlu2 %v2036_v13, %s1781_s19  ;;  %v936_v24 = vpop.permute.xlu0 %935 }
 0x25f   : > { %877 = vrot.lane.b32.xlu2 %v2094_v44, %s1784_s22  ;;  %v986_v49 = vpop.permute.xlu0 %985 }
 0x267   : > { %939 = vrot.lane.b32.xlu2 %v2041_v14, %s1779_s16  ;;  %v967_v59 = vpop.permute.xlu0 %966 }
 0x26f   : > { %970 = vrot.lane.b32.xlu2 %v2154_v63, %s1782_s20  ;;  %v1728_v13 = vpop.trf.xlu2  ;;  %v1007_v60 = vpop.permute.xlu0 %1006 }
 0x270   : > { %v1732_v0 = vunpack.i.h.bf16 %v1728_v13  ;;  %v1729_v3 = vunpack.i.l.bf16 %v1728_v13  ;;  %v984_v13 = vpop.permute.xlu1 %983 }
 0x272   : > { %v621_v61 = vrot.slane %v1732_v0, 7  ;;  %v594_v4 = vrot.slane %v1729_v3, 7  ;;  %v1140_v3 = vsel %vm1132_vm7, %v2142_v51, %v984_v13 }
 0x274   : > { %v663_v2 = vsel %vm593_vm0, 0.0, %v621_v61  ;;  %v654_v5 = vsel %vm593_vm0, 0.0, %v594_v4 }
 0x275   : > { %v701_v9 = vpack.c.bf16 %v663_v2, %v663_v2  ;;  %v674_v12 = vpack.c.bf16 %v654_v5, %v654_v5 }
 0x277   : > { %v1733_v11 = vpop.trf.xlu2  ;;  %v995_v26 = vunpack.c.l.b16 %v701_v9  ;;  %v720_v28 = vunpack.c.l.b16 %v674_v12  ;;  %v1038_v35 = vpop.permute.xlu0 %1037 }
 0x278   : > { %v1737_v55 = vunpack.i.h.bf16 %v1733_v11  ;;  %v1734_v6 = vunpack.i.l.bf16 %v1733_v11 }
 0x27a   : > { %v622_v8 = vrot.slane %v1737_v55, 7  ;;  %v595_v10 = vrot.slane %v1734_v6, 7 }
 0x27c   : > { %v623_v17 = vsel %vm593_vm0, %v621_v61, %v622_v8  ;;  %v596_v18 = vsel %vm593_vm0, %v594_v4, %v595_v10  ;;  %v664_v20 = vsel %vm593_vm0, %v595_v10, 0.0 }
 0x27d   : > { %v702_v21 = vpack.c.bf16 %v623_v17, %v623_v17  ;;  %v675_v25 = vpack.c.bf16 %v596_v18, %v596_v18  ;;  %v676_v19 = vpack.c.bf16 %v664_v20, %v664_v20  ;;  %v1011_v18 = vpop.permute.xlu1 %1010 }
 0x27f   : > { %v996_v27 = vunpack.c.l.b16 %v702_v21  ;;  %v721_v30 = vunpack.c.l.b16 %v675_v25  ;;  %v752_v32 = vunpack.c.l.b16 %v676_v19 }
 0x281   : > { %v2163_v34 = vpack.c.b16 %v996_v27, %v995_v26  ;;  %v2165_v53 = vpack.c.b16 %v721_v30, %v720_v28  ;;  %v760_v36 = vpack.c.b16 %v752_v32, %v752_v32  ;;  %v990_v32 = vpop.permute.xlu0 %989 }
 0x283   : > { %1012 = vrot.lane.b32.xlu1 %v2163_v34, %s1785_s23  ;;  %v882_v38 = vrot.slane %v2165_v53, 1  ;;  %v883_v22 = vrot.slane %v760_v36, 1  ;;  %v772_v40 = vshll.u32 %v2165_v53, 16  ;;  %v777_v41 = vshll.u32 %v760_v36, 16 }
 0x284   : > { %v770_v45 = vshrl.u32 %v2165_v53, 16  ;;  %v1020_v9 = vshll.u32 %v2163_v34, 16  ;;  %v1018_v12 = vshrl.u32 %v2163_v34, 16  ;;  %v1045_v25 = vrot.slane %v2163_v34, 1 }
 0x285   : > { %v884_v16 = vsel %vm881_vm1, %v882_v38, %v883_v22  ;;  %v774_v46 = vrot.slane %v772_v40, 1  ;;  %v779_v54 = vrot.slane %v777_v41, 1  ;;  %v1042_v26 = vpop.permute.xlu1 %1041 }
 0x286   : > { %906 = vrot.lane.b32.xlu0 %v884_v16, %s1781_s19  ;;  %v1022_v10 = vrot.slane %v1020_v9, 1 }
 0x287   : > { %v775_v52 = vor.u32 %v774_v46, %v770_v45 }
 0x288   : > { %v1023_v21 = vor.u32 %v1022_v10, %v1018_v12 }
 0x289   : > { %v780_v58 = vsel %vm768_vm2, %v775_v52, %v779_v54 }
 0x28a   : > { %865 = vrot.lane.b32.xlu2 %v780_v58, %s1784_s22 }
 0x28d   : > { %v1061_v22 = vpop.permute.xlu1 %1060 }
 0x28e   : > { %875 = vrot.lane.b32.xlu0 %v2079_v47, %s1784_s22 }
 0x292   : > { %1035 = vrot.lane.b32.xlu2 %v2079_v47, %s1787_s9  ;;  %v1091_v47 = vsel %vm1081_vm4, %v1074_v62, %v2126_v57  ;;  %v673_v57 = vsel %vm593_vm0, %v622_v8, 0.0 }
 0x296   : > { %916 = vrot.lane.b32.xlu0 %v2073_v39, %s1781_s19 }
 0x29a   : > { %1054 = vrot.lane.b32.xlu2 %v2073_v39, %s1786_s8  ;;  %v1108_v39 = vsel %vm1098_vm5, %v1091_v47, %v936_v24 }
 0x29b   : > { %v1125_v43 = vsel %vm1115_vm6, %v1108_v39, %v967_v59 }
 0x29c   : > { %v1142_v4 = vsel %vm1132_vm7, %v1125_v43, %v986_v49 }
 0x29d   : > { %v1159_v51 = vsel %vm1149_vm8, %v1142_v4, %v1007_v60 }
 0x29e   : > { %937 = vrot.lane.b32.xlu0 %v2028_v56, %s1779_s16  ;;  %v1176_v11 = vsel %vm1166_vm9, %v1159_v51, %v1038_v35  ;;  %s1626_s16 = sshll.u32 %s1878_s10, 1 }
 0x2a1   : > { %v1005_v0 = vpop.permute.xlu2 %1004 }
 0x2a2   : > { %v1157_v61 = vsel %vm1149_vm8, %v1140_v3, %v1005_v0  ;;  %968 = vrot.lane.b32.xlu2 %v2094_v44, %s1782_s20  ;;  %v703_v44 = vpack.c.bf16 %v673_v57, %v673_v57 }
 0x2a4   : > { %v1015_v5 = vunpack.c.l.b16 %v703_v44 }
 0x2a6   : > { %1008 = vrot.lane.b32.xlu0 %v2041_v14, %s1785_s23  ;;  %v1016_v8 = vpack.c.b16 %v1015_v5, %v1015_v5 }
 0x2a8   : > { %v1025_v17 = vshll.u32 %v1016_v8, 16 }
 0x2a9   : > { %v1057_v2 = vpop.permute.xlu2 %1056 }
 0x2aa   : > { %v1193_v55 = vsel %vm1183_vm10, %v1176_v11, %v1057_v2  ;;  %1039 = vrot.lane.b32.xlu2 %v2154_v63, %s1787_s9 }
 0x2ab   : > { %1647 = vmatmul.msk.bf16.vlgmr.msra.gmra.mxu2 %vm1236_vm12, %v1193_v55 }
 0x2ae   : > { %879 = vrot.lane.b32.xlu0 %v2154_v63, %s1784_s22  ;;  %v1027_v63 = vrot.slane %v1025_v17, 1  ;;  %s1624_s22 = sshll.u32 %s1878_s10, 3 }
 0x2b0   : > { %v1028_v24 = vsel %vm768_vm2, %v1023_v21, %v1027_v63 }
 0x2b1   : > { %v919_v6 = vpop.permute.xlu2 %918 }
 0x2b2   : > { %920 = vrot.lane.b32.xlu2 %v2049_v23, %s1781_s19  ;;  %v1046_v23 = vrot.slane %v1016_v8, 1 }
 0x2b6   : > { %972 = vrot.lane.b32.xlu0 %v2004_v37, %s1782_s20  ;;  %v1047_v37 = vsel %vm881_vm1, %v1045_v25, %v1046_v23  ;;  %s434_s20 = scalar_lea.vmem %s2361_s7, %s1626_s16 }
 0x2b9   : > { %v878_v20 = vpop.permute.xlu2 %877 }
 0x2ba   : > { %991 = vrot.lane.b32.xlu2 %v2016_v42, %s1780_s17  ;;  %v1078_v27 = vsel %vm1064_vm3, %v2028_v56, %v878_v20 }
 0x2bb   : > { %v1095_v28 = vsel %vm1081_vm4, %v1078_v27, %v919_v6 }
 0x2be   : > { %1043 = vrot.lane.b32.xlu0 %v1028_v24, %s1787_s9  ;;  %s426_s9 = scalar_lea.vmem %s2360_s6, %s1624_s22 }
 0x2c1   : > { %v940_v19 = vpop.permute.xlu2 %939 }
 0x2c2   : > { %1062 = vrot.lane.b32.xlu2 %v1047_v37, %s1786_s8  ;;  %v1112_v42 = vsel %vm1098_vm5, %v1095_v28, %v940_v19 }
 0x2c7   : > { %v1276_v24 = vpop.f32.mrf.mxu1 }
 0x2c9   : > { %v971_v30 = vpop.permute.xlu2 %970 }
 0x2ca   : > { %v1129_v34 = vsel %vm1115_vm6, %v1112_v42, %v971_v30 }
 0x2cb   : > { %v1146_v36 = vsel %vm1132_vm7, %v1129_v34, %v990_v32 }
 0x2cc   : > { %v1163_v38 = vsel %vm1149_vm8, %v1146_v36, %v1011_v18 }
 0x2cd   : > { %v1180_v40 = vsel %vm1166_vm9, %v1163_v38, %v1042_v26 }
 0x2ce   : > { %v1197_v41 = vsel %vm1183_vm10, %v1180_v40, %v1061_v22 }
 0x2cf   : > { %1649 = vmatmul.msk.bf16.vlgmr.msra.gmra.mxu3 %vm1236_vm12, %v1197_v41  ;;  %v1278_v19 = vpop.f32.mrf.mxu1 }
 0x2e4   : > { %v866_v56 = vpop.permute.xlu2 %865 }
 0x2e5   : > { %v1066_v52 = vsel %vm1064_vm3, %v2165_v53, %v866_v56 }
 0x2ec   : > { %v1036_v16 = vpop.permute.xlu2 %1035 }
 0x2ed   : > { %v1174_v45 = vsel %vm1166_vm9, %v1157_v61, %v1036_v16  ;;  %v988_v61 = vpop.permute.xlu1 %987 }
 0x2f4   : > { %v1055_v46 = vpop.permute.xlu2 %1054 }
 0x2f5   : > { %v1191_v49 = vsel %vm1183_vm10, %v1174_v45, %v1055_v46  ;;  %v1059_v51 = vpop.permute.xlu1 %1058 }
 0x2f6   : > { %1646 = vmatmul.msk.bf16.gmra.mxu1 %vm1236_vm12, %v1191_v49  ;;  %v1380_v49 = vmul.f32 %v1276_v24, %v1276_v24 }
 0x2f8   : > { %v907_v54 = vpop.permute.xlu0 %906 }
 0x2f9   : > { %v1083_v58 = vsel %vm1081_vm4, %v1066_v52, %v907_v54 }
 0x2fa   : > { %v1100_v59 = vsel %vm1098_vm5, %v1083_v58, %v1998_v29 }
 0x2fb   : > { %v1117_v60 = vsel %vm1115_vm6, %v1100_v59, %v2043_v15  ;;  %v1346_v59 = vsel %vm1064_vm3, %v1276_v24, 0.0 }
 0x2fc   : > { %v1134_v62 = vsel %vm1132_vm7, %v1117_v60, %v2011_v48  ;;  %v969_v29 = vpop.permute.xlu2 %968 }
 0x2fd   : > { %v1151_v13 = vsel %vm1149_vm8, %v1134_v62, %v2064_v31  ;;  %v942_v44 = vpop.permute.xlu1 %941 }
 0x2fe   : > { %v1168_v0 = vsel %vm1166_vm9, %v1151_v13, %v2083_v50 }
 0x2ff   : > { %v1185_v53 = vsel %vm1183_vm10, %v1168_v0, %v2068_v33  ;;  %v1399_v0 = vsel %vm1064_vm3, %v1380_v49, 0.0 }
 0x300   : > { %v876_v3 = vpop.permute.xlu0 %875  ;;  %1643 = vmatmul.msk.bf16.vlgmr.msra.gmra.mxu0 %vm1236_vm12, %v1185_v53  ;;  %v1381_v53 = vmul.f32 %v1278_v19, %v1278_v19 }
 0x301   : > { %v1076_v15 = vsel %vm1064_vm3, %v1973_v1, %v876_v3 }
 0x304   : > { %v1040_v50 = vpop.permute.xlu2 %1039 }
 0x305   : > { %v1013_v12 = vpop.permute.xlu1 %1012 }
 0x308   : > { %v917_v47 = vpop.permute.xlu0 %916 }
 0x309   : > { %v1093_v48 = vsel %vm1081_vm4, %v1076_v15, %v917_v47  ;;  %v1348_v47 = vsel %vm1064_vm3, %v1278_v19, 0.0 }
 0x310   : > { %v938_v39 = vpop.permute.xlu0 %937  ;;  %1644 = vmatmul.msk.bf16.gmra.mxu0 %vm1236_vm12, %v2103_v7  ;;  %v921_v7 = vpop.permute.xlu2 %920 }
 0x311   : > { %v1110_v31 = vsel %vm1098_vm5, %v1093_v48, %v938_v39 }
 0x312   : > { %v1127_v33 = vsel %vm1115_vm6, %v1110_v31, %v969_v29 }
 0x313   : > { %v1144_v35 = vsel %vm1132_vm7, %v1127_v33, %v988_v61  ;;  %v1401_v61 = vsel %vm1064_vm3, %v1381_v53, 0.0 }
 0x318   : > { %v1009_v43 = vpop.permute.xlu0 %1008  ;;  %v992_v5 = vpop.permute.xlu2 %991 }
 0x319   : > { %v1161_v4 = vsel %vm1149_vm8, %v1144_v35, %v1009_v43 }
 0x31a   : > { %v1178_v11 = vsel %vm1166_vm9, %v1161_v4, %v1040_v50 }
 0x31b   : > { %v1195_v1 = vsel %vm1183_vm10, %v1178_v11, %v1059_v51 }
 0x31c   : > { %1648 = vmatmul.msk.bf16.gmra.mxu2 %vm1236_vm12, %v1195_v1 }
 0x320   : > { %v880_v57 = vpop.permute.xlu0 %879  ;;  %v1063_v20 = vpop.permute.xlu2 %1062 }
 0x321   : > { %v1080_v2 = vsel %vm1064_vm3, %v2041_v14, %v880_v57 }
 0x322   : > { %v1097_v55 = vsel %vm1081_vm4, %v1080_v2, %v921_v7 }
 0x323   : > { %v1114_v9 = vsel %vm1098_vm5, %v1097_v55, %v942_v44 }
 0x328   : > { %v973_v6 = vpop.permute.xlu0 %972 }
 0x329   : > { %v1131_v8 = vsel %vm1115_vm6, %v1114_v9, %v973_v6 }
 0x32a   : > { %v1148_v10 = vsel %vm1132_vm7, %v1131_v8, %v992_v5 }
 0x32b   : > { %v1165_v18 = vsel %vm1149_vm8, %v1148_v10, %v1013_v12 }
 0x32e   : > { %v2274_v26 = vpop.f32.mrf.mxu2 }
 0x32f   : > { %v1384_v7 = vmul.f32 %v2274_v26, %v2274_v26  ;;  %v1354_v55 = vsel %vm1064_vm3, %v2274_v26, 0.0 }
 0x330   : > { %v1044_v17 = vpop.permute.xlu0 %1043 }
 0x331   : > { %v1182_v21 = vsel %vm1166_vm9, %v1165_v18, %v1044_v17  ;;  %v1407_v5 = vsel %vm1064_vm3, %v1384_v7, 0.0 }
 0x332   : > { %v1199_v14 = vsel %vm1183_vm10, %v1182_v21, %v1063_v20 }
 0x333   : > { %1650 = vmatmul.msk.bf16.gmra.mxu3 %vm1236_vm12, %v1199_v14 }
 0x336   : > { %v2285_v62 = vpop.f32.mrf.mxu2 }
 0x337   : > { %v1385_v6 = vmul.f32 %v2285_v62, %v2285_v62  ;;  %v1356_v10 = vsel %vm1064_vm3, %v2285_v62, 0.0 }
 0x339   : > { %v1409_v18 = vsel %vm1064_vm3, %v1385_v6, 0.0 }
 0x352   : > { %v2294_v4 = vpop.f32.mrf.mxu3 }
 0x35a   : > { %v1298_v12 = vpop.f32.mrf.mxu3 }
 0x373   : > { %v1281_v16 = vpop.f32.mrf.mxu1 }
 0x374   : > { %v1382_v15 = vmul.f32 %v1281_v16, %v1281_v16  ;;  %v1350_v31 = vsel %vm1064_vm3, %v1281_v16, 0.0 }
 0x376   : > { %v1403_v43 = vsel %vm1064_vm3, %v1382_v15, 0.0 }
 0x37b   : > { %v1283_v39 = vpop.f32.mrf.mxu1 }
 0x37c   : > { %v1383_v35 = vmul.f32 %v1283_v39, %v1283_v39  ;;  %v1352_v11 = vsel %vm1064_vm3, %v1283_v39, 0.0 }
 0x37d   : > { %v1266_v63 = vpop.f32.mrf.mxu0 }
 0x37e   : > { %1306 = vxpose.xlu1.b32.start [1/16] (narrow) %v1266_v63, 8  ;;  %v1376_v27 = vmul.f32 %v1266_v63, %v1266_v63  ;;  %v1339_v30 = vsel %vm1064_vm3, %v1266_v63, 0.0  ;;  %v1405_v57 = vsel %vm1064_vm3, %v1383_v35, 0.0 }
 0x380   : > { %v1392_v38 = vsel %vm1064_vm3, %v1376_v27, 0.0 }
 0x385   : > { %v1268_v25 = vpop.f32.mrf.mxu0 }
 0x386   : > { %1307 = vxpose.xlu1.b32.cont [2/16] (narrow) %v1268_v25, 8  ;;  %v1377_v37 = vmul.f32 %v1268_v25, %v1268_v25  ;;  %v1340_v28 = vsel %vm1064_vm3, %v1268_v25, 0.0 }
 0x387   : > { %v1341_v36 = vadd.f32 %v1340_v28, %v1339_v30  ;;  %v1388_v28 = vmul.f32 %v2294_v4, %v2294_v4 }
 0x388   : > { %v1393_v32 = vsel %vm1064_vm3, %v1377_v37, 0.0 }
 0x389   : > { %v1394_v40 = vadd.f32 %v1393_v32, %v1392_v38  ;;  %v1362_v32 = vsel %vm1064_vm3, %v2294_v4, 0.0  ;;  %v1389_v38 = vmul.f32 %v1298_v12, %v1298_v12 }
 0x38d   : > { %v1271_v23 = vpop.f32.mrf.mxu0 }
 0x38e   : > { %1308 = vxpose.xlu1.b32.cont [3/16] (narrow) %v1271_v23, 8  ;;  %v1378_v42 = vmul.f32 %v1271_v23, %v1271_v23  ;;  %v1342_v34 = vsel %vm1064_vm3, %v1271_v23, 0.0 }
 0x38f   : > { %v1343_v41 = vadd.f32 %v1342_v34, %v1341_v36  ;;  %v1415_v36 = vsel %vm1064_vm3, %v1388_v28, 0.0 }
 0x390   : > { %v1395_v22 = vsel %vm1064_vm3, %v1378_v42, 0.0 }
 0x391   : > { %v1396_v52 = vadd.f32 %v1395_v22, %v1394_v40 }
 0x395   : > { %v1273_v56 = vpop.f32.mrf.mxu0 }
 0x396   : > { %v1344_v45 = vsel %vm1064_vm3, %v1273_v56, 0.0  ;;  %v1379_v46 = vmul.f32 %v1273_v56, %v1273_v56  ;;  %1309 = vxpose.xlu1.b32.cont [4/16] (narrow) %v1273_v56, 8 }
 0x397   : > { %v1345_v54 = vadd.f32 %v1344_v45, %v1343_v41  ;;  %v1364_v41 = vsel %vm1064_vm3, %v1298_v12, 0.0  ;;  %v1417_v45 = vsel %vm1064_vm3, %v1389_v38, 0.0 }
 0x398   : > { %v1397_v58 = vsel %vm1064_vm3, %v1379_v46, 0.0 }
 0x399   : > { %v1398_v60 = vadd.f32 %v1397_v58, %v1396_v52  ;;  %v1347_v13 = vadd.f32 %v1346_v59, %v1345_v54 }
 0x39b   : > { %v1400_v3 = vadd.f32 %v1399_v0, %v1398_v60  ;;  %v1349_v29 = vadd.f32 %v1348_v47, %v1347_v13 }
 0x39d   : > { %v1402_v48 = vadd.f32 %v1401_v61, %v1400_v3  ;;  %v1351_v50 = vadd.f32 %v1350_v31, %v1349_v29 }
 0x39e   : > { %1310 = vxpose.xlu1.b32.cont [5/16] (narrow) %v1276_v24, 8 }
 0x39f   : > { %v2291_v33 = vpop.f32.mrf.mxu2  ;;  %v1404_v51 = vadd.f32 %v1403_v43, %v1402_v48  ;;  %v1353_v1 = vadd.f32 %v1352_v11, %v1351_v50 }
 0x3a0   : > { %v1386_v20 = vmul.f32 %v2291_v33, %v2291_v33  ;;  %v1358_v63 = vsel %vm1064_vm3, %v2291_v33, 0.0 }
 0x3a1   : > { %v1406_v2 = vadd.f32 %v1405_v57, %v1404_v51  ;;  %v1355_v44 = vadd.f32 %v1354_v55, %v1353_v1 }
 0x3a2   : > { %v1411_v23 = vsel %vm1064_vm3, %v1386_v20, 0.0 }
 0x3a3   : > { %v1408_v9 = vadd.f32 %v1407_v5, %v1406_v2  ;;  %v1357_v17 = vadd.f32 %v1356_v10, %v1355_v44 }
 0x3a5   : > { %v1410_v14 = vadd.f32 %v1409_v18, %v1408_v9  ;;  %v1359_v25 = vadd.f32 %v1358_v63, %v1357_v17 }
 0x3a6   : > { %1311 = vxpose.xlu1.b32.cont [6/16] (narrow) %v1278_v19, 8 }
 0x3a7   : > { %v1293_v8 = vpop.f32.mrf.mxu2  ;;  %v1412_v37 = vadd.f32 %v1411_v23, %v1410_v14 }
 0x3a8   : > { %v1387_v21 = vmul.f32 %v1293_v8, %v1293_v8  ;;  %v1360_v24 = vsel %vm1064_vm3, %v1293_v8, 0.0 }
 0x3a9   : > { %v1361_v27 = vadd.f32 %v1360_v24, %v1359_v25 }
 0x3aa   : > { %v1413_v19 = vsel %vm1064_vm3, %v1387_v21, 0.0 }
 0x3ab   : > { %v1414_v42 = vadd.f32 %v1413_v19, %v1412_v37  ;;  %v1363_v34 = vadd.f32 %v1362_v32, %v1361_v27 }
 0x3ad   : > { %v1416_v40 = vadd.f32 %v1415_v36, %v1414_v42 }
 0x3ae   : > { %1312 = vxpose.xlu1.b32.cont [7/16] (narrow) %v1281_v16, 8  ;;  %v1365_v16 = vadd.f32 %v1364_v41, %v1363_v34 }
 0x3af   : > { %v1418_v52 = vadd.f32 %v1417_v45, %v1416_v40 }
 0x3b6   : > { %1313 = vxpose.xlu1.b32.cont [8/16] (narrow) %v1283_v39, 8  ;;  %v1301_v30 = vpop.f32.mrf.mxu3 }
 0x3b7   : > { %v1390_v22 = vmul.f32 %v1301_v30, %v1301_v30  ;;  %v1366_v56 = vsel %vm1064_vm3, %v1301_v30, 0.0 }
 0x3b8   : > { %v1367_v49 = vadd.f32 %v1366_v56, %v1365_v16 }
 0x3b9   : > { %v1419_v46 = vsel %vm1064_vm3, %v1390_v22, 0.0 }
 0x3ba   : > { %v1420_v60 = vadd.f32 %v1419_v46, %v1418_v52 }
 0x3be   : > { %1314 = vxpose.xlu1.b32.cont [9/16] (narrow) %v2274_v26, 8  ;;  %v1303_v54 = vpop.f32.mrf.mxu3 }
 0x3bf   : > { %v1368_v58 = vsel %vm1064_vm3, %v1303_v54, 0.0  ;;  %v1391_v59 = vmul.f32 %v1303_v54, %v1303_v54 }
 0x3c0   : > { %v1369_v13 = vadd.f32 %v1368_v58, %v1367_v49 }
 0x3c1   : > { %v1421_v0 = vsel %vm1064_vm3, %v1391_v59, 0.0 }
 0x3c2   : > { %v1370_v53 = vrot.slane %v1369_v13, 4  ;;  %v1422_v3 = vadd.f32 %v1421_v0, %v1420_v60 }
 0x3c4   : > { %v1371_v47 = vadd.f32 %v1370_v53, %v1369_v13  ;;  %v1423_v29 = vrot.slane %v1422_v3, 4 }
 0x3c6   : > { %v1372_v61 = vrot.slane %v1371_v47, 2  ;;  %v1424_v15 = vadd.f32 %v1423_v29, %v1422_v3  ;;  %1315 = vxpose.xlu1.b32.cont [10/16] (narrow) %v2285_v62, 8 }
 0x3c8   : > { %v1373_v39 = vadd.f32 %v1372_v61, %v1371_v47  ;;  %v1425_v48 = vrot.slane %v1424_v15, 2 }
 0x3ca   : > { %v1374_v26 = vrot.slane %v1373_v39, 1  ;;  %v1426_v31 = vadd.f32 %v1425_v48, %v1424_v15 }
 0x3cc   : > { %v1427_v50 = vrot.slane %v1426_v31, 1  ;;  %v1375_v43 = vadd.f32 %v1374_v26, %v1373_v39 }
 0x3ce   : > { %v1428_v35 = vadd.f32 %v1427_v50, %v1426_v31  ;;  %1316 = vxpose.xlu1.b32.cont [11/16] (narrow) %v2291_v33, 8 }
 0x3d0   : > { %v1429_v51 = vsel %vm593_vm0, %v1375_v43, %v1428_v35 }
 0x3d1   : > { %1431 = vst.msk [vmem:[%s434_s20] sm:$0x3] %vm1430_vm13, %v1429_v51 }
 0x3d6   : > { %1317 = vxpose.xlu1.b32.cont [12/16] (narrow) %v1293_v8, 8 }
 0x3de   : > { %1318 = vxpose.xlu1.b32.cont [13/16] (narrow) %v2294_v4, 8 }
 0x3e6   : > { %1319 = vxpose.xlu1.b32.cont [14/16] (narrow) %v1298_v12, 8 }
 0x3ee   : > { %1320 = vxpose.xlu1.b32.cont [15/16] (narrow) %v1301_v30, 8 }
 0x3f6   : > { %1321 = vxpose.xlu1.b32.end [16/16] (narrow) %v1303_v54, 8 }
 0x422   : > { %v1322_v62 = vpop.trf.xlu1 }
 0x423   : > { %1338 = vst [vmem:[%s426_s9] sm:$0xff] %v1322_v62 }
 0x424 PF: > { %s18_s28 = sadd.s32 1, %s1776_s28   ;;  %s2362_s24 = smov %s1768_s26 }
 0x425   : > { %p15_p11 = scmp.ge.s32.totalorder %s18_s28, 6   ;;  %s2363_s25 = smov %s1772_s27 }
 0x426   : > { %s2364_s26 = smov %s2367_s29  ;;  %s2365_s27 = smov %s2371_s30 }
 0x427   :  { %17 = sbr.rel (!%p15_p11) target bundleno = 3 (0x3), region = 92 }

</bundles_post_ra>
